<compile_context>
chip_gen: v7x
topology: tpu7x:2x2x1
jax: 0.10.0
libtpu: 0.0.40
codegen_flags: <defaults>
</compile_context>

<pallas_src>
import functools

import jax
import jax.numpy as jnp
from jax.experimental import pallas as pl
from jax.experimental.pallas import tpu as pltpu

BN_EPS = 1e-5
_VMEM_LIMIT = 32 * 1024 * 1024      # explicit scoped-VMEM budget (safe on v5e/v6e/v7x)


# ---------------------------------------------------------------------------
# BlockSpec helpers: one batch element per grid step; broadcast for weights.
# ---------------------------------------------------------------------------
def _batch_spec(shape):
    n_rest = len(shape) - 1
    return pl.BlockSpec((None,) + tuple(shape[1:]),
                        lambda b, _n=n_rest: (b,) + (0,) * _n)


def _bcast_spec(shape):
    n = len(shape)
    return pl.BlockSpec(tuple(shape), lambda b, _n=n: (0,) * _n)


# ---------------------------------------------------------------------------
# Kernel 1: CCA_Threefeature gate, applied at LOW resolution.
#   scale   = sigmoid([mean(s1) | mean(s2) | mean(x_low)] @ W_fused + b_fused)
#   att_low = relu(x_low * scale)        (nearest upsample commutes with gate)
# ---------------------------------------------------------------------------
def _spatial_mean(v):                       # (H, W, C) -> (1, C), f32
    v = v.astype(jnp.float32)
    return jnp.mean(jnp.mean(v, axis=0), axis=0, keepdims=True)


def _cca_gate_kernel(xl_ref, s1_ref, s2_ref, w_ref, b_ref, out_ref):
    m_x = _spatial_mean(s1_ref[...])        # mean of skip_x1
    m_x2 = _spatial_mean(s2_ref[...])       # mean of skip_x2
    m_g = _spatial_mean(xl_ref[...])        # mean(up(x)) == mean(x_low) for nearest
    cat = jnp.concatenate([m_x, m_x2, m_g], axis=1)                     # (1, 3C)
    # single tiny fused matmul (three Linears + /3 folded into w_ref/b_ref)
    lin = jnp.dot(cat, w_ref[...], preferred_element_type=jnp.float32) + b_ref[...]
    scale = jax.nn.sigmoid(lin)                                         # (1, C)
    gated = xl_ref[...].astype(jnp.float32) * scale                     # (h, w, C)
    out_ref[...] = jnp.maximum(gated, 0.0).astype(out_ref.dtype)


def cca_gate_lowres(x_low, s1, s2, w_fused, b_fused):
    B = x_low.shape[0]
    return pl.pallas_call(
        _cca_gate_kernel,
        grid=(B,),
        in_specs=[_batch_spec(x_low.shape), _batch_spec(s1.shape),
                  _batch_spec(s2.shape), _bcast_spec(w_fused.shape),
                  _bcast_spec(b_fused.shape)],
        out_specs=_batch_spec(x_low.shape),
        out_shape=jax.ShapeDtypeStruct(x_low.shape, x_low.dtype),
        compiler_params=pltpu.CompilerParams(dimension_semantics=("parallel",)),
    )(x_low, s1, s2, w_fused, b_fused)


# ---------------------------------------------------------------------------
# Shared 3x3-conv core: zero-padded VMEM scratch -> 3 wide-K MXU matmuls
# (K = 3*Cin, one per kernel row) accumulated in register-resident f32 values.
# ---------------------------------------------------------------------------
def _conv3x3_rows(pad_ref, w_ref, H, W):
    xp = pad_ref[...]                              # (H+2, W+2, Cin), native dtype
    w = w_ref[...]                                 # (3, 3*Cin, Cout), native dtype
    acc = None
    for dh in range(3):                            # unrolled: 3 MXU matmuls
        strip = jnp.concatenate(
            [xp[dh:dh + H, 0:W, :],
             xp[dh:dh + H, 1:W + 1, :],
             xp[dh:dh + H, 2:W + 2, :]], axis=-1)  # (H, W, 3*Cin), order (dw, ci)
        part = jax.lax.dot_general(
            strip, w[dh],
            dimension_numbers=(((2,), (0,)), ((), ())),
            preferred_element_type=jnp.float32)    # (H, W, Cout)
        acc = part if acc is None else acc + part
    return acc                                     # f32 (H, W, Cout)


def _emit_conv_outputs(y, y_ref, st_ref):
    y_ref[...] = y.astype(y_ref.dtype)                                  # pre-BN conv out
    # per-channel partial sums for the two-pass BatchNorm batch statistics
    s_lin = jnp.sum(jnp.sum(y, axis=0), axis=0, keepdims=True)          # (1, Cout)
    s_sq = jnp.sum(jnp.sum(y * y, axis=0), axis=0, keepdims=True)       # (1, Cout)
    st_ref[...] = jnp.concatenate([s_lin, s_sq], axis=0)                # (2, Cout)


def _conv_first_kernel(att_ref, s1_ref, s2_ref, w_ref, y_ref, st_ref,
                       pad_ref, *, H, W, C):
    # fused channel concat [att | skip1 | skip2] straight into the padded scratch
    pad_ref[...] = jnp.zeros_like(pad_ref)
    pad_ref[1:H + 1, 1:W + 1, 0:C] = att_ref[...]
    pad_ref[1:H + 1, 1:W + 1, C:2 * C] = s1_ref[...]
    pad_ref[1:H + 1, 1:W + 1, 2 * C:3 * C] = s2_ref[...]
    y = _conv3x3_rows(pad_ref, w_ref, H, W)
    _emit_conv_outputs(y, y_ref, st_ref)


def _conv_next_kernel(x_ref, a_ref, c_ref, w_ref, y_ref, st_ref,
                      pad_ref, *, H, W):
    # previous layer's BatchNorm + ReLU fused into the input read (f32 VPU math)
    xin = jnp.maximum(x_ref[...].astype(jnp.float32) * a_ref[...] + c_ref[...], 0.0)
    pad_ref[...] = jnp.zeros_like(pad_ref)
    pad_ref[1:H + 1, 1:W + 1, :] = xin.astype(pad_ref.dtype)
    y = _conv3x3_rows(pad_ref, w_ref, H, W)
    _emit_conv_outputs(y, y_ref, st_ref)


def _conv_pallas_call(kernel, inputs, in_specs, B, H, W, Cin, Cout, dtype):
    return pl.pallas_call(
        kernel,
        grid=(B,),
        in_specs=in_specs,
        out_specs=(_batch_spec((B, H, W, Cout)), _batch_spec((B, 2, Cout))),
        out_shape=(jax.ShapeDtypeStruct((B, H, W, Cout), dtype),
                   jax.ShapeDtypeStruct((B, 2, Cout), jnp.float32)),
        scratch_shapes=[pltpu.VMEM((H + 2, W + 2, Cin), dtype)],       # padded input
        compiler_params=pltpu.CompilerParams(
            dimension_semantics=("parallel",),
            vmem_limit_bytes=_VMEM_LIMIT),
    )(*inputs)


def conv3x3_bnstats_first(att, s1, s2, w):
    B, H, W, C = att.shape
    Cin = 3 * C
    Cout = w.shape[-1]
    w_slab = w.reshape(3, 3 * Cin, Cout)             # (dh, dw*Cin+ci, co)
    kernel = functools.partial(_conv_first_kernel, H=H, W=W, C=C)
    in_specs = [_batch_spec(att.shape), _batch_spec(s1.shape),
                _batch_spec(s2.shape), _bcast_spec(w_slab.shape)]
    return _conv_pallas_call(kernel, (att, s1, s2, w_slab), in_specs,
                             B, H, W, Cin, Cout, att.dtype)


def conv3x3_bnstats_next(x, a, c, w):
    B, H, W, Cin = x.shape
    Cout = w.shape[-1]
    w_slab = w.reshape(3, 3 * Cin, Cout)
    kernel = functools.partial(_conv_next_kernel, H=H, W=W)
    in_specs = [_batch_spec(x.shape), _bcast_spec(a.shape),
                _bcast_spec(c.shape), _bcast_spec(w_slab.shape)]
    return _conv_pallas_call(kernel, (x, a, c, w_slab), in_specs,
                             B, H, W, Cin, Cout, x.dtype)


# ---------------------------------------------------------------------------
# Final layer's BatchNorm + ReLU (tiled elementwise kernel, no halo needed).
# ---------------------------------------------------------------------------
def _bn_relu_kernel(x_ref, a_ref, c_ref, o_ref):
    y = x_ref[...].astype(jnp.float32) * a_ref[...] + c_ref[...]
    o_ref[...] = jnp.maximum(y, 0.0).astype(o_ref.dtype)


def bn_relu(x, a, c):
    B, H, W, C = x.shape
    th = 8 if H % 8 == 0 else H
    return pl.pallas_call(
        _bn_relu_kernel,
        grid=(B, H // th),
        in_specs=[pl.BlockSpec((None, th, W, C), lambda b, i: (b, i, 0, 0)),
                  pl.BlockSpec((1, C), lambda b, i: (0, 0)),
                  pl.BlockSpec((1, C), lambda b, i: (0, 0))],
        out_specs=pl.BlockSpec((None, th, W, C), lambda b, i: (b, i, 0, 0)),
        out_shape=jax.ShapeDtypeStruct(x.shape, x.dtype),
        compiler_params=pltpu.CompilerParams(
            dimension_semantics=("parallel", "parallel")),
    )(x, a, c)


def _bn_affine(stats, gamma, beta, count):
    # combine per-batch-element partial sums -> per-channel affine (O(C) in XLA)
    s = jnp.sum(stats, axis=0)                              # (2, Cout)
    mean = s[0] / count
    var = jnp.maximum(s[1] / count - mean * mean, 0.0)      # biased (training-mode)
    a = gamma * jax.lax.rsqrt(var + BN_EPS)                 # (1, Cout)
    c = beta - mean * a
    return a, c


# ---------------------------------------------------------------------------
# Parameter init (deterministic, PyTorch-default-like uniform fan-in scaling)
# ---------------------------------------------------------------------------
def _uniform(key, shape, fan_in):
    bound = 1.0 / jnp.sqrt(jnp.maximum(float(fan_in), 1.0))
    return jax.random.uniform(key, shape, jnp.float32, -bound, bound)


def init_params(key, in_channels, out_channels, nb_conv):
    C = in_channels // 2                   # F_x == F_g == in_channels // 2
    keys = iter(jax.random.split(key, 6 + nb_conv))
    cca = {
        "wx":  _uniform(next(keys), (C, C), C),    # stored as (in, out) = W.T
        "bx":  _uniform(next(keys), (1, C), C),
        "wx2": _uniform(next(keys), (C, C), C),
        "bx2": _uniform(next(keys), (1, C), C),
        "wg":  _uniform(next(keys), (C, C), C),
        "bg":  _uniform(next(keys), (1, C), C),
    }
    convs = []
    cin = 3 * in_channels // 2
    for _ in range(nb_conv):
        convs.append({
            # HWIO conv weight.  The conv bias is omitted: a per-channel constant
            # added before training-mode BatchNorm cancels exactly in the forward.
            "w":     _uniform(next(keys), (3, 3, cin, out_channels), cin * 9),
            "gamma": jnp.ones((1, out_channels), jnp.float32),
            "beta":  jnp.zeros((1, out_channels), jnp.float32),
        })
        cin = out_channels
    return {"cca": cca, "convs": convs}


# ---------------------------------------------------------------------------
# Full forward pass (wrapper uses NCHW like the PyTorch module)
# ---------------------------------------------------------------------------
@jax.jit
def upblock_attention_threefeature(x, skip_x1, skip_x2, params):
    # NCHW -> NHWC (channels on the 128-lane axis inside the kernels)
    x_low = jnp.transpose(x, (0, 2, 3, 1))
    s1 = jnp.transpose(skip_x1, (0, 2, 3, 1))
    s2 = jnp.transpose(skip_x2, (0, 2, 3, 1))
    B, H, W, _ = s1.shape

    # fold the three CCA Linear layers (and the /3 constant) into one slab
    cca = params["cca"]
    w_fused = jnp.concatenate([cca["wx"], cca["wx2"], cca["wg"]], axis=0) * (1.0 / 3.0)
    b_fused = (cca["bx"] + cca["bx2"] + cca["bg"]) * (1.0 / 3.0)

    # channel-attention gate applied at low resolution (4x less IO/compute)
    att_low = cca_gate_lowres(x_low, s1, s2, w_fused, b_fused)
    # nearest-neighbour 2x upsample of the *gated* map (commutes with the gate)
    att = jnp.repeat(jnp.repeat(att_low, 2, axis=1), 2, axis=2)

    convs = params["convs"]
    count = float(B * H * W)
    # first ConvBatchNorm: channel concat fused in-kernel; emits conv + BN stats
    y, st = conv3x3_bnstats_first(att, s1, s2, convs[0]["w"])
    a, c = _bn_affine(st, convs[0]["gamma"], convs[0]["beta"], count)
    # remaining ConvBatchNorm blocks: previous BN+ReLU fused into the input read
    for p in convs[1:]:
        y, st = conv3x3_bnstats_next(y, a, c, p["w"])
        a, c = _bn_affine(st, p["gamma"], p["beta"], count)
    out = bn_relu(y, a, c)                         # last layer's BN + ReLU
    return jnp.transpose(out, (0, 3, 1, 2))        # NHWC -> NCHW


# ---------------------------------------------------------------------------
# Pure-JAX reference (mirrors the PyTorch module) for numeric validation.
# ---------------------------------------------------------------------------
def _reference_forward(x, skip_x1, skip_x2, params):
    xl = jnp.transpose(x, (0, 2, 3, 1))
    s1 = jnp.transpose(skip_x1, (0, 2, 3, 1))
    s2 = jnp.transpose(skip_x2, (0, 2, 3, 1))
    up = jnp.repeat(jnp.repeat(xl, 2, axis=1), 2, axis=2)
    cca = params["cca"]
    att = (s1.mean((1, 2)) @ cca["wx"] + cca["bx"]
           + s2.mean((1, 2)) @ cca["wx2"] + cca["bx2"]
           + up.mean((1, 2)) @ cca["wg"] + cca["bg"]) / 3.0
    scale = jax.nn.sigmoid(att)
    g = jnp.maximum(up * scale[:, None, None, :], 0.0)
    h = jnp.concatenate([g, s1, s2], axis=-1)
    for p in params["convs"]:
        y = jax.lax.conv_general_dilated(
            h, p["w"], (1, 1), "SAME",
            dimension_numbers=("NHWC", "HWIO", "NHWC"),
            precision=jax.lax.Precision.HIGHEST)
        mean = y.mean((0, 1, 2))
        var = ((y - mean) ** 2).mean((0, 1, 2))
        y = (y - mean) * jax.lax.rsqrt(var + BN_EPS) * p["gamma"][0] + p["beta"][0]
        h = jnp.maximum(y, 0.0)
    return jnp.transpose(h, (0, 3, 1, 2))


if __name__ == "__main__":
    in_channels = 8
    out_channels = 8
    nb_conv = 2
    B, Hs, Ws = 2, 16, 16                  # skip-connection spatial resolution
    C_half = in_channels // 2

    key = jax.random.PRNGKey(0)
    k_x, k_s1, k_s2, k_p = jax.random.split(key, 4)

    # x is at half resolution (upsampled 2x inside the forward)
    x = jax.random.normal(k_x, (B, C_half, Hs // 2, Ws // 2), jnp.float32)
    skip_x1 = jax.random.normal(k_s1, (B, C_half, Hs, Ws), jnp.float32)
    skip_x2 = jax.random.normal(k_s2, (B, C_half, Hs, Ws), jnp.float32)

    params = init_params(k_p, in_channels, out_channels, nb_conv)

    out = upblock_attention_threefeature(x, skip_x1, skip_x2, params)
    out = jax.block_until_ready(out)
    assert out.shape == (B, out_channels, Hs, Ws), out.shape

    ref = _reference_forward(x, skip_x1, skip_x2, params)
    assert jnp.allclose(out, ref, atol=5e-2, rtol=5e-2), (
        float(jnp.max(jnp.abs(out - ref))))

    print("KERNEL_OK")
</pallas_src>

<mosaic_0001>
module attributes {stable_mosaic.version = 11 : i64} {
  func.func @_cca_gate_kernel(%arg0: i32, %arg1: memref<1x8x8x4xf32, #tpu.memory_space<vmem>>, %arg2: memref<1x16x16x4xf32, #tpu.memory_space<vmem>>, %arg3: memref<1x16x16x4xf32, #tpu.memory_space<vmem>>, %arg4: memref<12x4xf32, #tpu.memory_space<vmem>>, %arg5: memref<1x4xf32, #tpu.memory_space<vmem>>, %arg6: memref<1x8x8x4xf32, #tpu.memory_space<vmem>>) attributes {dimension_semantics = [#tpu.dimension_semantics<parallel>], iteration_bounds = array<i64: 2>, scalar_prefetch = 0 : i64, scratch_operands = 0 : i64, tpu.core_type = #tpu.core_type<tc>, window_params = [{transform_indices = @transform_0, window_bounds = array<i64: 1, 8, 8, 4>}, {transform_indices = @transform_1, window_bounds = array<i64: 1, 16, 16, 4>}, {transform_indices = @transform_2, window_bounds = array<i64: 1, 16, 16, 4>}, {pipeline_mode = #tpu.pipeline_mode<synchronous>, transform_indices = @transform_3, window_bounds = array<i64: 12, 4>}, {pipeline_mode = #tpu.pipeline_mode<synchronous>, transform_indices = @transform_4, window_bounds = array<i64: 1, 4>}, {transform_indices = @transform_5, window_bounds = array<i64: 1, 8, 8, 4>}]} {
    %c0 = arith.constant 0 : index
    %c0_0 = arith.constant 0 : index
    %c0_1 = arith.constant 0 : index
    %c0_2 = arith.constant 0 : index
    %0 = vector.load %arg2[%c0, %c0_0, %c0_1, %c0_2] : memref<1x16x16x4xf32, #tpu.memory_space<vmem>>, vector<1x16x16x4xf32>
    %1 = vector.shape_cast %0 : vector<1x16x16x4xf32> to vector<16x16x4xf32>
    %cst = arith.constant dense<0.000000e+00> : vector<16x4xf32>
    %2 = vector.multi_reduction <add>, %1, %cst [0] : vector<16x16x4xf32> to vector<16x4xf32>
    %cst_3 = arith.constant 1.600000e+01 : f32
    %3 = vector.broadcast %cst_3 : f32 to vector<16x4xf32>
    %4 = arith.divf %2, %3 : vector<16x4xf32>
    %cst_4 = arith.constant dense<0.000000e+00> : vector<4xf32>
    %5 = vector.multi_reduction <add>, %4, %cst_4 [0] : vector<16x4xf32> to vector<4xf32>
    %6 = vector.shape_cast %5 : vector<4xf32> to vector<1x4xf32>
    %cst_5 = arith.constant 1.600000e+01 : f32
    %7 = vector.broadcast %cst_5 : f32 to vector<1x4xf32>
    %8 = arith.divf %6, %7 : vector<1x4xf32>
    %c0_6 = arith.constant 0 : index
    %c0_7 = arith.constant 0 : index
    %c0_8 = arith.constant 0 : index
    %c0_9 = arith.constant 0 : index
    %9 = vector.load %arg3[%c0_6, %c0_7, %c0_8, %c0_9] : memref<1x16x16x4xf32, #tpu.memory_space<vmem>>, vector<1x16x16x4xf32>
    %10 = vector.shape_cast %9 : vector<1x16x16x4xf32> to vector<16x16x4xf32>
    %cst_10 = arith.constant dense<0.000000e+00> : vector<16x4xf32>
    %11 = vector.multi_reduction <add>, %10, %cst_10 [0] : vector<16x16x4xf32> to vector<16x4xf32>
    %cst_11 = arith.constant 1.600000e+01 : f32
    %12 = vector.broadcast %cst_11 : f32 to vector<16x4xf32>
    %13 = arith.divf %11, %12 : vector<16x4xf32>
    %cst_12 = arith.constant dense<0.000000e+00> : vector<4xf32>
    %14 = vector.multi_reduction <add>, %13, %cst_12 [0] : vector<16x4xf32> to vector<4xf32>
    %15 = vector.shape_cast %14 : vector<4xf32> to vector<1x4xf32>
    %cst_13 = arith.constant 1.600000e+01 : f32
    %16 = vector.broadcast %cst_13 : f32 to vector<1x4xf32>
    %17 = arith.divf %15, %16 : vector<1x4xf32>
    %c0_14 = arith.constant 0 : index
    %c0_15 = arith.constant 0 : index
    %c0_16 = arith.constant 0 : index
    %c0_17 = arith.constant 0 : index
    %18 = vector.load %arg1[%c0_14, %c0_15, %c0_16, %c0_17] : memref<1x8x8x4xf32, #tpu.memory_space<vmem>>, vector<1x8x8x4xf32>
    %19 = vector.shape_cast %18 : vector<1x8x8x4xf32> to vector<8x8x4xf32>
    %cst_18 = arith.constant dense<0.000000e+00> : vector<8x4xf32>
    %20 = vector.multi_reduction <add>, %19, %cst_18 [0] : vector<8x8x4xf32> to vector<8x4xf32>
    %cst_19 = arith.constant 8.000000e+00 : f32
    %21 = vector.broadcast %cst_19 : f32 to vector<8x4xf32>
    %22 = arith.divf %20, %21 : vector<8x4xf32>
    %cst_20 = arith.constant dense<0.000000e+00> : vector<4xf32>
    %23 = vector.multi_reduction <add>, %22, %cst_20 [0] : vector<8x4xf32> to vector<4xf32>
    %24 = vector.shape_cast %23 : vector<4xf32> to vector<1x4xf32>
    %cst_21 = arith.constant 8.000000e+00 : f32
    %25 = vector.broadcast %cst_21 : f32 to vector<1x4xf32>
    %26 = arith.divf %24, %25 : vector<1x4xf32>
    %27 = tpu.concatenate %8, %17, %26 in 1 : vector<1x4xf32>, vector<1x4xf32>, vector<1x4xf32> -> vector<1x12xf32>
    %c0_22 = arith.constant 0 : index
    %c0_23 = arith.constant 0 : index
    %28 = vector.load %arg4[%c0_22, %c0_23] : memref<12x4xf32, #tpu.memory_space<vmem>>, vector<12x4xf32>
    %cst_24 = arith.constant dense<0.000000e+00> : vector<1x4xf32>
    %29 = tpu.matmul %27, %28, %cst_24 {dimension_numbers = #tpu.dot_dimension_numbers<[1], [0], [0], [1], [0, 0, 1, 1], [], []>} : vector<1x12xf32>, vector<12x4xf32>, vector<1x4xf32> -> vector<1x4xf32>
    %c0_25 = arith.constant 0 : index
    %c0_26 = arith.constant 0 : index
    %30 = vector.load %arg5[%c0_25, %c0_26] : memref<1x4xf32, #tpu.memory_space<vmem>>, vector<1x4xf32>
    %31 = arith.addf %29, %30 : vector<1x4xf32>
    %32 = arith.negf %31 : vector<1x4xf32>
    %33 = math.exp %32 : vector<1x4xf32>
    %cst_27 = arith.constant 1.000000e+00 : f32
    %34 = vector.broadcast %cst_27 : f32 to vector<1x4xf32>
    %35 = arith.addf %34, %33 : vector<1x4xf32>
    %36 = arith.divf %34, %35 : vector<1x4xf32>
    %c0_28 = arith.constant 0 : index
    %c0_29 = arith.constant 0 : index
    %c0_30 = arith.constant 0 : index
    %c0_31 = arith.constant 0 : index
    %37 = vector.load %arg1[%c0_28, %c0_29, %c0_30, %c0_31] : memref<1x8x8x4xf32, #tpu.memory_space<vmem>>, vector<1x8x8x4xf32>
    %38 = vector.shape_cast %37 : vector<1x8x8x4xf32> to vector<8x8x4xf32>
    %39 = vector.shape_cast %36 : vector<1x4xf32> to vector<1x1x4xf32>
    %40 = vector.broadcast %39 : vector<1x1x4xf32> to vector<8x8x4xf32>
    %41 = arith.mulf %38, %40 : vector<8x8x4xf32>
    %cst_32 = arith.constant 0.000000e+00 : f32
    %42 = vector.broadcast %cst_32 : f32 to vector<8x8x4xf32>
    %43 = arith.maximumf %41, %42 : vector<8x8x4xf32>
    %c0_33 = arith.constant 0 : index
    %c0_34 = arith.constant 0 : index
    %c0_35 = arith.constant 0 : index
    %c0_36 = arith.constant 0 : index
    %44 = vector.load %arg6[%c0_33, %c0_34, %c0_35, %c0_36] : memref<1x8x8x4xf32, #tpu.memory_space<vmem>>, vector<1x8x8x4xf32>
    %45 = vector.shape_cast %44 : vector<1x8x8x4xf32> to vector<8x8x4xf32>
    %46 = vector.shape_cast %43 : vector<8x8x4xf32> to vector<1x8x8x4xf32>
    tpu.vector_store %arg6[%c0_33, %c0_34, %c0_35, %c0_36], %46 {strides = array<i32>} : memref<1x8x8x4xf32, #tpu.memory_space<vmem>>, vector<1x8x8x4xf32>,
    return
  }
  func.func @transform_0(%arg0: i32) -> (i32, i32, i32, i32) {
    %c0_i32 = arith.constant 0 : i32
    %c0_i32_0 = arith.constant 0 : i32
    %c0_i32_1 = arith.constant 0 : i32
    %c0_i32_2 = arith.constant 0 : i32
    return %arg0, %c0_i32, %c0_i32_0, %c0_i32_1 : i32, i32, i32, i32
  }
  func.func @transform_1(%arg0: i32) -> (i32, i32, i32, i32) {
    %c0_i32 = arith.constant 0 : i32
    %c0_i32_0 = arith.constant 0 : i32
    %c0_i32_1 = arith.constant 0 : i32
    %c0_i32_2 = arith.constant 0 : i32
    return %arg0, %c0_i32, %c0_i32_0, %c0_i32_1 : i32, i32, i32, i32
  }
  func.func @transform_2(%arg0: i32) -> (i32, i32, i32, i32) {
    %c0_i32 = arith.constant 0 : i32
    %c0_i32_0 = arith.constant 0 : i32
    %c0_i32_1 = arith.constant 0 : i32
    %c0_i32_2 = arith.constant 0 : i32
    return %arg0, %c0_i32, %c0_i32_0, %c0_i32_1 : i32, i32, i32, i32
  }
  func.func @transform_3(%arg0: i32) -> (i32, i32) {
    %c0_i32 = arith.constant 0 : i32
    %c0_i32_0 = arith.constant 0 : i32
    %c0_i32_1 = arith.constant 0 : i32
    return %c0_i32, %c0_i32_0 : i32, i32
  }
  func.func @transform_4(%arg0: i32) -> (i32, i32) {
    %c0_i32 = arith.constant 0 : i32
    %c0_i32_0 = arith.constant 0 : i32
    %c0_i32_1 = arith.constant 0 : i32
    return %c0_i32, %c0_i32_0 : i32, i32
  }
  func.func @transform_5(%arg0: i32) -> (i32, i32, i32, i32) {
    %c0_i32 = arith.constant 0 : i32
    %c0_i32_0 = arith.constant 0 : i32
    %c0_i32_1 = arith.constant 0 : i32
    %c0_i32_2 = arith.constant 0 : i32
    return %arg0, %c0_i32, %c0_i32_0, %c0_i32_1 : i32, i32, i32, i32
  }
}

module attributes {stable_mosaic.version = 11 : i64} {
  func.func @_conv_first_kernel(%arg0: i32, %arg1: memref<1x16x16x4xf32, #tpu.memory_space<vmem>>, %arg2: memref<1x16x16x4xf32, #tpu.memory_space<vmem>>, %arg3: memref<1x16x16x4xf32, #tpu.memory_space<vmem>>, %arg4: memref<3x36x8xf32, #tpu.memory_space<vmem>>, %arg5: memref<1x16x16x8xf32, #tpu.memory_space<vmem>>, %arg6: memref<1x2x8xf32, #tpu.memory_space<vmem>>, %arg7: memref<18x18x12xf32, #tpu.memory_space<vmem>>) attributes {dimension_semantics = [#tpu.dimension_semantics<parallel>], iteration_bounds = array<i64: 2>, scalar_prefetch = 0 : i64, scratch_operands = 1 : i64, tpu.core_type = #tpu.core_type<tc>, window_params = [{transform_indices = @transform_0, window_bounds = array<i64: 1, 16, 16, 4>}, {transform_indices = @transform_1, window_bounds = array<i64: 1, 16, 16, 4>}, {transform_indices = @transform_2, window_bounds = array<i64: 1, 16, 16, 4>}, {pipeline_mode = #tpu.pipeline_mode<synchronous>, transform_indices = @transform_3, window_bounds = array<i64: 3, 36, 8>}, {transform_indices = @transform_4, window_bounds = array<i64: 1, 16, 16, 8>}, {transform_indices = @transform_5, window_bounds = array<i64: 1, 2, 8>}]} {
    %cst = arith.constant 0.000000e+00 : f32
    %0 = vector.broadcast %cst : f32 to vector<18x18x12xf32>
    %c0 = arith.constant 0 : index
    %c0_0 = arith.constant 0 : index
    %c0_1 = arith.constant 0 : index
    %1 = vector.load %arg7[%c0, %c0_0, %c0_1] : memref<18x18x12xf32, #tpu.memory_space<vmem>>, vector<18x18x12xf32>
    tpu.vector_store %arg7[%c0, %c0_0, %c0_1], %0 {strides = array<i32>} : memref<18x18x12xf32, #tpu.memory_space<vmem>>, vector<18x18x12xf32>,
    %c0_2 = arith.constant 0 : index
    %c0_3 = arith.constant 0 : index
    %c0_4 = arith.constant 0 : index
    %c0_5 = arith.constant 0 : index
    %2 = vector.load %arg1[%c0_2, %c0_3, %c0_4, %c0_5] : memref<1x16x16x4xf32, #tpu.memory_space<vmem>>, vector<1x16x16x4xf32>
    %3 = vector.shape_cast %2 : vector<1x16x16x4xf32> to vector<16x16x4xf32>
    %c1 = arith.constant 1 : index
    %c1_6 = arith.constant 1 : index
    %c0_7 = arith.constant 0 : index
    %4 = vector.load %arg7[%c1, %c1_6, %c0_7] : memref<18x18x12xf32, #tpu.memory_space<vmem>>, vector<16x16x4xf32>
    tpu.vector_store %arg7[%c1, %c1_6, %c0_7], %3 {strides = array<i32>} : memref<18x18x12xf32, #tpu.memory_space<vmem>>, vector<16x16x4xf32>,
    %c0_8 = arith.constant 0 : index
    %c0_9 = arith.constant 0 : index
    %c0_10 = arith.constant 0 : index
    %c0_11 = arith.constant 0 : index
    %5 = vector.load %arg2[%c0_8, %c0_9, %c0_10, %c0_11] : memref<1x16x16x4xf32, #tpu.memory_space<vmem>>, vector<1x16x16x4xf32>
    %6 = vector.shape_cast %5 : vector<1x16x16x4xf32> to vector<16x16x4xf32>
    %c1_12 = arith.constant 1 : index
    %c1_13 = arith.constant 1 : index
    %c4 = arith.constant 4 : index
    %7 = vector.load %arg7[%c1_12, %c1_13, %c4] : memref<18x18x12xf32, #tpu.memory_space<vmem>>, vector<16x16x4xf32>
    tpu.vector_store %arg7[%c1_12, %c1_13, %c4], %6 {strides = array<i32>} : memref<18x18x12xf32, #tpu.memory_space<vmem>>, vector<16x16x4xf32>,
    %c0_14 = arith.constant 0 : index
    %c0_15 = arith.constant 0 : index
    %c0_16 = arith.constant 0 : index
    %c0_17 = arith.constant 0 : index
    %8 = vector.load %arg3[%c0_14, %c0_15, %c0_16, %c0_17] : memref<1x16x16x4xf32, #tpu.memory_space<vmem>>, vector<1x16x16x4xf32>
    %9 = vector.shape_cast %8 : vector<1x16x16x4xf32> to vector<16x16x4xf32>
    %c1_18 = arith.constant 1 : index
    %c1_19 = arith.constant 1 : index
    %c8 = arith.constant 8 : index
    %10 = vector.load %arg7[%c1_18, %c1_19, %c8] : memref<18x18x12xf32, #tpu.memory_space<vmem>>, vector<16x16x4xf32>
    tpu.vector_store %arg7[%c1_18, %c1_19, %c8], %9 {strides = array<i32>} : memref<18x18x12xf32, #tpu.memory_space<vmem>>, vector<16x16x4xf32>,
    %c0_20 = arith.constant 0 : index
    %c0_21 = arith.constant 0 : index
    %c0_22 = arith.constant 0 : index
    %11 = vector.load %arg7[%c0_20, %c0_21, %c0_22] : memref<18x18x12xf32, #tpu.memory_space<vmem>>, vector<18x18x12xf32>
    %c0_23 = arith.constant 0 : index
    %c0_24 = arith.constant 0 : index
    %c0_25 = arith.constant 0 : index
    %12 = vector.load %arg4[%c0_23, %c0_24, %c0_25] : memref<3x36x8xf32, #tpu.memory_space<vmem>>, vector<3x36x8xf32>
    %13 = vector.extract_strided_slice %11 {offsets = [0, 0, 0], sizes = [16, 16, 12], strides = [1, 1, 1]} : vector<18x18x12xf32> to vector<16x16x12xf32>
    %14 = vector.extract_strided_slice %11 {offsets = [0, 1, 0], sizes = [16, 16, 12], strides = [1, 1, 1]} : vector<18x18x12xf32> to vector<16x16x12xf32>
    %15 = vector.extract_strided_slice %11 {offsets = [0, 2, 0], sizes = [16, 16, 12], strides = [1, 1, 1]} : vector<18x18x12xf32> to vector<16x16x12xf32>
    %16 = tpu.concatenate %13, %14, %15 in 2 : vector<16x16x12xf32>, vector<16x16x12xf32>, vector<16x16x12xf32> -> vector<16x16x36xf32>
    %17 = vector.extract_strided_slice %12 {offsets = [0, 0, 0], sizes = [1, 36, 8], strides = [1, 1, 1]} : vector<3x36x8xf32> to vector<1x36x8xf32>
    %18 = vector.shape_cast %17 : vector<1x36x8xf32> to vector<36x8xf32>
    %cst_26 = arith.constant dense<0.000000e+00> : vector<16x16x8xf32>
    %19 = tpu.matmul %16, %18, %cst_26 {dimension_numbers = #tpu.dot_dimension_numbers<[2], [0], [0, 1], [1], [0, 0, 0, 1, 1, 1], [], []>} : vector<16x16x36xf32>, vector<36x8xf32>, vector<16x16x8xf32> -> vector<16x16x8xf32>
    %20 = vector.extract_strided_slice %11 {offsets = [1, 0, 0], sizes = [16, 16, 12], strides = [1, 1, 1]} : vector<18x18x12xf32> to vector<16x16x12xf32>
    %21 = vector.extract_strided_slice %11 {offsets = [1, 1, 0], sizes = [16, 16, 12], strides = [1, 1, 1]} : vector<18x18x12xf32> to vector<16x16x12xf32>
    %22 = vector.extract_strided_slice %11 {offsets = [1, 2, 0], sizes = [16, 16, 12], strides = [1, 1, 1]} : vector<18x18x12xf32> to vector<16x16x12xf32>
    %23 = tpu.concatenate %20, %21, %22 in 2 : vector<16x16x12xf32>, vector<16x16x12xf32>, vector<16x16x12xf32> -> vector<16x16x36xf32>
    %24 = vector.extract_strided_slice %12 {offsets = [1, 0, 0], sizes = [1, 36, 8], strides = [1, 1, 1]} : vector<3x36x8xf32> to vector<1x36x8xf32>
    %25 = vector.shape_cast %24 : vector<1x36x8xf32> to vector<36x8xf32>
    %cst_27 = arith.constant dense<0.000000e+00> : vector<16x16x8xf32>
    %26 = tpu.matmul %23, %25, %cst_27 {dimension_numbers = #tpu.dot_dimension_numbers<[2], [0], [0, 1], [1], [0, 0, 0, 1, 1, 1], [], []>} : vector<16x16x36xf32>, vector<36x8xf32>, vector<16x16x8xf32> -> vector<16x16x8xf32>
    %27 = arith.addf %19, %26 : vector<16x16x8xf32>
    %28 = vector.extract_strided_slice %11 {offsets = [2, 0, 0], sizes = [16, 16, 12], strides = [1, 1, 1]} : vector<18x18x12xf32> to vector<16x16x12xf32>
    %29 = vector.extract_strided_slice %11 {offsets = [2, 1, 0], sizes = [16, 16, 12], strides = [1, 1, 1]} : vector<18x18x12xf32> to vector<16x16x12xf32>
    %30 = vector.extract_strided_slice %11 {offsets = [2, 2, 0], sizes = [16, 16, 12], strides = [1, 1, 1]} : vector<18x18x12xf32> to vector<16x16x12xf32>
    %31 = tpu.concatenate %28, %29, %30 in 2 : vector<16x16x12xf32>, vector<16x16x12xf32>, vector<16x16x12xf32> -> vector<16x16x36xf32>
    %32 = vector.extract_strided_slice %12 {offsets = [2, 0, 0], sizes = [1, 36, 8], strides = [1, 1, 1]} : vector<3x36x8xf32> to vector<1x36x8xf32>
    %33 = vector.shape_cast %32 : vector<1x36x8xf32> to vector<36x8xf32>
    %cst_28 = arith.constant dense<0.000000e+00> : vector<16x16x8xf32>
    %34 = tpu.matmul %31, %33, %cst_28 {dimension_numbers = #tpu.dot_dimension_numbers<[2], [0], [0, 1], [1], [0, 0, 0, 1, 1, 1], [], []>} : vector<16x16x36xf32>, vector<36x8xf32>, vector<16x16x8xf32> -> vector<16x16x8xf32>
    %35 = arith.addf %27, %34 : vector<16x16x8xf32>
    %c0_29 = arith.constant 0 : index
    %c0_30 = arith.constant 0 : index
    %c0_31 = arith.constant 0 : index
    %c0_32 = arith.constant 0 : index
    %36 = vector.load %arg5[%c0_29, %c0_30, %c0_31, %c0_32] : memref<1x16x16x8xf32, #tpu.memory_space<vmem>>, vector<1x16x16x8xf32>
    %37 = vector.shape_cast %36 : vector<1x16x16x8xf32> to vector<16x16x8xf32>
    %38 = vector.shape_cast %35 : vector<16x16x8xf32> to vector<1x16x16x8xf32>
    tpu.vector_store %arg5[%c0_29, %c0_30, %c0_31, %c0_32], %38 {strides = array<i32>} : memref<1x16x16x8xf32, #tpu.memory_space<vmem>>, vector<1x16x16x8xf32>,
    %cst_33 = arith.constant dense<0.000000e+00> : vector<16x8xf32>
    %39 = vector.multi_reduction <add>, %35, %cst_33 [0] : vector<16x16x8xf32> to vector<16x8xf32>
    %cst_34 = arith.constant dense<0.000000e+00> : vector<8xf32>
    %40 = vector.multi_reduction <add>, %39, %cst_34 [0] : vector<16x8xf32> to vector<8xf32>
    %41 = vector.shape_cast %40 : vector<8xf32> to vector<1x8xf32>
    %42 = arith.mulf %35, %35 : vector<16x16x8xf32>
    %cst_35 = arith.constant dense<0.000000e+00> : vector<16x8xf32>
    %43 = vector.multi_reduction <add>, %42, %cst_35 [0] : vector<16x16x8xf32> to vector<16x8xf32>
    %cst_36 = arith.constant dense<0.000000e+00> : vector<8xf32>
    %44 = vector.multi_reduction <add>, %43, %cst_36 [0] : vector<16x8xf32> to vector<8xf32>
    %45 = vector.shape_cast %44 : vector<8xf32> to vector<1x8xf32>
    %46 = tpu.concatenate %41, %45 in 0 : vector<1x8xf32>, vector<1x8xf32> -> vector<2x8xf32>
    %c0_37 = arith.constant 0 : index
    %c0_38 = arith.constant 0 : index
    %c0_39 = arith.constant 0 : index
    %47 = vector.load %arg6[%c0_37, %c0_38, %c0_39] : memref<1x2x8xf32, #tpu.memory_space<vmem>>, vector<1x2x8xf32>
    %48 = vector.shape_cast %47 : vector<1x2x8xf32> to vector<2x8xf32>
    %49 = vector.shape_cast %46 : vector<2x8xf32> to vector<1x2x8xf32>
    tpu.vector_store %arg6[%c0_37, %c0_38, %c0_39], %49 {strides = array<i32>} : memref<1x2x8xf32, #tpu.memory_space<vmem>>, vector<1x2x8xf32>,
    return
  }
  func.func @transform_0(%arg0: i32) -> (i32, i32, i32, i32) {
    %c0_i32 = arith.constant 0 : i32
    %c0_i32_0 = arith.constant 0 : i32
    %c0_i32_1 = arith.constant 0 : i32
    %c0_i32_2 = arith.constant 0 : i32
    return %arg0, %c0_i32, %c0_i32_0, %c0_i32_1 : i32, i32, i32, i32
  }
  func.func @transform_1(%arg0: i32) -> (i32, i32, i32, i32) {
    %c0_i32 = arith.constant 0 : i32
    %c0_i32_0 = arith.constant 0 : i32
    %c0_i32_1 = arith.constant 0 : i32
    %c0_i32_2 = arith.constant 0 : i32
    return %arg0, %c0_i32, %c0_i32_0, %c0_i32_1 : i32, i32, i32, i32
  }
  func.func @transform_2(%arg0: i32) -> (i32, i32, i32, i32) {
    %c0_i32 = arith.constant 0 : i32
    %c0_i32_0 = arith.constant 0 : i32
    %c0_i32_1 = arith.constant 0 : i32
    %c0_i32_2 = arith.constant 0 : i32
    return %arg0, %c0_i32, %c0_i32_0, %c0_i32_1 : i32, i32, i32, i32
  }
  func.func @transform_3(%arg0: i32) -> (i32, i32, i32) {
    %c0_i32 = arith.constant 0 : i32
    %c0_i32_0 = arith.constant 0 : i32
    %c0_i32_1 = arith.constant 0 : i32
    %c0_i32_2 = arith.constant 0 : i32
    return %c0_i32, %c0_i32_0, %c0_i32_1 : i32, i32, i32
  }
  func.func @transform_4(%arg0: i32) -> (i32, i32, i32, i32) {
    %c0_i32 = arith.constant 0 : i32
    %c0_i32_0 = arith.constant 0 : i32
    %c0_i32_1 = arith.constant 0 : i32
    %c0_i32_2 = arith.constant 0 : i32
    return %arg0, %c0_i32, %c0_i32_0, %c0_i32_1 : i32, i32, i32, i32
  }
  func.func @transform_5(%arg0: i32) -> (i32, i32, i32) {
    %c0_i32 = arith.constant 0 : i32
    %c0_i32_0 = arith.constant 0 : i32
    %c0_i32_1 = arith.constant 0 : i32
    return %arg0, %c0_i32, %c0_i32_0 : i32, i32, i32
  }
}

module attributes {stable_mosaic.version = 11 : i64} {
  func.func @_bn_relu_kernel(%arg0: i32, %arg1: i32, %arg2: memref<1x8x16x8xf32, #tpu.memory_space<vmem>>, %arg3: memref<1x8xf32, #tpu.memory_space<vmem>>, %arg4: memref<1x8xf32, #tpu.memory_space<vmem>>, %arg5: memref<1x8x16x8xf32, #tpu.memory_space<vmem>>) attributes {dimension_semantics = [#tpu.dimension_semantics<parallel>, #tpu.dimension_semantics<parallel>], iteration_bounds = array<i64: 2, 2>, scalar_prefetch = 0 : i64, scratch_operands = 0 : i64, tpu.core_type = #tpu.core_type<tc>, window_params = [{transform_indices = @transform_0, window_bounds = array<i64: 1, 8, 16, 8>}, {pipeline_mode = #tpu.pipeline_mode<synchronous>, transform_indices = @transform_1, window_bounds = array<i64: 1, 8>}, {pipeline_mode = #tpu.pipeline_mode<synchronous>, transform_indices = @transform_2, window_bounds = array<i64: 1, 8>}, {transform_indices = @transform_3, window_bounds = array<i64: 1, 8, 16, 8>}]} {
    %c0 = arith.constant 0 : index
    %c0_0 = arith.constant 0 : index
    %c0_1 = arith.constant 0 : index
    %c0_2 = arith.constant 0 : index
    %0 = vector.load %arg2[%c0, %c0_0, %c0_1, %c0_2] : memref<1x8x16x8xf32, #tpu.memory_space<vmem>>, vector<1x8x16x8xf32>
    %1 = vector.shape_cast %0 : vector<1x8x16x8xf32> to vector<8x16x8xf32>
    %c0_3 = arith.constant 0 : index
    %c0_4 = arith.constant 0 : index
    %2 = vector.load %arg3[%c0_3, %c0_4] : memref<1x8xf32, #tpu.memory_space<vmem>>, vector<1x8xf32>
    %3 = vector.shape_cast %2 : vector<1x8xf32> to vector<1x1x8xf32>
    %4 = vector.broadcast %3 : vector<1x1x8xf32> to vector<8x16x8xf32>
    %5 = arith.mulf %1, %4 : vector<8x16x8xf32>
    %c0_5 = arith.constant 0 : index
    %c0_6 = arith.constant 0 : index
    %6 = vector.load %arg4[%c0_5, %c0_6] : memref<1x8xf32, #tpu.memory_space<vmem>>, vector<1x8xf32>
    %7 = vector.shape_cast %6 : vector<1x8xf32> to vector<1x1x8xf32>
    %8 = vector.broadcast %7 : vector<1x1x8xf32> to vector<8x16x8xf32>
    %9 = arith.addf %5, %8 : vector<8x16x8xf32>
    %cst = arith.constant 0.000000e+00 : f32
    %10 = vector.broadcast %cst : f32 to vector<8x16x8xf32>
    %11 = arith.maximumf %9, %10 : vector<8x16x8xf32>
    %c0_7 = arith.constant 0 : index
    %c0_8 = arith.constant 0 : index
    %c0_9 = arith.constant 0 : index
    %c0_10 = arith.constant 0 : index
    %12 = vector.load %arg5[%c0_7, %c0_8, %c0_9, %c0_10] : memref<1x8x16x8xf32, #tpu.memory_space<vmem>>, vector<1x8x16x8xf32>
    %13 = vector.shape_cast %12 : vector<1x8x16x8xf32> to vector<8x16x8xf32>
    %14 = vector.shape_cast %11 : vector<8x16x8xf32> to vector<1x8x16x8xf32>
    tpu.vector_store %arg5[%c0_7, %c0_8, %c0_9, %c0_10], %14 {strides = array<i32>} : memref<1x8x16x8xf32, #tpu.memory_space<vmem>>, vector<1x8x16x8xf32>,
    return
  }
  func.func @transform_0(%arg0: i32, %arg1: i32) -> (i32, i32, i32, i32) {
    %c0_i32 = arith.constant 0 : i32
    %c0_i32_0 = arith.constant 0 : i32
    %c0_i32_1 = arith.constant 0 : i32
    return %arg0, %arg1, %c0_i32, %c0_i32_0 : i32, i32, i32, i32
  }
  func.func @transform_1(%arg0: i32, %arg1: i32) -> (i32, i32) {
    %c0_i32 = arith.constant 0 : i32
    %c0_i32_0 = arith.constant 0 : i32
    %c0_i32_1 = arith.constant 0 : i32
    return %c0_i32, %c0_i32_0 : i32, i32
  }
  func.func @transform_2(%arg0: i32, %arg1: i32) -> (i32, i32) {
    %c0_i32 = arith.constant 0 : i32
    %c0_i32_0 = arith.constant 0 : i32
    %c0_i32_1 = arith.constant 0 : i32
    return %c0_i32, %c0_i32_0 : i32, i32
  }
  func.func @transform_3(%arg0: i32, %arg1: i32) -> (i32, i32, i32, i32) {
    %c0_i32 = arith.constant 0 : i32
    %c0_i32_0 = arith.constant 0 : i32
    %c0_i32_1 = arith.constant 0 : i32
    return %arg0, %arg1, %c0_i32, %c0_i32_0 : i32, i32, i32, i32
  }
}

module attributes {stable_mosaic.version = 11 : i64} {
  func.func @_conv_next_kernel(%arg0: i32, %arg1: memref<1x16x16x8xf32, #tpu.memory_space<vmem>>, %arg2: memref<1x8xf32, #tpu.memory_space<vmem>>, %arg3: memref<1x8xf32, #tpu.memory_space<vmem>>, %arg4: memref<3x24x8xf32, #tpu.memory_space<vmem>>, %arg5: memref<1x16x16x8xf32, #tpu.memory_space<vmem>>, %arg6: memref<1x2x8xf32, #tpu.memory_space<vmem>>, %arg7: memref<18x18x8xf32, #tpu.memory_space<vmem>>) attributes {dimension_semantics = [#tpu.dimension_semantics<parallel>], iteration_bounds = array<i64: 2>, scalar_prefetch = 0 : i64, scratch_operands = 1 : i64, tpu.core_type = #tpu.core_type<tc>, window_params = [{transform_indices = @transform_0, window_bounds = array<i64: 1, 16, 16, 8>}, {pipeline_mode = #tpu.pipeline_mode<synchronous>, transform_indices = @transform_1, window_bounds = array<i64: 1, 8>}, {pipeline_mode = #tpu.pipeline_mode<synchronous>, transform_indices = @transform_2, window_bounds = array<i64: 1, 8>}, {pipeline_mode = #tpu.pipeline_mode<synchronous>, transform_indices = @transform_3, window_bounds = array<i64: 3, 24, 8>}, {transform_indices = @transform_4, window_bounds = array<i64: 1, 16, 16, 8>}, {transform_indices = @transform_5, window_bounds = array<i64: 1, 2, 8>}]} {
    %c0 = arith.constant 0 : index
    %c0_0 = arith.constant 0 : index
    %c0_1 = arith.constant 0 : index
    %c0_2 = arith.constant 0 : index
    %0 = vector.load %arg1[%c0, %c0_0, %c0_1, %c0_2] : memref<1x16x16x8xf32, #tpu.memory_space<vmem>>, vector<1x16x16x8xf32>
    %1 = vector.shape_cast %0 : vector<1x16x16x8xf32> to vector<16x16x8xf32>
    %c0_3 = arith.constant 0 : index
    %c0_4 = arith.constant 0 : index
    %2 = vector.load %arg2[%c0_3, %c0_4] : memref<1x8xf32, #tpu.memory_space<vmem>>, vector<1x8xf32>
    %3 = vector.shape_cast %2 : vector<1x8xf32> to vector<1x1x8xf32>
    %4 = vector.broadcast %3 : vector<1x1x8xf32> to vector<16x16x8xf32>
    %5 = arith.mulf %1, %4 : vector<16x16x8xf32>
    %c0_5 = arith.constant 0 : index
    %c0_6 = arith.constant 0 : index
    %6 = vector.load %arg3[%c0_5, %c0_6] : memref<1x8xf32, #tpu.memory_space<vmem>>, vector<1x8xf32>
    %7 = vector.shape_cast %6 : vector<1x8xf32> to vector<1x1x8xf32>
    %8 = vector.broadcast %7 : vector<1x1x8xf32> to vector<16x16x8xf32>
    %9 = arith.addf %5, %8 : vector<16x16x8xf32>
    %cst = arith.constant 0.000000e+00 : f32
    %10 = vector.broadcast %cst : f32 to vector<16x16x8xf32>
    %11 = arith.maximumf %9, %10 : vector<16x16x8xf32>
    %cst_7 = arith.constant 0.000000e+00 : f32
    %12 = vector.broadcast %cst_7 : f32 to vector<18x18x8xf32>
    %c0_8 = arith.constant 0 : index
    %c0_9 = arith.constant 0 : index
    %c0_10 = arith.constant 0 : index
    %13 = vector.load %arg7[%c0_8, %c0_9, %c0_10] : memref<18x18x8xf32, #tpu.memory_space<vmem>>, vector<18x18x8xf32>
    tpu.vector_store %arg7[%c0_8, %c0_9, %c0_10], %12 {strides = array<i32>} : memref<18x18x8xf32, #tpu.memory_space<vmem>>, vector<18x18x8xf32>,
    %c1 = arith.constant 1 : index
    %c1_11 = arith.constant 1 : index
    %c0_12 = arith.constant 0 : index
    %14 = vector.load %arg7[%c1, %c1_11, %c0_12] : memref<18x18x8xf32, #tpu.memory_space<vmem>>, vector<16x16x8xf32>
    tpu.vector_store %arg7[%c1, %c1_11, %c0_12], %11 {strides = array<i32>} : memref<18x18x8xf32, #tpu.memory_space<vmem>>, vector<16x16x8xf32>,
    %c0_13 = arith.constant 0 : index
    %c0_14 = arith.constant 0 : index
    %c0_15 = arith.constant 0 : index
    %15 = vector.load %arg7[%c0_13, %c0_14, %c0_15] : memref<18x18x8xf32, #tpu.memory_space<vmem>>, vector<18x18x8xf32>
    %c0_16 = arith.constant 0 : index
    %c0_17 = arith.constant 0 : index
    %c0_18 = arith.constant 0 : index
    %16 = vector.load %arg4[%c0_16, %c0_17, %c0_18] : memref<3x24x8xf32, #tpu.memory_space<vmem>>, vector<3x24x8xf32>
    %17 = vector.extract_strided_slice %15 {offsets = [0, 0, 0], sizes = [16, 16, 8], strides = [1, 1, 1]} : vector<18x18x8xf32> to vector<16x16x8xf32>
    %18 = vector.extract_strided_slice %15 {offsets = [0, 1, 0], sizes = [16, 16, 8], strides = [1, 1, 1]} : vector<18x18x8xf32> to vector<16x16x8xf32>
    %19 = vector.extract_strided_slice %15 {offsets = [0, 2, 0], sizes = [16, 16, 8], strides = [1, 1, 1]} : vector<18x18x8xf32> to vector<16x16x8xf32>
    %20 = tpu.concatenate %17, %18, %19 in 2 : vector<16x16x8xf32>, vector<16x16x8xf32>, vector<16x16x8xf32> -> vector<16x16x24xf32>
    %21 = vector.extract_strided_slice %16 {offsets = [0, 0, 0], sizes = [1, 24, 8], strides = [1, 1, 1]} : vector<3x24x8xf32> to vector<1x24x8xf32>
    %22 = vector.shape_cast %21 : vector<1x24x8xf32> to vector<24x8xf32>
    %cst_19 = arith.constant dense<0.000000e+00> : vector<16x16x8xf32>
    %23 = tpu.matmul %20, %22, %cst_19 {dimension_numbers = #tpu.dot_dimension_numbers<[2], [0], [0, 1], [1], [0, 0, 0, 1, 1, 1], [], []>} : vector<16x16x24xf32>, vector<24x8xf32>, vector<16x16x8xf32> -> vector<16x16x8xf32>
    %24 = vector.extract_strided_slice %15 {offsets = [1, 0, 0], sizes = [16, 16, 8], strides = [1, 1, 1]} : vector<18x18x8xf32> to vector<16x16x8xf32>
    %25 = vector.extract_strided_slice %15 {offsets = [1, 1, 0], sizes = [16, 16, 8], strides = [1, 1, 1]} : vector<18x18x8xf32> to vector<16x16x8xf32>
    %26 = vector.extract_strided_slice %15 {offsets = [1, 2, 0], sizes = [16, 16, 8], strides = [1, 1, 1]} : vector<18x18x8xf32> to vector<16x16x8xf32>
    %27 = tpu.concatenate %24, %25, %26 in 2 : vector<16x16x8xf32>, vector<16x16x8xf32>, vector<16x16x8xf32> -> vector<16x16x24xf32>
    %28 = vector.extract_strided_slice %16 {offsets = [1, 0, 0], sizes = [1, 24, 8], strides = [1, 1, 1]} : vector<3x24x8xf32> to vector<1x24x8xf32>
    %29 = vector.shape_cast %28 : vector<1x24x8xf32> to vector<24x8xf32>
    %cst_20 = arith.constant dense<0.000000e+00> : vector<16x16x8xf32>
    %30 = tpu.matmul %27, %29, %cst_20 {dimension_numbers = #tpu.dot_dimension_numbers<[2], [0], [0, 1], [1], [0, 0, 0, 1, 1, 1], [], []>} : vector<16x16x24xf32>, vector<24x8xf32>, vector<16x16x8xf32> -> vector<16x16x8xf32>
    %31 = arith.addf %23, %30 : vector<16x16x8xf32>
    %32 = vector.extract_strided_slice %15 {offsets = [2, 0, 0], sizes = [16, 16, 8], strides = [1, 1, 1]} : vector<18x18x8xf32> to vector<16x16x8xf32>
    %33 = vector.extract_strided_slice %15 {offsets = [2, 1, 0], sizes = [16, 16, 8], strides = [1, 1, 1]} : vector<18x18x8xf32> to vector<16x16x8xf32>
    %34 = vector.extract_strided_slice %15 {offsets = [2, 2, 0], sizes = [16, 16, 8], strides = [1, 1, 1]} : vector<18x18x8xf32> to vector<16x16x8xf32>
    %35 = tpu.concatenate %32, %33, %34 in 2 : vector<16x16x8xf32>, vector<16x16x8xf32>, vector<16x16x8xf32> -> vector<16x16x24xf32>
    %36 = vector.extract_strided_slice %16 {offsets = [2, 0, 0], sizes = [1, 24, 8], strides = [1, 1, 1]} : vector<3x24x8xf32> to vector<1x24x8xf32>
    %37 = vector.shape_cast %36 : vector<1x24x8xf32> to vector<24x8xf32>
    %cst_21 = arith.constant dense<0.000000e+00> : vector<16x16x8xf32>
    %38 = tpu.matmul %35, %37, %cst_21 {dimension_numbers = #tpu.dot_dimension_numbers<[2], [0], [0, 1], [1], [0, 0, 0, 1, 1, 1], [], []>} : vector<16x16x24xf32>, vector<24x8xf32>, vector<16x16x8xf32> -> vector<16x16x8xf32>
    %39 = arith.addf %31, %38 : vector<16x16x8xf32>
    %c0_22 = arith.constant 0 : index
    %c0_23 = arith.constant 0 : index
    %c0_24 = arith.constant 0 : index
    %c0_25 = arith.constant 0 : index
    %40 = vector.load %arg5[%c0_22, %c0_23, %c0_24, %c0_25] : memref<1x16x16x8xf32, #tpu.memory_space<vmem>>, vector<1x16x16x8xf32>
    %41 = vector.shape_cast %40 : vector<1x16x16x8xf32> to vector<16x16x8xf32>
    %42 = vector.shape_cast %39 : vector<16x16x8xf32> to vector<1x16x16x8xf32>
    tpu.vector_store %arg5[%c0_22, %c0_23, %c0_24, %c0_25], %42 {strides = array<i32>} : memref<1x16x16x8xf32, #tpu.memory_space<vmem>>, vector<1x16x16x8xf32>,
    %cst_26 = arith.constant dense<0.000000e+00> : vector<16x8xf32>
    %43 = vector.multi_reduction <add>, %39, %cst_26 [0] : vector<16x16x8xf32> to vector<16x8xf32>
    %cst_27 = arith.constant dense<0.000000e+00> : vector<8xf32>
    %44 = vector.multi_reduction <add>, %43, %cst_27 [0] : vector<16x8xf32> to vector<8xf32>
    %45 = vector.shape_cast %44 : vector<8xf32> to vector<1x8xf32>
    %46 = arith.mulf %39, %39 : vector<16x16x8xf32>
    %cst_28 = arith.constant dense<0.000000e+00> : vector<16x8xf32>
    %47 = vector.multi_reduction <add>, %46, %cst_28 [0] : vector<16x16x8xf32> to vector<16x8xf32>
    %cst_29 = arith.constant dense<0.000000e+00> : vector<8xf32>
    %48 = vector.multi_reduction <add>, %47, %cst_29 [0] : vector<16x8xf32> to vector<8xf32>
    %49 = vector.shape_cast %48 : vector<8xf32> to vector<1x8xf32>
    %50 = tpu.concatenate %45, %49 in 0 : vector<1x8xf32>, vector<1x8xf32> -> vector<2x8xf32>
    %c0_30 = arith.constant 0 : index
    %c0_31 = arith.constant 0 : index
    %c0_32 = arith.constant 0 : index
    %51 = vector.load %arg6[%c0_30, %c0_31, %c0_32] : memref<1x2x8xf32, #tpu.memory_space<vmem>>, vector<1x2x8xf32>
    %52 = vector.shape_cast %51 : vector<1x2x8xf32> to vector<2x8xf32>
    %53 = vector.shape_cast %50 : vector<2x8xf32> to vector<1x2x8xf32>
    tpu.vector_store %arg6[%c0_30, %c0_31, %c0_32], %53 {strides = array<i32>} : memref<1x2x8xf32, #tpu.memory_space<vmem>>, vector<1x2x8xf32>,
    return
  }
  func.func @transform_0(%arg0: i32) -> (i32, i32, i32, i32) {
    %c0_i32 = arith.constant 0 : i32
    %c0_i32_0 = arith.constant 0 : i32
    %c0_i32_1 = arith.constant 0 : i32
    %c0_i32_2 = arith.constant 0 : i32
    return %arg0, %c0_i32, %c0_i32_0, %c0_i32_1 : i32, i32, i32, i32
  }
  func.func @transform_1(%arg0: i32) -> (i32, i32) {
    %c0_i32 = arith.constant 0 : i32
    %c0_i32_0 = arith.constant 0 : i32
    %c0_i32_1 = arith.constant 0 : i32
    return %c0_i32, %c0_i32_0 : i32, i32
  }
  func.func @transform_2(%arg0: i32) -> (i32, i32) {
    %c0_i32 = arith.constant 0 : i32
    %c0_i32_0 = arith.constant 0 : i32
    %c0_i32_1 = arith.constant 0 : i32
    return %c0_i32, %c0_i32_0 : i32, i32
  }
  func.func @transform_3(%arg0: i32) -> (i32, i32, i32) {
    %c0_i32 = arith.constant 0 : i32
    %c0_i32_0 = arith.constant 0 : i32
    %c0_i32_1 = arith.constant 0 : i32
    %c0_i32_2 = arith.constant 0 : i32
    return %c0_i32, %c0_i32_0, %c0_i32_1 : i32, i32, i32
  }
  func.func @transform_4(%arg0: i32) -> (i32, i32, i32, i32) {
    %c0_i32 = arith.constant 0 : i32
    %c0_i32_0 = arith.constant 0 : i32
    %c0_i32_1 = arith.constant 0 : i32
    %c0_i32_2 = arith.constant 0 : i32
    return %arg0, %c0_i32, %c0_i32_0, %c0_i32_1 : i32, i32, i32, i32
  }
  func.func @transform_5(%arg0: i32) -> (i32, i32, i32) {
    %c0_i32 = arith.constant 0 : i32
    %c0_i32_0 = arith.constant 0 : i32
    %c0_i32_1 = arith.constant 0 : i32
    return %arg0, %c0_i32, %c0_i32_0 : i32, i32, i32
  }
}

</mosaic_0001>

<bundles_post_ra>
// kernel: upblock_attention_threefeature.4
= control target key start
LH: loop header
LB: loop body
LE: loop exit
PB: predicated region body
PF: predicated region fallthrough
CT: control target
= control target key end

     0   :  { %s815_s18 = smov 0   ;;  %s1055_s0 = inlined_call_operand.vmem [shape: f32[2,8,8,4], index: 0, kind: input, shape index: {}]   ;;  %s1056_s1 = inlined_call_operand.vmem [shape: f32[2,16,16,4], index: 1, kind: input, shape index: {}]   ;;  %s1057_s2 = inlined_call_operand.vmem [shape: f32[2,16,16,4], index: 2, kind: input, shape index: {}]   ;;  %s1058_s3 = inlined_call_operand.vmem [shape: f32[12,4], index: 3, kind: input, shape index: {}]   ;;  %s1059_s4 = inlined_call_operand.vmem [shape: f32[1,4], index: 4, kind: input, shape index: {}]   ;;  %s1060_s5 = inlined_call_operand.vmem [shape: f32[2,8,8,4], index: 5, kind: output, shape index: {}]  }
   0x1 LB: > { %s717_s19 = sadd.s32 4294967295, %s777_s18   ;;  %p721_p0 = scmp.ge.s32.totalorder %s777_s18, 1  ;;  %s777_s18 = sphi %s815_s18, %s15_s18  }
   0x2   : > { %p207_p1 = scmp.lt.s32.totalorder %s777_s18, 3 }
   0x4   : > { %p208_p2 = pnand %p721_p0, %p207_p1 }
   0x5   : > { %p245_p3 = scmp.lt.s32.totalorder (!%p208_p2), %s717_s19, 1  ;;  %vm297_vm0 = vcmask (!%p208_p2), 31744   ;;  %vm530_vm1 = vcmask (!%p208_p2), 1043456   ;;  %vm780_vm2 = vmmov (!%p208_p2), 1   ;;  %vm781_vm4 = vmmov (!%p208_p2), 0   ;;  %s783_s7 = smov (!%p208_p2), 4  }
   0x6   : > { %211 = sbr.rel (%p208_p2) target bundleno = 438 (0x1b6), region = 40  ;;  %vm751_vm3 = vmpackc.low (!%p208_p2), %vm530_vm1, %vm780_vm2  ;;  %s784_s8 = smov (!%p208_p2), 8   ;;  %vm521_vm5 = vcmask (!%p208_p2), 64512   ;;  %vm526_vm6 = vcmask (!%p208_p2), 97280  }
   0xd   : > { %s1062_s19 = smov (!%p245_p3, %s717_s19), 1 }
   0xe   : > { %s736_s20 = sshll.u32 %s1062_s19, 8  ;;  %s735_s24 = sshll.u32 %s1062_s19, 6 }
   0xf   : > { %s831_s23 = scalar_lea.vmem %s1057_s2, %s736_s20  ;;  %s864_s27 = scalar_lea.vmem %s1055_s0, %s735_s24 }
  0x10   : > { %v373_v0 = vld [vmem:[%s831_s23] sm:$0xff]  ;;  %v374_v1 = vld [vmem:[%s831_s23 + $0x8] sm:$0xff]  ;;  %v375_v2 = vld [vmem:[%s831_s23 + $0x10] sm:$0xff]  ;;  %s959_s11 = scalar_lea.vmem %s1056_s1, %s736_s20  ;;  %s264_s16 = scalar_lea.vmem %s1060_s5, %s735_s24 }
  0x11   : > { %v376_v3 = vld [vmem:[%s831_s23 + $0x18] sm:$0xff]  ;;  %v377_v4 = vld [vmem:[%s831_s23 + $0x20] sm:$0xff]  ;;  %v378_v5 = vld [vmem:[%s831_s23 + $0x28] sm:$0xff]  ;;  %v405_v6 = vsel %vm297_vm0, %v373_v0, 0.0  ;;  %v406_v7 = vsel %vm297_vm0, %v375_v2, 0.0  ;;  %v436_v8 = vsel %vm297_vm0, %v374_v1, 0.0 }
  0x12   : > { %v379_v9 = vld [vmem:[%s831_s23 + $0x30] sm:$0xff]  ;;  %v380_v10 = vld [vmem:[%s831_s23 + $0x38] sm:$0xff]  ;;  %v381_v11 = vld [vmem:[%s831_s23 + $0x40] sm:$0xff]  ;;  %v407_v12 = vadd.f32 %v406_v7, %v405_v6  ;;  %v408_v13 = vsel %vm297_vm0, %v377_v4, 0.0  ;;  %v437_v14 = vsel %vm297_vm0, %v376_v3, 0.0  ;;  %v439_v15 = vsel %vm297_vm0, %v378_v5, 0.0 }
  0x13   : > { %v382_v16 = vld [vmem:[%s831_s23 + $0x48] sm:$0xff]  ;;  %v410_v17 = vsel %vm297_vm0, %v379_v9, 0.0  ;;  %v438_v18 = vadd.f32 %v437_v14, %v436_v8  ;;  %v383_v19 = vld [vmem:[%s831_s23 + $0x50] sm:$0xff]  ;;  %v441_v21 = vsel %vm297_vm0, %v380_v10, 0.0  ;;  %v384_v22 = vld [vmem:[%s831_s23 + $0x58] sm:$0xff]  ;;  %v412_v23 = vsel %vm297_vm0, %v381_v11, 0.0 }
  0x14   : > { %v409_v20 = vadd.f32 %v408_v13, %v407_v12  ;;  %v385_v25 = vld [vmem:[%s831_s23 + $0x60] sm:$0xff]  ;;  %v443_v27 = vsel %vm297_vm0, %v382_v16, 0.0  ;;  %v386_v28 = vld [vmem:[%s831_s23 + $0x68] sm:$0xff]  ;;  %v414_v29 = vsel %vm297_vm0, %v383_v19, 0.0  ;;  %v387_v31 = vld [vmem:[%s831_s23 + $0x70] sm:$0xff]  ;;  %v445_v33 = vsel %vm297_vm0, %v384_v22, 0.0 }
  0x15   : > { %v440_v24 = vadd.f32 %v439_v15, %v438_v18  ;;  %v388_v34 = vld [vmem:[%s831_s23 + $0x78] sm:$0xff]  ;;  %v416_v35 = vsel %vm297_vm0, %v385_v25, 0.0  ;;  %v389_v37 = vld [vmem:[%s831_s23 + $0x80] sm:$0xff]  ;;  %v390_v38 = vld [vmem:[%s831_s23 + $0x88] sm:$0xff]  ;;  %v447_v40 = vsel %vm297_vm0, %v386_v28, 0.0  ;;  %v418_v42 = vsel %vm297_vm0, %v387_v31, 0.0 }
  0x16   : > { %v411_v26 = vadd.f32 %v410_v17, %v409_v20  ;;  %v874_v41 = vld [vmem:[%s864_s27] sm:$0xff]  ;;  %v878_v44 = vld [vmem:[%s864_s27 + $0x8] sm:$0xff]  ;;  %v881_v45 = vld [vmem:[%s864_s27 + $0x10] sm:$0xff]  ;;  %v449_v50 = vsel %vm297_vm0, %v388_v34, 0.0  ;;  %v420_v54 = vsel %vm297_vm0, %v389_v37, 0.0  ;;  %v451_v60 = vsel %vm297_vm0, %v390_v38, 0.0 }
  0x17   : > { %v442_v30 = vadd.f32 %v441_v21, %v440_v24  ;;  %v884_v46 = vld [vmem:[%s864_s27 + $0x18] sm:$0xff]  ;;  %v487_v47 = vsel %vm297_vm0, %v874_v41, 0.0  ;;  %v391_v48 = vld [vmem:[%s831_s23 + $0x90] sm:$0xff]  ;;  %v488_v51 = vsel %vm297_vm0, %v878_v44, 0.0  ;;  %v490_v52 = vsel %vm297_vm0, %v881_v45, 0.0  ;;  %v897_v56 = vld [vmem:[%s864_s27 + $0x20] sm:$0xff] }
  0x18   : > { %v413_v32 = vadd.f32 %v412_v23, %v411_v26  ;;  %v392_v53 = vld [vmem:[%s831_s23 + $0x98] sm:$0xff]  ;;  %v489_v57 = vadd.f32 %v488_v51, %v487_v47  ;;  %v393_v58 = vld [vmem:[%s831_s23 + $0xa0] sm:$0xff]  ;;  %v492_v61 = vsel %vm297_vm0, %v884_v46, 0.0  ;;  %v394_v62 = vld [vmem:[%s831_s23 + $0xa8] sm:$0xff]  ;;  %v422_v63 = vsel %vm297_vm0, %v391_v48, 0.0 }
  0x19   : > { %v444_v36 = vadd.f32 %v443_v27, %v442_v30  ;;  %v906_v1 = vld [vmem:[%s864_s27 + $0x28] sm:$0xff]  ;;  %v395_v3 = vld [vmem:[%s831_s23 + $0xb0] sm:$0xff]  ;;  %v453_v5 = vsel %vm297_vm0, %v392_v53, 0.0  ;;  %v494_v6 = vsel %vm297_vm0, %v897_v56, 0.0  ;;  %v396_v7 = vld [vmem:[%s831_s23 + $0xb8] sm:$0xff]  ;;  %v424_v8 = vsel %vm297_vm0, %v393_v58, 0.0 }
  0x1a   : > { %v415_v39 = vadd.f32 %v414_v29, %v413_v32  ;;  %v491_v2 = vadd.f32 %v490_v52, %v489_v57  ;;  %v915_v10 = vld [vmem:[%s864_s27 + $0x30] sm:$0xff]  ;;  %v397_v12 = vld [vmem:[%s831_s23 + $0xc0] sm:$0xff]  ;;  %v455_v14 = vsel %vm297_vm0, %v394_v62, 0.0  ;;  %v496_v15 = vsel %vm297_vm0, %v906_v1, 0.0  ;;  %v398_v16 = vld [vmem:[%s831_s23 + $0xc8] sm:$0xff] }
  0x1b   : > { %v446_v43 = vadd.f32 %v445_v33, %v444_v36  ;;  %v426_v17 = vsel %vm297_vm0, %v395_v3, 0.0  ;;  %v924_v19 = vld [vmem:[%s864_s27 + $0x38] sm:$0xff]  ;;  %v399_v21 = vld [vmem:[%s831_s23 + $0xd0] sm:$0xff]  ;;  %v457_v23 = vsel %vm297_vm0, %v396_v7, 0.0  ;;  %v498_v24 = vsel %vm297_vm0, %v915_v10, 0.0  ;;  %v401_v29 = vld [vmem:[%s831_s23 + $0xe0] sm:$0xff] }
  0x1c   : > { %v417_v49 = vadd.f32 %v416_v35, %v415_v39  ;;  %v493_v11 = vadd.f32 %v492_v61, %v491_v2  ;;  %v400_v25 = vld [vmem:[%s831_s23 + $0xd8] sm:$0xff]  ;;  %v428_v26 = vsel %vm297_vm0, %v397_v12, 0.0  ;;  %v459_v31 = vsel %vm297_vm0, %v398_v16, 0.0  ;;  %v402_v33 = vld [vmem:[%s831_s23 + $0xe8] sm:$0xff]  ;;  %v403_v37 = vld [vmem:[%s831_s23 + $0xf0] sm:$0xff] }
  0x1d   : > { %v448_v55 = vadd.f32 %v447_v40, %v446_v43  ;;  %v500_v32 = vsel %vm297_vm0, %v924_v19, 0.0  ;;  %v430_v34 = vsel %vm297_vm0, %v399_v21, 0.0  ;;  %v461_v39 = vsel %vm297_vm0, %v400_v25, 0.0  ;;  %v404_v40 = vld [vmem:[%s831_s23 + $0xf8] sm:$0xff]  ;;  %v524_v7 = vld [vmem:[%s1058_s3 + $0x8] sm:$0xf] }
  0x1e   : > { %v419_v59 = vadd.f32 %v418_v42, %v417_v49  ;;  %v495_v20 = vadd.f32 %v494_v6, %v493_v11  ;;  %v432_v42 = vsel %vm297_vm0, %v401_v29, 0.0  ;;  %v463_v49 = vsel %vm297_vm0, %v402_v33, 0.0  ;;  %v523_v6 = vld [vmem:[%s1058_s3] sm:$0xff]  ;;  %v267_v25 = vld [vmem:[%s959_s11 + $0x10] sm:$0xff] }
  0x1f   : > { %v450_v0 = vadd.f32 %v449_v50, %v448_v55  ;;  %v434_v50 = vsel %vm297_vm0, %v403_v37, 0.0  ;;  %v779_v12 = vmov 0.0|0.0   ;;  %v782_v16 = vmov 0.0   ;;  %v271_v37 = vld [vmem:[%s959_s11 + $0x30] sm:$0xff] }
  0x20   : > { %v421_v4 = vadd.f32 %v420_v54, %v419_v59  ;;  %v497_v28 = vadd.f32 %v496_v15, %v495_v20  ;;  %v465_v54 = vsel %vm297_vm0, %v404_v40, 0.0  ;;  %749 = vmatprep.subr.bf16.mxu0 %v779_v12  ;;  %746 = vmatprep.mubr.msk.f32.mxu0 %vm781_vm4, %v782_v16  ;;  %v283_v16 = vld [vmem:[%s959_s11 + $0x90] sm:$0xff] }
  0x21   : > { %v452_v9 = vadd.f32 %v451_v60, %v450_v0 }
  0x22   : > { %v423_v13 = vadd.f32 %v422_v63, %v421_v4  ;;  %v499_v36 = vadd.f32 %v498_v24, %v497_v28  ;;  %v266_v24 = vld [vmem:[%s959_s11 + $0x8] sm:$0xff]  ;;  %v299_v28 = vsel %vm297_vm0, %v267_v25, 0.0 }
  0x23   : > { %v454_v18 = vadd.f32 %v453_v5, %v452_v9  ;;  %v329_v29 = vsel %vm297_vm0, %v266_v24, 0.0  ;;  %v286_v24 = vld [vmem:[%s959_s11 + $0xa8] sm:$0xff] }
  0x24   : > { %v425_v22 = vadd.f32 %v424_v8, %v423_v13  ;;  %v501_v47 = vadd.f32 %v500_v32, %v499_v36  ;;  %v750_v8 = vpack.c.bf16 %v524_v7, %v523_v6  ;;  %v270_v32 = vld [vmem:[%s959_s11 + $0x28] sm:$0xff] }
  0x25   : > { %v456_v27 = vadd.f32 %v455_v14, %v454_v18  ;;  %v332_v36 = vsel %vm297_vm0, %v270_v32, 0.0 }
  0x26   : > { %v427_v30 = vadd.f32 %v426_v17, %v425_v22  ;;  %v503_v52 = vmul.f32 0.125, %v501_v47  ;;  %752 = vmatpush3.bf16.msk.msra.mxu0 %vm751_vm3, %v750_v8  ;;  %v273_v47 = vld [vmem:[%s959_s11 + $0x40] sm:$0xff] }
  0x27   : > { %v458_v35 = vadd.f32 %v457_v23, %v456_v27  ;;  %v265_v23 = vld [vmem:[%s959_s11] sm:$0xff] }
  0x28   : > { %v429_v38 = vadd.f32 %v428_v26, %v427_v30  ;;  %v504_v57 = vsel %vm297_vm0, %v503_v52, 0.0  ;;  %v268_v26 = vld [vmem:[%s959_s11 + $0x18] sm:$0xff]  ;;  %v298_v27 = vsel %vm297_vm0, %v265_v23, 0.0  ;;  %v285_v23 = vld [vmem:[%s959_s11 + $0xa0] sm:$0xff] }
  0x29   : > { %v460_v43 = vadd.f32 %v459_v31, %v458_v35  ;;  %v505_v59 = vrot.slane %v504_v57, 4  ;;  %v330_v30 = vsel %vm297_vm0, %v268_v26, 0.0  ;;  %v269_v31 = vld [vmem:[%s959_s11 + $0x20] sm:$0xff]  ;;  %v300_v33 = vadd.f32 %v299_v28, %v298_v27 }
  0x2a   : > { %v431_v48 = vadd.f32 %v430_v34, %v429_v38  ;;  %v331_v34 = vadd.f32 %v330_v30, %v329_v29  ;;  %v301_v35 = vsel %vm297_vm0, %v269_v31, 0.0  ;;  %v272_v38 = vld [vmem:[%s959_s11 + $0x38] sm:$0xff]  ;;  %v317_v27 = vsel %vm297_vm0, %v285_v23, 0.0  ;;  %v287_v29 = vld [vmem:[%s959_s11 + $0xb0] sm:$0xff] }
  0x2b   : > { %v462_v51 = vadd.f32 %v461_v39, %v460_v43  ;;  %v506_v62 = vadd.f32 %v505_v59, %v504_v57  ;;  %v302_v39 = vadd.f32 %v301_v35, %v300_v33  ;;  %v334_v43 = vsel %vm297_vm0, %v272_v38, 0.0  ;;  %v288_v30 = vld [vmem:[%s959_s11 + $0xb8] sm:$0xff]  ;;  %v289_v35 = vld [vmem:[%s959_s11 + $0xc0] sm:$0xff] }
  0x2c   : > { %v433_v53 = vadd.f32 %v432_v42, %v431_v48  ;;  %v333_v40 = vadd.f32 %v332_v36, %v331_v34  ;;  %v303_v42 = vsel %vm297_vm0, %v271_v37, 0.0  ;;  %v274_v48 = vld [vmem:[%s959_s11 + $0x48] sm:$0xff]  ;;  %v348_v28 = vsel %vm297_vm0, %v286_v24, 0.0 }
  0x2d   : > { %v464_v55 = vadd.f32 %v463_v49, %v462_v51  ;;  %v507_v4 = vrot.slane %v506_v62, 2  ;;  %v304_v49 = vadd.f32 %v303_v42, %v302_v39  ;;  %v305_v51 = vsel %vm297_vm0, %v273_v47, 0.0  ;;  %v290_v36 = vld [vmem:[%s959_s11 + $0xc8] sm:$0xff]  ;;  %v291_v42 = vld [vmem:[%s959_s11 + $0xd0] sm:$0xff] }
  0x2e   : > { %v435_v58 = vadd.f32 %v434_v50, %v433_v53  ;;  %v335_v50 = vadd.f32 %v334_v43, %v333_v40  ;;  %v336_v52 = vsel %vm297_vm0, %v274_v48, 0.0  ;;  %v275_v53 = vld [vmem:[%s959_s11 + $0x50] sm:$0xff]  ;;  %v319_v33 = vsel %vm297_vm0, %v287_v29, 0.0  ;;  %v292_v43 = vld [vmem:[%s959_s11 + $0xd8] sm:$0xff] }
  0x2f   : > { %v466_v60 = vadd.f32 %v465_v54, %v464_v55  ;;  %v508_v11 = vadd.f32 %v507_v4, %v506_v62  ;;  %v276_v54 = vld [vmem:[%s959_s11 + $0x58] sm:$0xff]  ;;  %v306_v55 = vadd.f32 %v305_v51, %v304_v49  ;;  %v350_v34 = vsel %vm297_vm0, %v288_v30, 0.0  ;;  %v293_v51 = vld [vmem:[%s959_s11 + $0xe0] sm:$0xff] }
  0x30   : > { %v467_v61 = vmul.f32 0.0625, %v435_v58  ;;  %v337_v57 = vadd.f32 %v336_v52, %v335_v50  ;;  %v307_v58 = vsel %vm297_vm0, %v275_v53, 0.0  ;;  %v338_v59 = vsel %vm297_vm0, %v276_v54, 0.0  ;;  %v280_v4 = vld [vmem:[%s959_s11 + $0x78] sm:$0xff]  ;;  %v294_v52 = vld [vmem:[%s959_s11 + $0xe8] sm:$0xff] }
  0x31   : > { %v468_v63 = vmul.f32 0.0625, %v466_v60  ;;  %v509_v15 = vrot.slane %v508_v11, 1  ;;  %v277_v60 = vld [vmem:[%s959_s11 + $0x60] sm:$0xff]  ;;  %v308_v62 = vadd.f32 %v307_v58, %v306_v55  ;;  %v342_v8 = vsel %vm297_vm0, %v280_v4, 0.0  ;;  %v295_v58 = vld [vmem:[%s959_s11 + $0xf0] sm:$0xff] }
  0x32   : > { %v469_v0 = vsel %vm297_vm0, %v467_v61, 0.0  ;;  %v278_v61 = vld [vmem:[%s959_s11 + $0x68] sm:$0xff]  ;;  %v321_v39 = vsel %vm297_vm0, %v289_v35, 0.0  ;;  %v352_v40 = vsel %vm297_vm0, %v290_v36, 0.0  ;;  %v323_v49 = vsel %vm297_vm0, %v291_v42, 0.0 }
  0x33   : > { %v470_v2 = vsel %vm297_vm0, %v468_v63, 0.0  ;;  %v510_v20 = vadd.f32 %v509_v15, %v508_v11  ;;  %v339_v63 = vadd.f32 %v338_v59, %v337_v57  ;;  %v282_v11 = vld [vmem:[%s959_s11 + $0x88] sm:$0xff]  ;;  %v354_v50 = vsel %vm297_vm0, %v292_v43, 0.0  ;;  %v296_v59 = vld [vmem:[%s959_s11 + $0xf8] sm:$0xff] }
  0x34   : > { %v471_v3 = vadd.f32 %v470_v2, %v469_v0  ;;  %v309_v0 = vsel %vm297_vm0, %v277_v60, 0.0  ;;  %v340_v2 = vsel %vm297_vm0, %v278_v61, 0.0  ;;  %v344_v15 = vsel %vm297_vm0, %v282_v11, 0.0 }
  0x35   : > { %v511_v22 = vmul.f32 0.125, %v510_v20  ;;  %v341_v6 = vadd.f32 %v340_v2, %v339_v63  ;;  %v325_v55 = vsel %vm297_vm0, %v293_v51, 0.0  ;;  %v356_v57 = vsel %vm297_vm0, %v294_v52, 0.0 }
  0x36   : > { %v472_v5 = vrot.slane %v471_v3, 4  ;;  %v358_v63 = vsel %vm297_vm0, %v296_v59, 0.0 }
  0x38   : > { %v473_v9 = vadd.f32 %v472_v5, %v471_v3  ;;  %v279_v3 = vld [vmem:[%s959_s11 + $0x70] sm:$0xff]  ;;  %v310_v5 = vadd.f32 %v309_v0, %v308_v62  ;;  %v327_v62 = vsel %vm297_vm0, %v295_v58, 0.0 }
  0x39   : > { %v311_v7 = vsel %vm297_vm0, %v279_v3, 0.0 }
  0x3a   : > { %v474_v13 = vrot.slane %v473_v9, 2  ;;  %v312_v12 = vadd.f32 %v311_v7, %v310_v5 }
  0x3c   : > { %v475_v14 = vadd.f32 %v474_v13, %v473_v9  ;;  %v281_v9 = vld [vmem:[%s959_s11 + $0x80] sm:$0xff]  ;;  %v343_v13 = vadd.f32 %v342_v8, %v341_v6 }
  0x3e   : > { %v476_v17 = vrot.slane %v475_v14, 1  ;;  %v345_v20 = vadd.f32 %v344_v15, %v343_v13 }
  0x40   : > { %v477_v18 = vadd.f32 %v476_v17, %v475_v14  ;;  %v313_v14 = vsel %vm297_vm0, %v281_v9, 0.0  ;;  %v284_v17 = vld [vmem:[%s959_s11 + $0x98] sm:$0xff] }
  0x42   : > { %v478_v21 = vmul.f32 0.0625, %v477_v18  ;;  %v314_v18 = vadd.f32 %v313_v14, %v312_v12 }
  0x44   : > { %513 = vrot.lane.b32.xlu0 %v478_v21, %s783_s7  ;;  %v315_v21 = vsel %vm297_vm0, %v283_v16, 0.0 }
  0x45   : > { %v316_v25 = vadd.f32 %v315_v21, %v314_v18  ;;  %v525_v21 = vld [vmem:[%s1059_s4] sm:$0x1] }
  0x47   : > { %v318_v31 = vadd.f32 %v317_v27, %v316_v25 }
  0x48   : > { %517 = vrot.lane.b32.xlu0 %v511_v22, %s784_s8  ;;  %v346_v22 = vsel %vm297_vm0, %v284_v17, 0.0 }
  0x49   : > { %v347_v26 = vadd.f32 %v346_v22, %v345_v20  ;;  %v320_v37 = vadd.f32 %v319_v33, %v318_v31 }
  0x4b   : > { %v349_v32 = vadd.f32 %v348_v28, %v347_v26  ;;  %v322_v47 = vadd.f32 %v321_v39, %v320_v37  ;;  %v610_v28 = vlaneseq }
  0x4d   : > { %v351_v38 = vadd.f32 %v350_v34, %v349_v32  ;;  %v324_v53 = vadd.f32 %v323_v49, %v322_v47  ;;  %v611_v29 = vshrl.u32 %v610_v28, 7 }
  0x4f   : > { %v353_v48 = vadd.f32 %v352_v40, %v351_v38  ;;  %v326_v60 = vadd.f32 %v325_v55, %v324_v53  ;;  %v612_v30 = vsub.s32 0, %v611_v29 }
  0x51   : > { %v355_v54 = vadd.f32 %v354_v50, %v353_v48  ;;  %v328_v0 = vadd.f32 %v327_v62, %v326_v60 }
  0x53   : > { %v357_v61 = vadd.f32 %v356_v57, %v355_v54  ;;  %v361_v3 = vmul.f32 0.0625, %v328_v0 }
  0x55   : > { %v359_v2 = vadd.f32 %v358_v63, %v357_v61  ;;  %v363_v5 = vsel %vm297_vm0, %v361_v3, 0.0 }
  0x57   : > { %v362_v4 = vmul.f32 0.0625, %v359_v2 }
  0x59   : > { %v364_v6 = vsel %vm297_vm0, %v362_v4, 0.0 }
  0x5a   : > { %v365_v7 = vadd.f32 %v364_v6, %v363_v5 }
  0x5c   : > { %v366_v8 = vrot.slane %v365_v7, 4 }
  0x5e   : > { %v367_v9 = vadd.f32 %v366_v8, %v365_v7 }
  0x60   : > { %v368_v11 = vrot.slane %v367_v9, 2 }
  0x62   : > { %v369_v12 = vadd.f32 %v368_v11, %v367_v9 }
  0x64   : > { %v370_v13 = vrot.slane %v369_v12, 1 }
  0x66   : > { %v371_v14 = vadd.f32 %v370_v13, %v369_v12 }
  0x68   : > { %v372_v16 = vmul.f32 0.0625, %v371_v14 }
  0xb6   : > { %v514_v15 = vpop.permute.xlu0 %513 }
  0xb7   : > { %v520_v17 = vsel %vm297_vm0, %v372_v16, %v514_v15 }
  0xba   : > { %v518_v18 = vpop.permute.xlu0 %517 }
  0xbb   : > { %v522_v20 = vsel %vm521_vm5, %v520_v17, %v518_v18 }
  0xbc   : > { %747 = vmatmul.mubr.msk.f32.vlgmr.msra.gmra.mrb[0].mxu0 %vm526_vm6, %v522_v20 }
 0x18f   : > { %v600_v22 = vpop.f32.mrb[0].mxu0 }
 0x190   : > { %v601_v23 = vadd.f32 %v600_v22, %v525_v21  ;;  %v748_v24 = vpop.f32.mrb[1].mxu0 }
 0x192   : > { %v732_v25 = vmul.f32 -1.442695, %v601_v23 }
 0x194   : > { %767 = vpow2.f32 %v732_v25 }
 0x19e   : > { %v768_v26 = vpop.eup %767 }
 0x19f   : > { %v607_v27 = vadd.f32 1.0, %v768_v26 }
 0x1a1   : > { %769 = vrcp.f32 %v607_v27 }
 0x1ab   : > { %v770_v31 = vpop.eup %769 }
 0x1ac   : > { %v613_v32 = vrot.slane %v770_v31, %v612_v30 }
 0x1ae   : > { %v614_v33 = vmul.f32 %v613_v32, %v874_v41  ;;  %v615_v34 = vmul.f32 %v613_v32, %v878_v44  ;;  %v616_v35 = vmul.f32 %v613_v32, %v881_v45  ;;  %v617_v36 = vmul.f32 %v613_v32, %v884_v46 }
 0x1af   : > { %v618_v37 = vmul.f32 %v613_v32, %v897_v56  ;;  %v619_v38 = vmul.f32 %v613_v32, %v906_v1  ;;  %v620_v39 = vmul.f32 %v613_v32, %v915_v10  ;;  %v621_v40 = vmul.f32 %v613_v32, %v924_v19 }
 0x1b0   : > { %v622_v41 = vmax.f32 %v614_v33, 0.0  ;;  %v623_v42 = vmax.f32 %v615_v34, 0.0  ;;  %v624_v44 = vmax.f32 %v616_v35, 0.0  ;;  %v625_v43 = vmax.f32 %v617_v36, 0.0 }
 0x1b1   : > { %v626_v45 = vmax.f32 %v618_v37, 0.0  ;;  %v627_v47 = vmax.f32 %v619_v38, 0.0  ;;  %v628_v46 = vmax.f32 %v620_v39, 0.0  ;;  %v629_v48 = vmax.f32 %v621_v40, 0.0 }
 0x1b2   : > { %630 = vst.msk [vmem:[%s264_s16] sm:$0xff] %vm297_vm0, %v622_v41  ;;  %631 = vst.msk [vmem:[%s264_s16 + $0x8] sm:$0xff] %vm297_vm0, %v623_v42 }
 0x1b3   : > { %632 = vst.msk [vmem:[%s264_s16 + $0x10] sm:$0xff] %vm297_vm0, %v624_v44  ;;  %633 = vst.msk [vmem:[%s264_s16 + $0x18] sm:$0xff] %vm297_vm0, %v625_v43 }
 0x1b4   : > { %634 = vst.msk [vmem:[%s264_s16 + $0x20] sm:$0xff] %vm297_vm0, %v626_v45  ;;  %635 = vst.msk [vmem:[%s264_s16 + $0x28] sm:$0xff] %vm297_vm0, %v627_v47 }
 0x1b5   : > { %636 = vst.msk [vmem:[%s264_s16 + $0x30] sm:$0xff] %vm297_vm0, %v628_v46  ;;  %637 = vst.msk [vmem:[%s264_s16 + $0x38] sm:$0xff] %vm297_vm0, %v629_v48 }
 0x1b6 PF: > { %s15_s18 = sadd.s32 1, %s777_s18  }
 0x1b7   : > { %p12_p4 = scmp.ge.s32.totalorder %s15_s18, 4  }
 0x1b9   :  { %14 = sbr.rel (!%p12_p4) target bundleno = 1 (0x1), region = 76 }

// kernel: upblock_attention_threefeature.7
= control target key start
LH: loop header
LB: loop body
LE: loop exit
PB: predicated region body
PF: predicated region fallthrough
CT: control target
= control target key end

     0   :  { %s526_s12 = smov 0   ;;  %s528_s13 = smov 0   ;;  %s671_s0 = inlined_call_operand.vmem [shape: f32[2,16,16,8], index: 0, kind: input, shape index: {}]   ;;  %s672_s1 = inlined_call_operand.vmem [shape: f32[1,8], index: 1, kind: input, shape index: {}]   ;;  %s673_s2 = inlined_call_operand.vmem [shape: f32[1,8], index: 2, kind: input, shape index: {}]   ;;  %s674_s3 = inlined_call_operand.vmem [shape: f32[2,16,16,8], index: 3, kind: output, shape index: {}]  }
   0x1   :  { %s530_s14 = smov 0   ;;  %s532_s15 = smov 0  }
   0x2   :  { %s534_s16 = smov 0  }
   0x3 LB: > { %s22_s17 = sadd.s32 1, %s496_s14  ;;  %s25_s18 = sadd.s32 1, %s500_s15  ;;  %s504_s16 = sphi %s534_s16, %s13_s16   ;;  %s500_s15 = sphi %s532_s15, %s678_s15   ;;  %s496_s14 = sphi %s530_s14, %s677_s14   ;;  %s492_s13 = sphi %s528_s13, %s676_s13   ;;  %s488_s12 = sphi %s526_s12, %s675_s12  }
   0x4   : > { %p23_p0 = scmp.ge.s32.totalorder %s22_s17, 2  ;;  %p413_p1 = scmp.ge.s32.totalorder %s504_s16, 1 }
   0x5   : > { %p159_p2 = scmp.lt.s32.totalorder %s504_s16, 5 }
   0x6   : > { %s680_s17 = smov (%p23_p0, %s22_s17), 0  ;;  %s682_s18 = smov (!%p23_p0, %s25_s18), %s500_s15 }
   0x7   : > { %p160_p3 = pnand %p413_p1, %p159_p2  ;;  %p27_p4 = scmp.ge.s32.totalorder %s682_s18, 2 }
   0x8   : > { %s414_s19 = sshll.u32 (!%p160_p3), %s488_s12, 3  ;;  %p194_p5 = scmp.lt.s32.totalorder (!%p160_p3), %s492_s13, 1  ;;  %v559_v0 = vld [vmem:[%s672_s1] ss:$0 sm:$0xff] (!%p160_p3)  ;;  %vm293_vm0 = vcmask (!%p160_p3), 64512  }
   0x9   : > { %s684_s18 = smov (%p27_p4, %s682_s18), 0  ;;  %163 = sbr.rel (%p160_p3) target bundleno = 39 (0x27), region = 32 }
   0xa   : > { %p196_p6 = scmp.lt.s32.totalorder (!%p160_p3), %s414_s19, 15  ;;  %v569_v1 = vld [vmem:[%s673_s2] ss:$0 sm:$0xff] (!%p160_p3) }
  0x10   : > { %s686_s13 = smov (!%p194_p5, %s492_s13), 1  ;;  %s688_s19 = smov (!%p196_p6, %s414_s19), 15 }
  0x11   : > { %s416_s20 = sshll.u32 %s686_s13, 5  ;;  %s415_s21 = sshll.u32 %s688_s19, 1 }
  0x12   : > { %s200_s22 = sadd.s32 %s416_s20, %s415_s21 }
  0x13   : > { %s417_s23 = sshll.u32 %s200_s22, 3 }
  0x14   : > { %s564_s28 = scalar_lea.vmem %s671_s0, %s417_s23  ;;  %s592_s6 = scalar_lea.vmem %s674_s3, %s417_s23 }
  0x15   : > { %v215_v2 = vld [vmem:[%s564_s28] sm:$0xff]  ;;  %v216_v3 = vld [vmem:[%s564_s28 + $0x8] sm:$0xff]  ;;  %v217_v4 = vld [vmem:[%s564_s28 + $0x10] sm:$0xff] }
  0x16   : > { %v238_v5 = vmul.f32 %v559_v0, %v215_v2  ;;  %v239_v6 = vmul.f32 %v559_v0, %v216_v3  ;;  %v240_v7 = vmul.f32 %v559_v0, %v217_v4  ;;  %v218_v8 = vld [vmem:[%s564_s28 + $0x18] sm:$0xff]  ;;  %v219_v9 = vld [vmem:[%s564_s28 + $0x20] sm:$0xff]  ;;  %v220_v10 = vld [vmem:[%s564_s28 + $0x28] sm:$0xff] }
  0x17   : > { %v241_v11 = vmul.f32 %v559_v0, %v218_v8  ;;  %v242_v12 = vmul.f32 %v559_v0, %v219_v9  ;;  %v243_v13 = vmul.f32 %v559_v0, %v220_v10  ;;  %v221_v14 = vld [vmem:[%s564_s28 + $0x30] sm:$0xff]  ;;  %v222_v15 = vld [vmem:[%s564_s28 + $0x38] sm:$0xff]  ;;  %v223_v24 = vld [vmem:[%s564_s28 + $0x40] sm:$0xff] }
  0x18   : > { %v261_v16 = vadd.f32 %v569_v1, %v238_v5  ;;  %v262_v17 = vadd.f32 %v569_v1, %v239_v6  ;;  %v263_v18 = vadd.f32 %v569_v1, %v240_v7  ;;  %v244_v19 = vmul.f32 %v559_v0, %v221_v14  ;;  %v224_v25 = vld [vmem:[%s564_s28 + $0x48] sm:$0xff]  ;;  %v225_v26 = vld [vmem:[%s564_s28 + $0x50] sm:$0xff]  ;;  %v226_v31 = vld [vmem:[%s564_s28 + $0x58] sm:$0xff] }
  0x19   : > { %v264_v20 = vadd.f32 %v569_v1, %v241_v11  ;;  %v265_v21 = vadd.f32 %v569_v1, %v242_v12  ;;  %v266_v22 = vadd.f32 %v569_v1, %v243_v13  ;;  %v245_v23 = vmul.f32 %v559_v0, %v222_v15  ;;  %v227_v32 = vld [vmem:[%s564_s28 + $0x60] sm:$0xff]  ;;  %v228_v33 = vld [vmem:[%s564_s28 + $0x68] sm:$0xff]  ;;  %v229_v38 = vld [vmem:[%s564_s28 + $0x70] sm:$0xff] }
  0x1a   : > { %v277_v27 = vmax.f32 %v261_v16, 0.0  ;;  %v278_v28 = vmax.f32 %v262_v17, 0.0  ;;  %v279_v29 = vmax.f32 %v263_v18, 0.0  ;;  %v267_v30 = vadd.f32 %v569_v1, %v244_v19  ;;  %v230_v43 = vld [vmem:[%s564_s28 + $0x78] sm:$0xff] }
  0x1b   : > { %v280_v34 = vmax.f32 %v264_v20, 0.0  ;;  %v281_v35 = vmax.f32 %v265_v21, 0.0  ;;  %v282_v36 = vmax.f32 %v266_v22, 0.0  ;;  %v268_v37 = vadd.f32 %v569_v1, %v245_v23 }
  0x1c   : > { %294 = vst.msk [vmem:[%s592_s6] sm:$0xff] %vm293_vm0, %v277_v27  ;;  %295 = vst.msk [vmem:[%s592_s6 + $0x8] sm:$0xff] %vm293_vm0, %v278_v28  ;;  %v283_v39 = vmax.f32 %v267_v30, 0.0  ;;  %v246_v40 = vmul.f32 %v559_v0, %v223_v24  ;;  %v247_v41 = vmul.f32 %v559_v0, %v224_v25  ;;  %v248_v42 = vmul.f32 %v559_v0, %v225_v26 }
  0x1d   : > { %296 = vst.msk [vmem:[%s592_s6 + $0x10] sm:$0xff] %vm293_vm0, %v279_v29  ;;  %297 = vst.msk [vmem:[%s592_s6 + $0x18] sm:$0xff] %vm293_vm0, %v280_v34  ;;  %v284_v44 = vmax.f32 %v268_v37, 0.0  ;;  %v249_v45 = vmul.f32 %v559_v0, %v226_v31  ;;  %v250_v46 = vmul.f32 %v559_v0, %v227_v32  ;;  %v251_v47 = vmul.f32 %v559_v0, %v228_v33 }
  0x1e   : > { %298 = vst.msk [vmem:[%s592_s6 + $0x20] sm:$0xff] %vm293_vm0, %v281_v35  ;;  %299 = vst.msk [vmem:[%s592_s6 + $0x28] sm:$0xff] %vm293_vm0, %v282_v36  ;;  %v269_v48 = vadd.f32 %v569_v1, %v246_v40  ;;  %v270_v49 = vadd.f32 %v569_v1, %v247_v41  ;;  %v271_v50 = vadd.f32 %v569_v1, %v248_v42 }
  0x1f   : > { %300 = vst.msk [vmem:[%s592_s6 + $0x30] sm:$0xff] %vm293_vm0, %v283_v39  ;;  %v252_v51 = vmul.f32 %v559_v0, %v229_v38  ;;  %301 = vst.msk [vmem:[%s592_s6 + $0x38] sm:$0xff] %vm293_vm0, %v284_v44  ;;  %v272_v52 = vadd.f32 %v569_v1, %v249_v45  ;;  %v273_v53 = vadd.f32 %v569_v1, %v250_v46 }
  0x20   : > { %v274_v54 = vadd.f32 %v569_v1, %v251_v47  ;;  %v253_v55 = vmul.f32 %v559_v0, %v230_v43  ;;  %v285_v56 = vmax.f32 %v269_v48, 0.0  ;;  %v286_v57 = vmax.f32 %v270_v49, 0.0 }
  0x21   : > { %v287_v58 = vmax.f32 %v271_v50, 0.0  ;;  %v275_v59 = vadd.f32 %v569_v1, %v252_v51  ;;  %v288_v60 = vmax.f32 %v272_v52, 0.0  ;;  %v289_v61 = vmax.f32 %v273_v53, 0.0 }
  0x22   : > { %v290_v62 = vmax.f32 %v274_v54, 0.0  ;;  %v276_v63 = vadd.f32 %v569_v1, %v253_v55  ;;  %302 = vst.msk [vmem:[%s592_s6 + $0x40] sm:$0xff] %vm293_vm0, %v285_v56  ;;  %303 = vst.msk [vmem:[%s592_s6 + $0x48] sm:$0xff] %vm293_vm0, %v286_v57 }
  0x23   : > { %304 = vst.msk [vmem:[%s592_s6 + $0x50] sm:$0xff] %vm293_vm0, %v287_v58  ;;  %v291_v2 = vmax.f32 %v275_v59, 0.0  ;;  %305 = vst.msk [vmem:[%s592_s6 + $0x58] sm:$0xff] %vm293_vm0, %v288_v60 }
  0x24   : > { %306 = vst.msk [vmem:[%s592_s6 + $0x60] sm:$0xff] %vm293_vm0, %v289_v61  ;;  %307 = vst.msk [vmem:[%s592_s6 + $0x68] sm:$0xff] %vm293_vm0, %v290_v62  ;;  %v292_v0 = vmax.f32 %v276_v63, 0.0 }
  0x25   : > { %308 = vst.msk [vmem:[%s592_s6 + $0x70] sm:$0xff] %vm293_vm0, %v291_v2 }
  0x26   : > { %309 = vst.msk [vmem:[%s592_s6 + $0x78] sm:$0xff] %vm293_vm0, %v292_v0 }
  0x27 PF: > { %s13_s16 = sadd.s32 1, %s504_s16   ;;  %s675_s12 = smov %s496_s14 }
  0x28   : > { %p10_p7 = scmp.ge.s32.totalorder %s13_s16, 6   ;;  %s676_s13 = smov %s500_s15 }
  0x29   : > { %s677_s14 = smov %s680_s17  ;;  %s678_s15 = smov %s684_s18 }
  0x2a   :  { %12 = sbr.rel (!%p10_p7) target bundleno = 3 (0x3), region = 62 }

// kernel: upblock_attention_threefeature.5
= control target key start
LH: loop header
LB: loop body
LE: loop exit
PB: predicated region body
PF: predicated region fallthrough
CT: control target
= control target key end

     0   :  { %s3079_s18 = smov 0   ;;  %s4265_s0 = inlined_call_operand.vmem [shape: f32[2,16,16,4], index: 0, kind: input, shape index: {}]   ;;  %s4266_s1 = inlined_call_operand.vmem [shape: f32[2,16,16,4], index: 1, kind: input, shape index: {}]   ;;  %s4267_s2 = inlined_call_operand.vmem [shape: f32[2,16,16,4], index: 2, kind: input, shape index: {}]   ;;  %s4268_s3 = inlined_call_operand.vmem [shape: f32[3,36,8], index: 3, kind: input, shape index: {}]   ;;  %s4269_s4 = inlined_call_operand.vmem [shape: f32[2,16,16,8], index: 4, kind: output, shape index: {0}]   ;;  %s4270_s5 = inlined_call_operand.vmem [shape: f32[2,2,8], index: 5, kind: output, shape index: {1}]  }
   0x1 LB: > { %s2525_s19 = sadd.s32 4294967295, %s3042_s18   ;;  %p2529_p0 = scmp.ge.s32.totalorder %s3042_s18, 1  ;;  %s3042_s18 = sphi %s3079_s18, %s16_s18  }
   0x2   : > { %p210_p1 = scmp.lt.s32.totalorder %s3042_s18, 3 }
   0x4   : > { %p211_p2 = pnand %p2529_p0, %p210_p1 }
   0x5   : > { %p3089_p3 = scmp.lt.s32.totalorder (!%p211_p2), %s2525_s19, 1  ;;  %vm276_vm0 = vcmask (!%p211_p2), 97280   ;;  %v3044_v0 = vmov (!%p211_p2), 0.0   ;;  %vm279_vm1 = vcmask (!%p211_p2), 91136   ;;  %s3045_s28 = smov (!%p211_p2), 4   ;;  %vm365_vm2 = vcmask (!%p211_p2), 31744  }
   0x6   : > { %214 = sbr.rel (%p211_p2) target bundleno = 665 (0x299), region = 36  ;;  %281 = vst.msk [vmem:[#allocation2 + $0x18] sm:$0xff] (!%p211_p2), %vm276_vm0, %v3044_v0  ;;  %282 = vst.msk [vmem:[#allocation2 + $0x20] sm:$0xff] (!%p211_p2), %vm276_vm0, %v3044_v0  ;;  %s3046_s29 = smov (!%p211_p2), 8   ;;  %vm558_vm3 = vcmask (!%p211_p2), 64544   ;;  %vm751_vm4 = vcmask (!%p211_p2), 97344  }
   0x7   : > { %277 = vst.msk [vmem:[#allocation2] sm:$0xff] (!%p211_p2), %vm276_vm0, %v3044_v0  ;;  %278 = vst.msk [vmem:[#allocation2 + $0x8] sm:$0xff] (!%p211_p2), %vm276_vm0, %v3044_v0  ;;  %vm901_vm5 = vcmask (!%p211_p2), 1046528   ;;  %vm1446_vm6 = vcmask (!%p211_p2), 1043456   ;;  %vm1078_vm7 = vcmask (!%p211_p2), 1045504   ;;  %vm1287_vm8 = vcmask (!%p211_p2), 195584  }
   0x8   : > { %284 = vst.msk [vmem:[#allocation2 + $0x30] sm:$0xff] (!%p211_p2), %vm276_vm0, %v3044_v0  ;;  %285 = vst.msk [vmem:[#allocation2 + $0x38] sm:$0xff] (!%p211_p2), %vm276_vm0, %v3044_v0  ;;  %vm1349_vm9 = vcmask (!%p211_p2), 293888   ;;  %vm2204_vm10 = vcmask (!%p211_p2), 64512   ;;  %vm2411_vm11 = vcmask (!%p211_p2), 1040384   ;;  %vm2413_vm12 = vcmask (!%p211_p2), 58368  }
   0x9   : > { %287 = vst.msk [vmem:[#allocation2 + $0x48] sm:$0xff] (!%p211_p2), %vm276_vm0, %v3044_v0  ;;  %288 = vst.msk [vmem:[#allocation2 + $0x50] sm:$0xff] (!%p211_p2), %vm276_vm0, %v3044_v0 }
   0xa   : > { %290 = vst.msk [vmem:[#allocation2 + $0x60] sm:$0xff] (!%p211_p2), %vm276_vm0, %v3044_v0  ;;  %291 = vst.msk [vmem:[#allocation2 + $0x68] sm:$0xff] (!%p211_p2), %vm276_vm0, %v3044_v0 }
   0xb   : > { %293 = vst.msk [vmem:[#allocation2 + $0x78] sm:$0xff] (!%p211_p2), %vm276_vm0, %v3044_v0  ;;  %294 = vst.msk [vmem:[#allocation2 + $0x80] sm:$0xff] (!%p211_p2), %vm276_vm0, %v3044_v0 }
   0xc   : > { %296 = vst.msk [vmem:[#allocation2 + $0x90] sm:$0xff] (!%p211_p2), %vm276_vm0, %v3044_v0  ;;  %297 = vst.msk [vmem:[#allocation2 + $0x98] sm:$0xff] (!%p211_p2), %vm276_vm0, %v3044_v0 }
   0xd   : > { %299 = vst.msk [vmem:[#allocation2 + $0xa8] sm:$0xff] %vm276_vm0, %v3044_v0  ;;  %300 = vst.msk [vmem:[#allocation2 + $0xb0] sm:$0xff] %vm276_vm0, %v3044_v0  ;;  %s4273_s19 = smov (!%p3089_p3, %s2525_s19), 1 }
   0xe   : > { %302 = vst.msk [vmem:[#allocation2 + $0xc0] sm:$0xff] %vm276_vm0, %v3044_v0  ;;  %303 = vst.msk [vmem:[#allocation2 + $0xc8] sm:$0xff] %vm276_vm0, %v3044_v0  ;;  %s3154_s21 = sshll.u32 %s4273_s19, 8 }
   0xf   : > { %305 = vst.msk [vmem:[#allocation2 + $0xd8] sm:$0xff] %vm276_vm0, %v3044_v0  ;;  %306 = vst.msk [vmem:[#allocation2 + $0xe0] sm:$0xff] %vm276_vm0, %v3044_v0  ;;  %s3160_s24 = scalar_lea.vmem %s4266_s1, %s3154_s21  ;;  %s3166_s27 = scalar_lea.vmem %s4267_s2, %s3154_s21 }
  0x10   : > { %308 = vst.msk [vmem:[#allocation2 + $0xf0] sm:$0xff] %vm276_vm0, %v3044_v0  ;;  %309 = vst.msk [vmem:[#allocation2 + $0xf8] sm:$0xff] %vm276_vm0, %v3044_v0  ;;  %v398_v1 = vld [vmem:[%s3160_s24] sm:$0xff]  ;;  %v399_v3 = vld [vmem:[%s3160_s24 + $0x8] sm:$0xff]  ;;  %s3194_s7 = scalar_lea.vmem %s4265_s0, %s3154_s21  ;;  %s4088_s23 = scalar_lea.vmem %s4269_s4, %s3154_s21 }
  0x11   : > { %311 = vst.msk [vmem:[#allocation2 + $0x108] sm:$0xff] %vm276_vm0, %v3044_v0  ;;  %312 = vst.msk [vmem:[#allocation2 + $0x110] sm:$0xff] %vm276_vm0, %v3044_v0  ;;  %v591_v2 = vld [vmem:[%s3166_s27] sm:$0xff]  ;;  %462 = vrot.lane.b32.xlu0 %v398_v1, %s3045_s28  ;;  %v592_v4 = vld [vmem:[%s3166_s27 + $0x8] sm:$0xff]  ;;  %s2538_s21 = sshll.u32 %s4273_s19, 1 }
  0x12   : > { %314 = vst.msk [vmem:[#allocation2 + $0x120] sm:$0xff] %vm276_vm0, %v3044_v0  ;;  %315 = vst.msk [vmem:[#allocation2 + $0x128] sm:$0xff] %vm276_vm0, %v3044_v0  ;;  %655 = vrot.lane.b32.xlu1 %v591_v2, %s3046_s29  ;;  %v400_v5 = vld [vmem:[%s3160_s24 + $0x10] sm:$0xff]  ;;  %v401_v6 = vld [vmem:[%s3160_s24 + $0x18] sm:$0xff]  ;;  %s275_s26 = scalar_lea.vmem %s4270_s5, %s2538_s21 }
  0x13   : > { %317 = vst.msk [vmem:[#allocation2 + $0x138] sm:$0xff] %vm276_vm0, %v3044_v0  ;;  %318 = vst.msk [vmem:[#allocation2 + $0x140] sm:$0xff] %vm276_vm0, %v3044_v0  ;;  %v593_v7 = vld [vmem:[%s3166_s27 + $0x10] sm:$0xff]  ;;  %v594_v8 = vld [vmem:[%s3166_s27 + $0x18] sm:$0xff] }
  0x14   : > { %320 = vst.msk [vmem:[#allocation2 + $0x150] sm:$0xff] %vm276_vm0, %v3044_v0  ;;  %321 = vst.msk [vmem:[#allocation2 + $0x158] sm:$0xff] %vm276_vm0, %v3044_v0  ;;  %v402_v9 = vld [vmem:[%s3160_s24 + $0x20] sm:$0xff]  ;;  %v403_v10 = vld [vmem:[%s3160_s24 + $0x28] sm:$0xff] }
  0x15   : > { %323 = vst.msk [vmem:[#allocation2 + $0x168] sm:$0xff] %vm276_vm0, %v3044_v0  ;;  %324 = vst.msk [vmem:[#allocation2 + $0x170] sm:$0xff] %vm276_vm0, %v3044_v0  ;;  %464 = vrot.lane.b32.xlu0 %v399_v3, %s3045_s28  ;;  %v595_v11 = vld [vmem:[%s3166_s27 + $0x20] sm:$0xff]  ;;  %v596_v12 = vld [vmem:[%s3166_s27 + $0x28] sm:$0xff] }
  0x16   : > { %326 = vst.msk [vmem:[#allocation2 + $0x180] sm:$0xff] %vm276_vm0, %v3044_v0  ;;  %327 = vst.msk [vmem:[#allocation2 + $0x188] sm:$0xff] %vm276_vm0, %v3044_v0  ;;  %657 = vrot.lane.b32.xlu1 %v592_v4, %s3046_s29  ;;  %v332_v13 = vld [vmem:[%s3194_s7] sm:$0xff]  ;;  %v404_v14 = vld [vmem:[%s3160_s24 + $0x30] sm:$0xff] }
  0x17   : > { %329 = vst.msk [vmem:[#allocation2 + $0x198] sm:$0xff] %vm276_vm0, %v3044_v0  ;;  %330 = vst.msk [vmem:[#allocation2 + $0x1a0] sm:$0xff] %vm276_vm0, %v3044_v0  ;;  %v405_v15 = vld [vmem:[%s3160_s24 + $0x38] sm:$0xff]  ;;  %v333_v16 = vld [vmem:[%s3194_s7 + $0x8] sm:$0xff] }
  0x18   : > { %283 = vst.msk [vmem:[#allocation2 + $0x28] sm:$0x3] %vm279_vm1, %v3044_v0  ;;  %280 = vst.msk [vmem:[#allocation2 + $0x10] sm:$0x3] %vm279_vm1, %v3044_v0  ;;  %v334_v17 = vld [vmem:[%s3194_s7 + $0x10] sm:$0xff]  ;;  %v335_v18 = vld [vmem:[%s3194_s7 + $0x18] sm:$0xff] }
  0x19   : > { %286 = vst.msk [vmem:[#allocation2 + $0x40] sm:$0x3] %vm279_vm1, %v3044_v0  ;;  %289 = vst.msk [vmem:[#allocation2 + $0x58] sm:$0x3] %vm279_vm1, %v3044_v0  ;;  %466 = vrot.lane.b32.xlu0 %v400_v5, %s3045_s28  ;;  %v597_v19 = vld [vmem:[%s3166_s27 + $0x30] sm:$0xff]  ;;  %v598_v20 = vld [vmem:[%s3166_s27 + $0x38] sm:$0xff] }
  0x1a   : > { %292 = vst.msk [vmem:[#allocation2 + $0x70] sm:$0x3] %vm279_vm1, %v3044_v0  ;;  %295 = vst.msk [vmem:[#allocation2 + $0x88] sm:$0x3] %vm279_vm1, %v3044_v0  ;;  %468 = vrot.lane.b32.xlu1 %v401_v6, %s3045_s28  ;;  %v336_v21 = vld [vmem:[%s3194_s7 + $0x20] sm:$0xff]  ;;  %v337_v22 = vld [vmem:[%s3194_s7 + $0x28] sm:$0xff] }
  0x1b   : > { %298 = vst.msk [vmem:[#allocation2 + $0xa0] sm:$0x3] %vm279_vm1, %v3044_v0  ;;  %301 = vst.msk [vmem:[#allocation2 + $0xb8] sm:$0x3] %vm279_vm1, %v3044_v0  ;;  %v338_v23 = vld [vmem:[%s3194_s7 + $0x30] sm:$0xff]  ;;  %v339_v24 = vld [vmem:[%s3194_s7 + $0x38] sm:$0xff] }
  0x1c   : > { %304 = vst.msk [vmem:[#allocation2 + $0xd0] sm:$0x3] %vm279_vm1, %v3044_v0  ;;  %307 = vst.msk [vmem:[#allocation2 + $0xe8] sm:$0x3] %vm279_vm1, %v3044_v0  ;;  %v340_v25 = vld [vmem:[%s3194_s7 + $0x40] sm:$0xff]  ;;  %v341_v26 = vld [vmem:[%s3194_s7 + $0x48] sm:$0xff] }
  0x1d   : > { %310 = vst.msk [vmem:[#allocation2 + $0x100] sm:$0x3] %vm279_vm1, %v3044_v0  ;;  %313 = vst.msk [vmem:[#allocation2 + $0x118] sm:$0x3] %vm279_vm1, %v3044_v0  ;;  %659 = vrot.lane.b32.xlu0 %v593_v7, %s3046_s29  ;;  %v342_v27 = vld [vmem:[%s3194_s7 + $0x50] sm:$0xff]  ;;  %v343_v28 = vld [vmem:[%s3194_s7 + $0x58] sm:$0xff] }
  0x1e   : > { %316 = vst.msk [vmem:[#allocation2 + $0x130] sm:$0x3] %vm279_vm1, %v3044_v0  ;;  %319 = vst.msk [vmem:[#allocation2 + $0x148] sm:$0x3] %vm279_vm1, %v3044_v0  ;;  %661 = vrot.lane.b32.xlu1 %v594_v8, %s3046_s29  ;;  %v406_v29 = vld [vmem:[%s3160_s24 + $0x40] sm:$0xff]  ;;  %v407_v30 = vld [vmem:[%s3160_s24 + $0x48] sm:$0xff] }
  0x1f   : > { %322 = vst.msk [vmem:[#allocation2 + $0x160] sm:$0x3] %vm279_vm1, %v3044_v0  ;;  %325 = vst.msk [vmem:[#allocation2 + $0x178] sm:$0x3] %vm279_vm1, %v3044_v0  ;;  %v599_v31 = vld [vmem:[%s3166_s27 + $0x40] sm:$0xff]  ;;  %v600_v32 = vld [vmem:[%s3166_s27 + $0x48] sm:$0xff] }
  0x20   : > { %328 = vst.msk [vmem:[#allocation2 + $0x190] sm:$0x3] %vm279_vm1, %v3044_v0  ;;  %331 = vst.msk [vmem:[#allocation2 + $0x1a8] sm:$0x3] %vm279_vm1, %v3044_v0  ;;  %v344_v33 = vld [vmem:[%s3194_s7 + $0x60] sm:$0xff]  ;;  %v345_v34 = vld [vmem:[%s3194_s7 + $0x68] sm:$0xff] }
  0x21   : > { %470 = vrot.lane.b32.xlu0 %v402_v9, %s3045_s28  ;;  %366 = vst.msk [vmem:[#allocation2 + $0x19] sm:$0xff] %vm365_vm2, %v332_v13  ;;  %367 = vst.msk [vmem:[#allocation2 + $0x21] sm:$0xff] %vm365_vm2, %v333_v16  ;;  %v408_v35 = vld [vmem:[%s3160_s24 + $0x50] sm:$0xff]  ;;  %v409_v36 = vld [vmem:[%s3160_s24 + $0x58] sm:$0xff] }
  0x22   : > { %472 = vrot.lane.b32.xlu1 %v403_v10, %s3045_s28  ;;  %368 = vst.msk [vmem:[#allocation2 + $0x31] sm:$0xff] %vm365_vm2, %v334_v17  ;;  %369 = vst.msk [vmem:[#allocation2 + $0x39] sm:$0xff] %vm365_vm2, %v335_v18  ;;  %v601_v37 = vld [vmem:[%s3166_s27 + $0x50] sm:$0xff]  ;;  %v602_v38 = vld [vmem:[%s3166_s27 + $0x58] sm:$0xff] }
  0x23   : > { %370 = vst.msk [vmem:[#allocation2 + $0x49] sm:$0xff] %vm365_vm2, %v336_v21  ;;  %371 = vst.msk [vmem:[#allocation2 + $0x51] sm:$0xff] %vm365_vm2, %v337_v22  ;;  %v346_v39 = vld [vmem:[%s3194_s7 + $0x70] sm:$0xff]  ;;  %v347_v40 = vld [vmem:[%s3194_s7 + $0x78] sm:$0xff] }
  0x24   : > { %372 = vst.msk [vmem:[#allocation2 + $0x61] sm:$0xff] %vm365_vm2, %v338_v23  ;;  %373 = vst.msk [vmem:[#allocation2 + $0x69] sm:$0xff] %vm365_vm2, %v339_v24  ;;  %v410_v41 = vld [vmem:[%s3160_s24 + $0x60] sm:$0xff]  ;;  %v411_v42 = vld [vmem:[%s3160_s24 + $0x68] sm:$0xff] }
  0x25   : > { %663 = vrot.lane.b32.xlu0 %v595_v11, %s3046_s29  ;;  %374 = vst.msk [vmem:[#allocation2 + $0x79] sm:$0xff] %vm365_vm2, %v340_v25  ;;  %375 = vst.msk [vmem:[#allocation2 + $0x81] sm:$0xff] %vm365_vm2, %v341_v26  ;;  %v603_v43 = vld [vmem:[%s3166_s27 + $0x60] sm:$0xff]  ;;  %v604_v44 = vld [vmem:[%s3166_s27 + $0x68] sm:$0xff] }
  0x26   : > { %665 = vrot.lane.b32.xlu1 %v596_v12, %s3046_s29  ;;  %376 = vst.msk [vmem:[#allocation2 + $0x91] sm:$0xff] %vm365_vm2, %v342_v27  ;;  %377 = vst.msk [vmem:[#allocation2 + $0x99] sm:$0xff] %vm365_vm2, %v343_v28  ;;  %v348_v45 = vld [vmem:[%s3194_s7 + $0x80] sm:$0xff]  ;;  %v349_v46 = vld [vmem:[%s3194_s7 + $0x88] sm:$0xff] }
  0x27   : > { %378 = vst.msk [vmem:[#allocation2 + $0xa9] sm:$0xff] %vm365_vm2, %v344_v33  ;;  %379 = vst.msk [vmem:[#allocation2 + $0xb1] sm:$0xff] %vm365_vm2, %v345_v34  ;;  %v412_v47 = vld [vmem:[%s3160_s24 + $0x70] sm:$0xff]  ;;  %v413_v48 = vld [vmem:[%s3160_s24 + $0x78] sm:$0xff] }
  0x28   : > { %380 = vst.msk [vmem:[#allocation2 + $0xc1] sm:$0xff] %vm365_vm2, %v346_v39  ;;  %381 = vst.msk [vmem:[#allocation2 + $0xc9] sm:$0xff] %vm365_vm2, %v347_v40  ;;  %v605_v49 = vld [vmem:[%s3166_s27 + $0x70] sm:$0xff]  ;;  %v606_v50 = vld [vmem:[%s3166_s27 + $0x78] sm:$0xff] }
  0x29   : > { %474 = vrot.lane.b32.xlu0 %v404_v14, %s3045_s28  ;;  %382 = vst.msk [vmem:[#allocation2 + $0xd9] sm:$0xff] %vm365_vm2, %v348_v45  ;;  %383 = vst.msk [vmem:[#allocation2 + $0xe1] sm:$0xff] %vm365_vm2, %v349_v46  ;;  %v350_v51 = vld [vmem:[%s3194_s7 + $0x90] sm:$0xff]  ;;  %v351_v52 = vld [vmem:[%s3194_s7 + $0x98] sm:$0xff] }
  0x2a   : > { %476 = vrot.lane.b32.xlu1 %v405_v15, %s3045_s28  ;;  %384 = vst.msk [vmem:[#allocation2 + $0xf1] sm:$0xff] %vm365_vm2, %v350_v51  ;;  %385 = vst.msk [vmem:[#allocation2 + $0xf9] sm:$0xff] %vm365_vm2, %v351_v52  ;;  %v414_v53 = vld [vmem:[%s3160_s24 + $0x80] sm:$0xff]  ;;  %v415_v54 = vld [vmem:[%s3160_s24 + $0x88] sm:$0xff] }
  0x2b   : > { %v607_v55 = vld [vmem:[%s3166_s27 + $0x80] sm:$0xff]  ;;  %v608_v56 = vld [vmem:[%s3166_s27 + $0x88] sm:$0xff]  ;;  %v416_v59 = vld [vmem:[%s3160_s24 + $0x90] sm:$0xff] }
  0x2c   : > { %v352_v57 = vld [vmem:[%s3194_s7 + $0xa0] sm:$0xff]  ;;  %v353_v58 = vld [vmem:[%s3194_s7 + $0xa8] sm:$0xff]  ;;  %v417_v60 = vld [vmem:[%s3160_s24 + $0x98] sm:$0xff] }
  0x2d   : > { %667 = vrot.lane.b32.xlu0 %v597_v19, %s3046_s29  ;;  %386 = vst.msk [vmem:[#allocation2 + $0x109] sm:$0xff] %vm365_vm2, %v352_v57  ;;  %387 = vst.msk [vmem:[#allocation2 + $0x111] sm:$0xff] %vm365_vm2, %v353_v58  ;;  %v609_v61 = vld [vmem:[%s3166_s27 + $0x90] sm:$0xff]  ;;  %v610_v62 = vld [vmem:[%s3166_s27 + $0x98] sm:$0xff] }
  0x2e   : > { %669 = vrot.lane.b32.xlu1 %v598_v20, %s3046_s29  ;;  %v354_v63 = vld [vmem:[%s3194_s7 + $0xb0] sm:$0xff]  ;;  %v355_v0 = vld [vmem:[%s3194_s7 + $0xb8] sm:$0xff]  ;;  %v418_v1 = vld [vmem:[%s3160_s24 + $0xa0] sm:$0xff] }
  0x2f   : > { %388 = vst.msk [vmem:[#allocation2 + $0x121] sm:$0xff] %vm365_vm2, %v354_v63  ;;  %389 = vst.msk [vmem:[#allocation2 + $0x129] sm:$0xff] %vm365_vm2, %v355_v0  ;;  %v419_v2 = vld [vmem:[%s3160_s24 + $0xa8] sm:$0xff]  ;;  %v611_v3 = vld [vmem:[%s3166_s27 + $0xa0] sm:$0xff] }
  0x30   : > { %v612_v4 = vld [vmem:[%s3166_s27 + $0xa8] sm:$0xff]  ;;  %v356_v5 = vld [vmem:[%s3194_s7 + $0xc0] sm:$0xff]  ;;  %v420_v7 = vld [vmem:[%s3160_s24 + $0xb0] sm:$0xff] }
  0x31   : > { %478 = vrot.lane.b32.xlu0 %v406_v29, %s3045_s28  ;;  %390 = vst.msk [vmem:[#allocation2 + $0x139] sm:$0xff] %vm365_vm2, %v356_v5  ;;  %v357_v6 = vld [vmem:[%s3194_s7 + $0xc8] sm:$0xff]  ;;  %v421_v8 = vld [vmem:[%s3160_s24 + $0xb8] sm:$0xff]  ;;  %v613_v9 = vld [vmem:[%s3166_s27 + $0xb0] sm:$0xff] }
  0x32   : > { %480 = vrot.lane.b32.xlu1 %v407_v30, %s3045_s28  ;;  %391 = vst.msk [vmem:[#allocation2 + $0x141] sm:$0xff] %vm365_vm2, %v357_v6  ;;  %v614_v10 = vld [vmem:[%s3166_s27 + $0xb8] sm:$0xff]  ;;  %v358_v11 = vld [vmem:[%s3194_s7 + $0xd0] sm:$0xff]  ;;  %v422_v13 = vld [vmem:[%s3160_s24 + $0xc0] sm:$0xff] }
  0x33   : > { %392 = vst.msk [vmem:[#allocation2 + $0x151] sm:$0xff] %vm365_vm2, %v358_v11  ;;  %v359_v12 = vld [vmem:[%s3194_s7 + $0xd8] sm:$0xff]  ;;  %v423_v14 = vld [vmem:[%s3160_s24 + $0xc8] sm:$0xff]  ;;  %v615_v15 = vld [vmem:[%s3166_s27 + $0xc0] sm:$0xff] }
  0x34   : > { %393 = vst.msk [vmem:[#allocation2 + $0x159] sm:$0xff] %vm365_vm2, %v359_v12  ;;  %v616_v16 = vld [vmem:[%s3166_s27 + $0xc8] sm:$0xff]  ;;  %v360_v17 = vld [vmem:[%s3194_s7 + $0xe0] sm:$0xff]  ;;  %v424_v19 = vld [vmem:[%s3160_s24 + $0xd0] sm:$0xff] }
  0x35   : > { %671 = vrot.lane.b32.xlu0 %v599_v31, %s3046_s29  ;;  %394 = vst.msk [vmem:[#allocation2 + $0x169] sm:$0xff] %vm365_vm2, %v360_v17  ;;  %v361_v18 = vld [vmem:[%s3194_s7 + $0xe8] sm:$0xff]  ;;  %v425_v20 = vld [vmem:[%s3160_s24 + $0xd8] sm:$0xff]  ;;  %v617_v21 = vld [vmem:[%s3166_s27 + $0xd0] sm:$0xff] }
  0x36   : > { %673 = vrot.lane.b32.xlu1 %v600_v32, %s3046_s29  ;;  %395 = vst.msk [vmem:[#allocation2 + $0x171] sm:$0xff] %vm365_vm2, %v361_v18  ;;  %v618_v22 = vld [vmem:[%s3166_s27 + $0xd8] sm:$0xff]  ;;  %v362_v23 = vld [vmem:[%s3194_s7 + $0xf0] sm:$0xff]  ;;  %v426_v25 = vld [vmem:[%s3160_s24 + $0xe0] sm:$0xff] }
  0x37   : > { %396 = vst.msk [vmem:[#allocation2 + $0x181] sm:$0xff] %vm365_vm2, %v362_v23  ;;  %v363_v24 = vld [vmem:[%s3194_s7 + $0xf8] sm:$0xff]  ;;  %v427_v26 = vld [vmem:[%s3160_s24 + $0xe8] sm:$0xff]  ;;  %v619_v27 = vld [vmem:[%s3166_s27 + $0xe0] sm:$0xff]  ;;  %s3048_s7 = smov 24  }
  0x38   : > { %397 = vst.msk [vmem:[#allocation2 + $0x189] sm:$0xff] %vm365_vm2, %v363_v24  ;;  %v620_v28 = vld [vmem:[%s3166_s27 + $0xe8] sm:$0xff]  ;;  %v838_v31 = vld [vmem:[%s4268_s3] sm:$0xff]  ;;  %v428_v34 = vld [vmem:[%s3160_s24 + $0xf0] sm:$0xff] }
  0x39   : > { %482 = vrot.lane.b32.xlu0 %v408_v35, %s3045_s28  ;;  %v839_v32 = vld [vmem:[%s4268_s3 + $0x8] sm:$0xff]  ;;  %v429_v35 = vld [vmem:[%s3160_s24 + $0xf8] sm:$0xff]  ;;  %v621_v46 = vld [vmem:[%s3166_s27 + $0xf0] sm:$0xff] }
  0x3a   : > { %484 = vrot.lane.b32.xlu1 %v409_v36, %s3045_s28  ;;  %v3366_v33 = vpack.c.bf16 %v839_v32, %v838_v31  ;;  %v3370_v36 = vld [vmem:[#allocation2] sm:$0xff]  ;;  %v3372_v39 = vld [vmem:[#allocation2 + $0x8] sm:$0xff]  ;;  %v786_v52 = vld [vmem:[#allocation2 + $0x10] sm:$0x3] }
  0x3b   : > { %v843_v40 = vld [vmem:[%s4268_s3 + $0x28] sm:$0xff]  ;;  %v905_v58 = vrot.slane %v786_v52, 1  ;;  %v1080_v5 = vrot.slane %v3372_v39, 2  ;;  %v1082_v11 = vrot.slane %v786_v52, 2 }
  0x3c   : > { %2938 = vmatprep.subr.bf16.mxu0 %v3366_v33 }
  0x3d   : > { %675 = vrot.lane.b32.xlu0 %v601_v37, %s3046_s29  ;;  %2940 = vmatpush3.bf16.msra.mxu0 %v3366_v33 }
  0x3e   : > { %677 = vrot.lane.b32.xlu1 %v602_v38, %s3046_s29 }
  0x41   : > { %486 = vrot.lane.b32.xlu0 %v410_v41, %s3045_s28  ;;  %v844_v41 = vld [vmem:[%s4268_s3 + $0x30] sm:$0xff] }
  0x42   : > { %488 = vrot.lane.b32.xlu1 %v411_v42, %s3045_s28  ;;  %v2929_v42 = vpack.c.bf16 %v844_v41, %v843_v40 }
  0x44   : > { %2930 = vmatprep.subr.bf16.mxu1 %v2929_v42 }
  0x45   : > { %679 = vrot.lane.b32.xlu0 %v603_v43, %s3046_s29  ;;  %v840_v43 = vld [vmem:[%s4268_s3 + $0x10] sm:$0xff]  ;;  %2932 = vmatpush3.bf16.msra.mxu1 %v2929_v42 }
  0x46   : > { %681 = vrot.lane.b32.xlu1 %v604_v44, %s3046_s29  ;;  %v841_v44 = vld [vmem:[%s4268_s3 + $0x18] sm:$0xff] }
  0x47   : > { %v3392_v45 = vpack.c.bf16 %v841_v44, %v840_v43 }
  0x49   : > { %490 = vrot.lane.b32.xlu0 %v412_v47, %s3045_s28  ;;  %v622_v47 = vld [vmem:[%s3166_s27 + $0xf8] sm:$0xff]  ;;  %2942 = vmatprep.subr.bf16.mxu0 %v3392_v45 }
  0x4a   : > { %492 = vrot.lane.b32.xlu1 %v413_v48, %s3045_s28  ;;  %v902_v48 = vrot.slane %v3370_v36, 1  ;;  %2944 = vmatpush3.bf16.msra.mxu0 %v3392_v45 }
  0x4d   : > { %683 = vrot.lane.b32.xlu0 %v605_v49, %s3046_s29  ;;  %v903_v49 = vrot.slane %v3372_v39, 1 }
  0x4e   : > { %685 = vrot.lane.b32.xlu1 %v606_v50, %s3046_s29 }
  0x51   : > { %494 = vrot.lane.b32.xlu0 %v414_v53, %s3045_s28  ;;  %v845_v53 = vld [vmem:[%s4268_s3 + $0x38] sm:$0xff] }
  0x52   : > { %496 = vrot.lane.b32.xlu1 %v415_v54, %s3045_s28  ;;  %v846_v54 = vld [vmem:[%s4268_s3 + $0x40] sm:$0xff] }
  0x55   : > { %687 = vrot.lane.b32.xlu0 %v607_v55, %s3046_s29  ;;  %v2933_v55 = vpack.c.bf16 %v846_v54, %v845_v53 }
  0x56   : > { %689 = vrot.lane.b32.xlu1 %v608_v56, %s3046_s29  ;;  %v904_v56 = vsel %vm901_vm5, %v902_v48, %v903_v49 }
  0x57   : > { %2934 = vmatprep.subr.bf16.mxu1 %v2933_v55 }
  0x58   : > { %2936 = vmatpush3.bf16.msra.mxu1 %v2933_v55 }
  0x59   : > { %498 = vrot.lane.b32.xlu0 %v416_v59, %s3045_s28  ;;  %v3416_v59 = vld [vmem:[%s4268_s3 + $0x20] sm:$0xf] }
  0x5a   : > { %500 = vrot.lane.b32.xlu1 %v417_v60, %s3045_s28  ;;  %2821 = vmatprep.subr.msk.mxu0 %vm1446_vm6, %v3416_v59 }
  0x5b   : > { %2822 = vmatpush3.msk.msra.mxu0 %vm1446_vm6, %v3416_v59 }
  0x5d   : > { %691 = vrot.lane.b32.xlu0 %v609_v61, %s3046_s29 }
  0x5e   : > { %693 = vrot.lane.b32.xlu1 %v610_v62, %s3046_s29 }
  0x61   : > { %502 = vrot.lane.b32.xlu0 %v418_v1, %s3045_s28 }
  0x62   : > { %504 = vrot.lane.b32.xlu1 %v419_v2, %s3045_s28  ;;  %v847_v2 = vld [vmem:[%s4268_s3 + $0x48] sm:$0xf] }
  0x63   : > { %2763 = vmatprep.subr.msk.mxu1 %vm1446_vm6, %v847_v2 }
  0x64   : > { %2764 = vmatpush3.msk.msra.mxu1 %vm1446_vm6, %v847_v2 }
  0x65   : > { %695 = vrot.lane.b32.xlu0 %v611_v3, %s3046_s29  ;;  %v906_v3 = vsel %vm901_vm5, %v903_v49, %v905_v58  ;;  %2953 = vmatprep.subr.bf16.mxu1 %v3366_v33 }
  0x66   : > { %697 = vrot.lane.b32.xlu1 %v612_v4, %s3046_s29  ;;  %v1079_v4 = vrot.slane %v3370_v36, 2 }
  0x69   : > { %506 = vrot.lane.b32.xlu0 %v420_v7, %s3045_s28 }
  0x6a   : > { %508 = vrot.lane.b32.xlu1 %v421_v8, %s3045_s28 }
  0x6d   : > { %699 = vrot.lane.b32.xlu0 %v613_v9, %s3046_s29 }
  0x6e   : > { %701 = vrot.lane.b32.xlu1 %v614_v10, %s3046_s29  ;;  %v1081_v10 = vsel %vm1078_vm7, %v1079_v4, %v1080_v5 }
  0x71   : > { %510 = vrot.lane.b32.xlu0 %v422_v13, %s3045_s28 }
  0x72   : > { %512 = vrot.lane.b32.xlu1 %v423_v14, %s3045_s28 }
  0x75   : > { %703 = vrot.lane.b32.xlu0 %v615_v15, %s3046_s29 }
  0x76   : > { %705 = vrot.lane.b32.xlu1 %v616_v16, %s3046_s29 }
  0x79   : > { %514 = vrot.lane.b32.xlu0 %v424_v19, %s3045_s28  ;;  %v1083_v19 = vsel %vm1078_vm7, %v1080_v5, %v1082_v11 }
  0x7a   : > { %516 = vrot.lane.b32.xlu1 %v425_v20, %s3045_s28 }
  0x7d   : > { %707 = vrot.lane.b32.xlu0 %v617_v21, %s3046_s29 }
  0x7e   : > { %709 = vrot.lane.b32.xlu1 %v618_v22, %s3046_s29 }
  0x81   : > { %518 = vrot.lane.b32.xlu0 %v426_v25, %s3045_s28 }
  0x82   : > { %520 = vrot.lane.b32.xlu1 %v427_v26, %s3045_s28 }
  0x83   : > { %v463_v29 = vpop.permute.xlu0 %462 }
  0x84   : > { %v656_v30 = vpop.permute.xlu1 %655  ;;  %559 = vst.msk [vmem:[#allocation2 + $0x19] sm:$0xff] %vm558_vm3, %v463_v29 }
  0x85   : > { %752 = vst.msk [vmem:[#allocation2 + $0x19] sm:$0xff] %vm751_vm4, %v656_v30  ;;  %711 = vrot.lane.b32.xlu0 %v619_v27, %s3046_s29 }
  0x86   : > { %713 = vrot.lane.b32.xlu1 %v620_v28, %s3046_s29 }
  0x87   : > { %v465_v37 = vpop.permute.xlu0 %464 }
  0x88   : > { %v658_v38 = vpop.permute.xlu1 %657  ;;  %560 = vst.msk [vmem:[#allocation2 + $0x21] sm:$0xff] %vm558_vm3, %v465_v37 }
  0x89   : > { %753 = vst.msk [vmem:[#allocation2 + $0x21] sm:$0xff] %vm751_vm4, %v658_v38  ;;  %522 = vrot.lane.b32.xlu0 %v428_v34, %s3045_s28 }
  0x8a   : > { %524 = vrot.lane.b32.xlu1 %v429_v35, %s3045_s28 }
  0x8b   : > { %v467_v50 = vpop.permute.xlu0 %466 }
  0x8c   : > { %v469_v51 = vpop.permute.xlu1 %468  ;;  %561 = vst.msk [vmem:[#allocation2 + $0x31] sm:$0xff] %vm558_vm3, %v467_v50  ;;  %v3411_v57 = vld [vmem:[#allocation2 + $0x18] sm:$0xff] }
  0x8d   : > { %562 = vst.msk [vmem:[#allocation2 + $0x39] sm:$0xff] %vm558_vm3, %v469_v51  ;;  %715 = vrot.lane.b32.xlu0 %v621_v46, %s3046_s29  ;;  %v907_v0 = vrot.slane %v3411_v57, 1  ;;  %v1084_v16 = vrot.slane %v3411_v57, 2 }
  0x8e   : > { %717 = vrot.lane.b32.xlu1 %v622_v47, %s3046_s29  ;;  %s3047_s29 = smov 12  }
  0x8f   : > { %v660_v60 = vpop.permute.xlu0 %659 }
  0x90   : > { %v662_v61 = vpop.permute.xlu1 %661  ;;  %754 = vst.msk [vmem:[#allocation2 + $0x31] sm:$0xff] %vm751_vm4, %v660_v60  ;;  %v3422_v62 = vld [vmem:[#allocation2 + $0x20] sm:$0xff]  ;;  %v789_v63 = vld [vmem:[#allocation2 + $0x28] sm:$0x3] }
  0x91   : > { %755 = vst.msk [vmem:[#allocation2 + $0x39] sm:$0xff] %vm751_vm4, %v662_v61  ;;  %982 = vrot.lane.b32.xlu0 %v904_v56, %s3047_s29  ;;  %v908_v1 = vrot.slane %v3422_v62, 1  ;;  %v910_v9 = vrot.slane %v789_v63, 1  ;;  %v1085_v15 = vrot.slane %v3422_v62, 2  ;;  %v1087_v23 = vrot.slane %v789_v63, 2 }
  0x93   : > { %v471_v6 = vpop.permute.xlu0 %470  ;;  %v909_v7 = vsel %vm901_vm5, %v907_v0, %v908_v1  ;;  %v911_v13 = vsel %vm901_vm5, %v908_v1, %v910_v9  ;;  %v1086_v21 = vsel %vm1078_vm7, %v1084_v16, %v1085_v15  ;;  %v1088_v28 = vsel %vm1078_vm7, %v1085_v15, %v1087_v23 }
  0x94   : > { %v473_v8 = vpop.permute.xlu1 %472  ;;  %563 = vst.msk [vmem:[#allocation2 + $0x49] sm:$0xff] %vm558_vm3, %v471_v6  ;;  %986 = vrot.lane.b32.xlu1 %v909_v7, %s3047_s29 }
  0x95   : > { %564 = vst.msk [vmem:[#allocation2 + $0x51] sm:$0xff] %vm558_vm3, %v473_v8  ;;  %984 = vrot.lane.b32.xlu0 %v906_v3, %s3047_s29 }
  0x97   : > { %v664_v12 = vpop.permute.xlu0 %663  ;;  %v3451_v17 = vld [vmem:[#allocation2 + $0x30] sm:$0xff] }
  0x98   : > { %v666_v14 = vpop.permute.xlu1 %665  ;;  %756 = vst.msk [vmem:[#allocation2 + $0x49] sm:$0xff] %vm751_vm4, %v664_v12  ;;  %988 = vrot.lane.b32.xlu1 %v911_v13, %s3047_s29  ;;  %v3453_v18 = vld [vmem:[#allocation2 + $0x38] sm:$0xff]  ;;  %v912_v24 = vrot.slane %v3451_v17, 1  ;;  %v792_v26 = vld [vmem:[#allocation2 + $0x40] sm:$0x3]  ;;  %v1089_v32 = vrot.slane %v3451_v17, 2 }
  0x99   : > { %757 = vst.msk [vmem:[#allocation2 + $0x51] sm:$0xff] %vm751_vm4, %v666_v14  ;;  %1159 = vrot.lane.b32.xlu0 %v1081_v10, %s3048_s7  ;;  %v913_v25 = vrot.slane %v3453_v18, 1  ;;  %v915_v30 = vrot.slane %v792_v26, 1  ;;  %v1090_v34 = vrot.slane %v3453_v18, 2  ;;  %v1092_v42 = vrot.slane %v792_v26, 2 }
  0x9b   : > { %v475_v20 = vpop.permute.xlu0 %474  ;;  %v914_v31 = vsel %vm901_vm5, %v912_v24, %v913_v25  ;;  %v916_v40 = vsel %vm901_vm5, %v913_v25, %v915_v30  ;;  %v1091_v43 = vsel %vm1078_vm7, %v1089_v32, %v1090_v34  ;;  %v1093_v49 = vsel %vm1078_vm7, %v1090_v34, %v1092_v42  ;;  %v849_v42 = vld [vmem:[%s4268_s3 + $0x58] sm:$0xff] }
  0x9c   : > { %v477_v22 = vpop.permute.xlu1 %476  ;;  %565 = vst.msk [vmem:[#allocation2 + $0x61] sm:$0xff] %vm558_vm3, %v475_v20  ;;  %1163 = vrot.lane.b32.xlu1 %v1086_v21, %s3048_s7 }
  0x9d   : > { %566 = vst.msk [vmem:[#allocation2 + $0x69] sm:$0xff] %vm558_vm3, %v477_v22  ;;  %1161 = vrot.lane.b32.xlu0 %v1083_v19, %s3048_s7 }
  0x9f   : > { %v668_v27 = vpop.permute.xlu0 %667  ;;  %v3471_v35 = vld [vmem:[#allocation2 + $0x48] sm:$0xff] }
  0xa0   : > { %v670_v29 = vpop.permute.xlu1 %669  ;;  %758 = vst.msk [vmem:[#allocation2 + $0x61] sm:$0xff] %vm751_vm4, %v668_v27  ;;  %1165 = vrot.lane.b32.xlu1 %v1088_v28, %s3048_s7  ;;  %v3473_v37 = vld [vmem:[#allocation2 + $0x50] sm:$0xff]  ;;  %v917_v44 = vrot.slane %v3471_v35, 1  ;;  %v795_v47 = vld [vmem:[#allocation2 + $0x58] sm:$0x3]  ;;  %v1094_v53 = vrot.slane %v3471_v35, 2 }
  0xa1   : > { %759 = vst.msk [vmem:[#allocation2 + $0x69] sm:$0xff] %vm751_vm4, %v670_v29  ;;  %990 = vrot.lane.b32.xlu0 %v914_v31, %s3047_s29  ;;  %v918_v46 = vrot.slane %v3473_v37, 1  ;;  %v920_v51 = vrot.slane %v795_v47, 1  ;;  %v1095_v54 = vrot.slane %v3473_v37, 2  ;;  %v1097_v63 = vrot.slane %v795_v47, 2 }
  0xa3   : > { %v479_v38 = vpop.permute.xlu0 %478  ;;  %v919_v52 = vsel %vm901_vm5, %v917_v44, %v918_v46  ;;  %v921_v60 = vsel %vm901_vm5, %v918_v46, %v920_v51  ;;  %v1096_v0 = vsel %vm1078_vm7, %v1094_v53, %v1095_v54  ;;  %v1098_v5 = vsel %vm1078_vm7, %v1095_v54, %v1097_v63 }
  0xa4   : > { %v481_v41 = vpop.permute.xlu1 %480  ;;  %567 = vst.msk [vmem:[#allocation2 + $0x79] sm:$0xff] %vm558_vm3, %v479_v38  ;;  %992 = vrot.lane.b32.xlu1 %v916_v40, %s3047_s29 }
  0xa5   : > { %568 = vst.msk [vmem:[#allocation2 + $0x81] sm:$0xff] %vm558_vm3, %v481_v41  ;;  %1167 = vrot.lane.b32.xlu0 %v1091_v43, %s3048_s7  ;;  %v848_v41 = vld [vmem:[%s4268_s3 + $0x50] sm:$0xff] }
  0xa7   : > { %v672_v48 = vpop.permute.xlu0 %671  ;;  %v3491_v55 = vld [vmem:[#allocation2 + $0x60] sm:$0xff] }
  0xa8   : > { %v674_v50 = vpop.permute.xlu1 %673  ;;  %760 = vst.msk [vmem:[#allocation2 + $0x79] sm:$0xff] %vm751_vm4, %v672_v48  ;;  %1169 = vrot.lane.b32.xlu1 %v1093_v49, %s3048_s7  ;;  %v3493_v56 = vld [vmem:[#allocation2 + $0x68] sm:$0xff]  ;;  %v922_v1 = vrot.slane %v3491_v55, 1  ;;  %v798_v3 = vld [vmem:[#allocation2 + $0x70] sm:$0x3]  ;;  %v1099_v9 = vrot.slane %v3491_v55, 2  ;;  %v3548_v48 = vpack.c.bf16 %v849_v42, %v848_v41 }
  0xa9   : > { %761 = vst.msk [vmem:[#allocation2 + $0x81] sm:$0xff] %vm751_vm4, %v674_v50  ;;  %994 = vrot.lane.b32.xlu0 %v919_v52, %s3047_s29  ;;  %v923_v2 = vrot.slane %v3493_v56, 1  ;;  %v925_v7 = vrot.slane %v798_v3, 1  ;;  %v1100_v10 = vrot.slane %v3493_v56, 2  ;;  %v1102_v16 = vrot.slane %v798_v3, 2 }
  0xaa   : > { %2946 = vmatprep.subr.bf16.mxu0 %v3548_v48 }
  0xab   : > { %v483_v58 = vpop.permute.xlu0 %482  ;;  %v924_v8 = vsel %vm901_vm5, %v922_v1, %v923_v2  ;;  %v926_v14 = vsel %vm901_vm5, %v923_v2, %v925_v7  ;;  %v1101_v19 = vsel %vm1078_vm7, %v1099_v9, %v1100_v10  ;;  %v1103_v24 = vsel %vm1078_vm7, %v1100_v10, %v1102_v16 }
  0xac   : > { %v485_v61 = vpop.permute.xlu1 %484  ;;  %569 = vst.msk [vmem:[#allocation2 + $0x91] sm:$0xff] %vm558_vm3, %v483_v58  ;;  %996 = vrot.lane.b32.xlu1 %v921_v60, %s3047_s29 }
  0xad   : > { %570 = vst.msk [vmem:[#allocation2 + $0x99] sm:$0xff] %vm558_vm3, %v485_v61  ;;  %1171 = vrot.lane.b32.xlu0 %v1096_v0, %s3048_s7 }
  0xaf   : > { %v676_v4 = vpop.permute.xlu0 %675  ;;  %v3511_v11 = vld [vmem:[#allocation2 + $0x78] sm:$0xff] }
  0xb0   : > { %v678_v6 = vpop.permute.xlu1 %677  ;;  %762 = vst.msk [vmem:[#allocation2 + $0x91] sm:$0xff] %vm751_vm4, %v676_v4  ;;  %1173 = vrot.lane.b32.xlu1 %v1098_v5, %s3048_s7  ;;  %v3513_v12 = vld [vmem:[#allocation2 + $0x80] sm:$0xff]  ;;  %v927_v20 = vrot.slane %v3511_v11, 1  ;;  %v801_v22 = vld [vmem:[#allocation2 + $0x88] sm:$0x3]  ;;  %v1104_v28 = vrot.slane %v3511_v11, 2 }
  0xb1   : > { %763 = vst.msk [vmem:[#allocation2 + $0x99] sm:$0xff] %vm751_vm4, %v678_v6  ;;  %998 = vrot.lane.b32.xlu0 %v924_v8, %s3047_s29  ;;  %v928_v21 = vrot.slane %v3513_v12, 1  ;;  %v930_v26 = vrot.slane %v801_v22, 1  ;;  %v1105_v29 = vrot.slane %v3513_v12, 2  ;;  %v1107_v40 = vrot.slane %v801_v22, 2 }
  0xb3   : > { %v487_v13 = vpop.permute.xlu0 %486  ;;  %v929_v27 = vsel %vm901_vm5, %v927_v20, %v928_v21  ;;  %v931_v34 = vsel %vm901_vm5, %v928_v21, %v930_v26  ;;  %v1106_v43 = vsel %vm1078_vm7, %v1104_v28, %v1105_v29  ;;  %v1108_v50 = vsel %vm1078_vm7, %v1105_v29, %v1107_v40 }
  0xb4   : > { %v489_v15 = vpop.permute.xlu1 %488  ;;  %571 = vst.msk [vmem:[#allocation2 + $0xa9] sm:$0xff] %vm558_vm3, %v487_v13  ;;  %1000 = vrot.lane.b32.xlu1 %v926_v14, %s3047_s29 }
  0xb5   : > { %572 = vst.msk [vmem:[#allocation2 + $0xb1] sm:$0xff] %vm558_vm3, %v489_v15  ;;  %1175 = vrot.lane.b32.xlu0 %v1101_v19, %s3048_s7 }
  0xb7   : > { %v680_v23 = vpop.permute.xlu0 %679  ;;  %v3531_v30 = vld [vmem:[#allocation2 + $0x90] sm:$0xff] }
  0xb8   : > { %v682_v25 = vpop.permute.xlu1 %681  ;;  %764 = vst.msk [vmem:[#allocation2 + $0xa9] sm:$0xff] %vm751_vm4, %v680_v23  ;;  %1177 = vrot.lane.b32.xlu1 %v1103_v24, %s3048_s7  ;;  %v3533_v31 = vld [vmem:[#allocation2 + $0x98] sm:$0xff]  ;;  %v932_v44 = vrot.slane %v3531_v30, 1  ;;  %v804_v47 = vld [vmem:[#allocation2 + $0xa0] sm:$0x3]  ;;  %v1109_v54 = vrot.slane %v3531_v30, 2 }
  0xb9   : > { %765 = vst.msk [vmem:[#allocation2 + $0xb1] sm:$0xff] %vm751_vm4, %v682_v25  ;;  %1002 = vrot.lane.b32.xlu0 %v929_v27, %s3047_s29  ;;  %v933_v46 = vrot.slane %v3533_v31, 1  ;;  %v935_v52 = vrot.slane %v804_v47, 1  ;;  %v1110_v58 = vrot.slane %v3533_v31, 2  ;;  %v1112_v2 = vrot.slane %v804_v47, 2 }
  0xbb   : > { %v491_v32 = vpop.permute.xlu0 %490  ;;  %v934_v53 = vsel %vm901_vm5, %v932_v44, %v933_v46  ;;  %v936_v0 = vsel %vm901_vm5, %v933_v46, %v935_v52  ;;  %v1111_v3 = vsel %vm1078_vm7, %v1109_v54, %v1110_v58  ;;  %v1113_v8 = vsel %vm1078_vm7, %v1110_v58, %v1112_v2 }
  0xbc   : > { %v493_v38 = vpop.permute.xlu1 %492  ;;  %573 = vst.msk [vmem:[#allocation2 + $0xc1] sm:$0xff] %vm558_vm3, %v491_v32  ;;  %1004 = vrot.lane.b32.xlu1 %v931_v34, %s3047_s29 }
  0xbd   : > { %574 = vst.msk [vmem:[#allocation2 + $0xc9] sm:$0xff] %vm558_vm3, %v493_v38  ;;  %1179 = vrot.lane.b32.xlu0 %v1106_v43, %s3048_s7 }
  0xbf   : > { %v684_v49 = vpop.permute.xlu0 %683  ;;  %v3560_v60 = vld [vmem:[#allocation2 + $0xa8] sm:$0xff] }
  0xc0   : > { %v686_v51 = vpop.permute.xlu1 %685  ;;  %766 = vst.msk [vmem:[#allocation2 + $0xc1] sm:$0xff] %vm751_vm4, %v684_v49  ;;  %1181 = vrot.lane.b32.xlu1 %v1108_v50, %s3048_s7  ;;  %v3562_v61 = vld [vmem:[#allocation2 + $0xb0] sm:$0xff]  ;;  %v937_v4 = vrot.slane %v3560_v60, 1  ;;  %v807_v6 = vld [vmem:[#allocation2 + $0xb8] sm:$0x3]  ;;  %v1114_v14 = vrot.slane %v3560_v60, 2 }
  0xc1   : > { %767 = vst.msk [vmem:[#allocation2 + $0xc9] sm:$0xff] %vm751_vm4, %v686_v51  ;;  %1006 = vrot.lane.b32.xlu0 %v934_v53, %s3047_s29  ;;  %v938_v5 = vrot.slane %v3562_v61, 1  ;;  %v940_v10 = vrot.slane %v807_v6, 1  ;;  %v1115_v15 = vrot.slane %v3562_v61, 2  ;;  %v1117_v23 = vrot.slane %v807_v6, 2 }
  0xc3   : > { %v495_v63 = vpop.permute.xlu0 %494  ;;  %v939_v13 = vsel %vm901_vm5, %v937_v4, %v938_v5  ;;  %v941_v21 = vsel %vm901_vm5, %v938_v5, %v940_v10  ;;  %v1116_v24 = vsel %vm1078_vm7, %v1114_v14, %v1115_v15  ;;  %v1118_v29 = vsel %vm1078_vm7, %v1115_v15, %v1117_v23 }
  0xc4   : > { %v497_v1 = vpop.permute.xlu1 %496  ;;  %575 = vst.msk [vmem:[#allocation2 + $0xd9] sm:$0xff] %vm558_vm3, %v495_v63  ;;  %1008 = vrot.lane.b32.xlu1 %v936_v0, %s3047_s29 }
  0xc5   : > { %576 = vst.msk [vmem:[#allocation2 + $0xe1] sm:$0xff] %vm558_vm3, %v497_v1  ;;  %1183 = vrot.lane.b32.xlu0 %v1111_v3, %s3048_s7 }
  0xc7   : > { %v688_v7 = vpop.permute.xlu0 %687  ;;  %v3580_v16 = vld [vmem:[#allocation2 + $0xc0] sm:$0xff] }
  0xc8   : > { %v690_v9 = vpop.permute.xlu1 %689  ;;  %768 = vst.msk [vmem:[#allocation2 + $0xd9] sm:$0xff] %vm751_vm4, %v688_v7  ;;  %1185 = vrot.lane.b32.xlu1 %v1113_v8, %s3048_s7  ;;  %v3582_v19 = vld [vmem:[#allocation2 + $0xc8] sm:$0xff]  ;;  %v942_v25 = vrot.slane %v3580_v16, 1  ;;  %v810_v27 = vld [vmem:[#allocation2 + $0xd0] sm:$0x3]  ;;  %v1119_v40 = vrot.slane %v3580_v16, 2 }
  0xc9   : > { %769 = vst.msk [vmem:[#allocation2 + $0xe1] sm:$0xff] %vm751_vm4, %v690_v9  ;;  %1010 = vrot.lane.b32.xlu0 %v939_v13, %s3047_s29  ;;  %v943_v26 = vrot.slane %v3582_v19, 1  ;;  %v945_v34 = vrot.slane %v810_v27, 1  ;;  %v1120_v41 = vrot.slane %v3582_v19, 2  ;;  %v1122_v49 = vrot.slane %v810_v27, 2 }
  0xcb   : > { %v499_v20 = vpop.permute.xlu0 %498  ;;  %v944_v38 = vsel %vm901_vm5, %v942_v25, %v943_v26  ;;  %v946_v46 = vsel %vm901_vm5, %v943_v26, %v945_v34  ;;  %v1121_v50 = vsel %vm1078_vm7, %v1119_v40, %v1120_v41  ;;  %v1123_v58 = vsel %vm1078_vm7, %v1120_v41, %v1122_v49 }
  0xcc   : > { %v501_v22 = vpop.permute.xlu1 %500  ;;  %577 = vst.msk [vmem:[#allocation2 + $0xf1] sm:$0xff] %vm558_vm3, %v499_v20  ;;  %1012 = vrot.lane.b32.xlu1 %v941_v21, %s3047_s29 }
  0xcd   : > { %578 = vst.msk [vmem:[#allocation2 + $0xf9] sm:$0xff] %vm558_vm3, %v501_v22  ;;  %1187 = vrot.lane.b32.xlu0 %v1116_v24, %s3048_s7 }
  0xcf   : > { %v692_v28 = vpop.permute.xlu0 %691  ;;  %v3600_v42 = vld [vmem:[#allocation2 + $0xd8] sm:$0xff] }
  0xd0   : > { %v694_v32 = vpop.permute.xlu1 %693  ;;  %770 = vst.msk [vmem:[#allocation2 + $0xf1] sm:$0xff] %vm751_vm4, %v692_v28  ;;  %1189 = vrot.lane.b32.xlu1 %v1118_v29, %s3048_s7  ;;  %v3602_v43 = vld [vmem:[#allocation2 + $0xe0] sm:$0xff]  ;;  %v947_v51 = vrot.slane %v3600_v42, 1  ;;  %v813_v53 = vld [vmem:[#allocation2 + $0xe8] sm:$0x3]  ;;  %v1124_v2 = vrot.slane %v3600_v42, 2 }
  0xd1   : > { %771 = vst.msk [vmem:[#allocation2 + $0xf9] sm:$0xff] %vm751_vm4, %v694_v32  ;;  %1014 = vrot.lane.b32.xlu0 %v944_v38, %s3047_s29  ;;  %v948_v52 = vrot.slane %v3602_v43, 1  ;;  %v950_v0 = vrot.slane %v813_v53, 1  ;;  %v1125_v3 = vrot.slane %v3602_v43, 2  ;;  %v1127_v9 = vrot.slane %v813_v53, 2 }
  0xd3   : > { %v503_v44 = vpop.permute.xlu0 %502  ;;  %v949_v1 = vsel %vm901_vm5, %v947_v51, %v948_v52  ;;  %v951_v7 = vsel %vm901_vm5, %v948_v52, %v950_v0  ;;  %v1126_v10 = vsel %vm1078_vm7, %v1124_v2, %v1125_v3  ;;  %v1128_v21 = vsel %vm1078_vm7, %v1125_v3, %v1127_v9 }
  0xd4   : > { %v505_v47 = vpop.permute.xlu1 %504  ;;  %579 = vst.msk [vmem:[#allocation2 + $0x109] sm:$0xff] %vm558_vm3, %v503_v44  ;;  %1016 = vrot.lane.b32.xlu1 %v946_v46, %s3047_s29 }
  0xd5   : > { %580 = vst.msk [vmem:[#allocation2 + $0x111] sm:$0xff] %vm558_vm3, %v505_v47  ;;  %1191 = vrot.lane.b32.xlu0 %v1121_v50, %s3048_s7 }
  0xd7   : > { %v696_v54 = vpop.permute.xlu0 %695  ;;  %v3620_v4 = vld [vmem:[#allocation2 + $0xf0] sm:$0xff] }
  0xd8   : > { %v698_v63 = vpop.permute.xlu1 %697  ;;  %772 = vst.msk [vmem:[#allocation2 + $0x109] sm:$0xff] %vm751_vm4, %v696_v54  ;;  %1193 = vrot.lane.b32.xlu1 %v1123_v58, %s3048_s7  ;;  %v3622_v5 = vld [vmem:[#allocation2 + $0xf8] sm:$0xff]  ;;  %v952_v13 = vrot.slane %v3620_v4, 1  ;;  %v816_v15 = vld [vmem:[#allocation2 + $0x100] sm:$0x3]  ;;  %v1129_v25 = vrot.slane %v3620_v4, 2 }
  0xd9   : > { %773 = vst.msk [vmem:[#allocation2 + $0x111] sm:$0xff] %vm751_vm4, %v698_v63  ;;  %1018 = vrot.lane.b32.xlu0 %v949_v1, %s3047_s29  ;;  %v953_v14 = vrot.slane %v3622_v5, 1  ;;  %v955_v23 = vrot.slane %v816_v15, 1  ;;  %v1130_v26 = vrot.slane %v3622_v5, 2  ;;  %v1132_v38 = vrot.slane %v816_v15, 2 }
  0xdb   : > { %v507_v6 = vpop.permute.xlu0 %506  ;;  %v954_v24 = vsel %vm901_vm5, %v952_v13, %v953_v14  ;;  %v956_v32 = vsel %vm901_vm5, %v953_v14, %v955_v23  ;;  %v1131_v40 = vsel %vm1078_vm7, %v1129_v25, %v1130_v26  ;;  %v1133_v49 = vsel %vm1078_vm7, %v1130_v26, %v1132_v38 }
  0xdc   : > { %v509_v8 = vpop.permute.xlu1 %508  ;;  %581 = vst.msk [vmem:[#allocation2 + $0x121] sm:$0xff] %vm558_vm3, %v507_v6  ;;  %1020 = vrot.lane.b32.xlu1 %v951_v7, %s3047_s29 }
  0xdd   : > { %582 = vst.msk [vmem:[#allocation2 + $0x129] sm:$0xff] %vm558_vm3, %v509_v8  ;;  %1195 = vrot.lane.b32.xlu0 %v1126_v10, %s3048_s7 }
  0xdf   : > { %v700_v20 = vpop.permute.xlu0 %699  ;;  %v3640_v27 = vld [vmem:[#allocation2 + $0x108] sm:$0xff] }
  0xe0   : > { %v702_v22 = vpop.permute.xlu1 %701  ;;  %774 = vst.msk [vmem:[#allocation2 + $0x121] sm:$0xff] %vm751_vm4, %v700_v20  ;;  %1197 = vrot.lane.b32.xlu1 %v1128_v21, %s3048_s7  ;;  %v3642_v28 = vld [vmem:[#allocation2 + $0x110] sm:$0xff]  ;;  %v957_v41 = vrot.slane %v3640_v27, 1  ;;  %v819_v46 = vld [vmem:[#allocation2 + $0x118] sm:$0x3]  ;;  %v1134_v53 = vrot.slane %v3640_v27, 2 }
  0xe1   : > { %775 = vst.msk [vmem:[#allocation2 + $0x129] sm:$0xff] %vm751_vm4, %v702_v22  ;;  %1022 = vrot.lane.b32.xlu0 %v954_v24, %s3047_s29  ;;  %v958_v44 = vrot.slane %v3642_v28, 1  ;;  %v960_v51 = vrot.slane %v819_v46, 1  ;;  %v1135_v54 = vrot.slane %v3642_v28, 2  ;;  %v1137_v3 = vrot.slane %v819_v46, 2 }
  0xe3   : > { %v511_v29 = vpop.permute.xlu0 %510  ;;  %v959_v52 = vsel %vm901_vm5, %v957_v41, %v958_v44  ;;  %v961_v1 = vsel %vm901_vm5, %v958_v44, %v960_v51  ;;  %v1136_v6 = vsel %vm1078_vm7, %v1134_v53, %v1135_v54  ;;  %v1138_v13 = vsel %vm1078_vm7, %v1135_v54, %v1137_v3 }
  0xe4   : > { %v513_v34 = vpop.permute.xlu1 %512  ;;  %583 = vst.msk [vmem:[#allocation2 + $0x139] sm:$0xff] %vm558_vm3, %v511_v29  ;;  %1024 = vrot.lane.b32.xlu1 %v956_v32, %s3047_s29 }
  0xe5   : > { %584 = vst.msk [vmem:[#allocation2 + $0x141] sm:$0xff] %vm558_vm3, %v513_v34  ;;  %1199 = vrot.lane.b32.xlu0 %v1131_v40, %s3048_s7 }
  0xe7   : > { %v704_v47 = vpop.permute.xlu0 %703  ;;  %v3660_v58 = vld [vmem:[#allocation2 + $0x120] sm:$0xff] }
  0xe8   : > { %v706_v50 = vpop.permute.xlu1 %705  ;;  %776 = vst.msk [vmem:[#allocation2 + $0x139] sm:$0xff] %vm751_vm4, %v704_v47  ;;  %1201 = vrot.lane.b32.xlu1 %v1133_v49, %s3048_s7  ;;  %v3662_v63 = vld [vmem:[#allocation2 + $0x128] sm:$0xff]  ;;  %v962_v7 = vrot.slane %v3660_v58, 1  ;;  %v822_v9 = vld [vmem:[#allocation2 + $0x130] sm:$0x3]  ;;  %v1139_v21 = vrot.slane %v3660_v58, 2 }
  0xe9   : > { %777 = vst.msk [vmem:[#allocation2 + $0x141] sm:$0xff] %vm751_vm4, %v706_v50  ;;  %1026 = vrot.lane.b32.xlu0 %v959_v52, %s3047_s29  ;;  %v963_v8 = vrot.slane %v3662_v63, 1  ;;  %v965_v15 = vrot.slane %v822_v9, 1  ;;  %v1140_v22 = vrot.slane %v3662_v63, 2  ;;  %v1142_v32 = vrot.slane %v822_v9, 2 }
  0xeb   : > { %v515_v0 = vpop.permute.xlu0 %514  ;;  %v964_v20 = vsel %vm901_vm5, %v962_v7, %v963_v8  ;;  %v966_v26 = vsel %vm901_vm5, %v963_v8, %v965_v15  ;;  %v1141_v34 = vsel %vm1078_vm7, %v1139_v21, %v1140_v22  ;;  %v1143_v46 = vsel %vm1078_vm7, %v1140_v22, %v1142_v32 }
  0xec   : > { %v517_v2 = vpop.permute.xlu1 %516  ;;  %585 = vst.msk [vmem:[#allocation2 + $0x151] sm:$0xff] %vm558_vm3, %v515_v0  ;;  %1028 = vrot.lane.b32.xlu1 %v961_v1, %s3047_s29 }
  0xed   : > { %586 = vst.msk [vmem:[#allocation2 + $0x159] sm:$0xff] %vm558_vm3, %v517_v2  ;;  %1203 = vrot.lane.b32.xlu0 %v1136_v6, %s3048_s7 }
  0xef   : > { %v708_v10 = vpop.permute.xlu0 %707  ;;  %v3680_v23 = vld [vmem:[#allocation2 + $0x138] sm:$0xff] }
  0xf0   : > { %v710_v14 = vpop.permute.xlu1 %709  ;;  %778 = vst.msk [vmem:[#allocation2 + $0x151] sm:$0xff] %vm751_vm4, %v708_v10  ;;  %1205 = vrot.lane.b32.xlu1 %v1138_v13, %s3048_s7  ;;  %v3682_v24 = vld [vmem:[#allocation2 + $0x140] sm:$0xff]  ;;  %v967_v38 = vrot.slane %v3680_v23, 1  ;;  %v825_v41 = vld [vmem:[#allocation2 + $0x148] sm:$0x3]  ;;  %v1144_v51 = vrot.slane %v3680_v23, 2 }
  0xf1   : > { %779 = vst.msk [vmem:[#allocation2 + $0x159] sm:$0xff] %vm751_vm4, %v710_v14  ;;  %1030 = vrot.lane.b32.xlu0 %v964_v20, %s3047_s29  ;;  %v968_v40 = vrot.slane %v3682_v24, 1  ;;  %v970_v49 = vrot.slane %v825_v41, 1  ;;  %v1145_v52 = vrot.slane %v3682_v24, 2  ;;  %v1147_v3 = vrot.slane %v825_v41, 2 }
  0xf3   : > { %v519_v25 = vpop.permute.xlu0 %518  ;;  %v969_v50 = vsel %vm901_vm5, %v967_v38, %v968_v40  ;;  %v971_v1 = vsel %vm901_vm5, %v968_v40, %v970_v49  ;;  %v1146_v6 = vsel %vm1078_vm7, %v1144_v51, %v1145_v52  ;;  %v1148_v13 = vsel %vm1078_vm7, %v1145_v52, %v1147_v3 }
  0xf4   : > { %v521_v29 = vpop.permute.xlu1 %520  ;;  %587 = vst.msk [vmem:[#allocation2 + $0x169] sm:$0xff] %vm558_vm3, %v519_v25  ;;  %1032 = vrot.lane.b32.xlu1 %v966_v26, %s3047_s29 }
  0xf5   : > { %588 = vst.msk [vmem:[#allocation2 + $0x171] sm:$0xff] %vm558_vm3, %v521_v29  ;;  %1207 = vrot.lane.b32.xlu0 %v1141_v34, %s3048_s7 }
  0xf7   : > { %v712_v44 = vpop.permute.xlu0 %711  ;;  %v3700_v53 = vld [vmem:[#allocation2 + $0x150] sm:$0xff] }
  0xf8   : > { %v714_v47 = vpop.permute.xlu1 %713  ;;  %780 = vst.msk [vmem:[#allocation2 + $0x169] sm:$0xff] %vm751_vm4, %v712_v44  ;;  %1209 = vrot.lane.b32.xlu1 %v1143_v46, %s3048_s7  ;;  %v3702_v54 = vld [vmem:[#allocation2 + $0x158] sm:$0xff]  ;;  %v972_v7 = vrot.slane %v3700_v53, 1  ;;  %v828_v9 = vld [vmem:[#allocation2 + $0x160] sm:$0x3]  ;;  %v1149_v21 = vrot.slane %v3700_v53, 2 }
  0xf9   : > { %781 = vst.msk [vmem:[#allocation2 + $0x171] sm:$0xff] %vm751_vm4, %v714_v47  ;;  %1034 = vrot.lane.b32.xlu0 %v969_v50, %s3047_s29  ;;  %v973_v8 = vrot.slane %v3702_v54, 1  ;;  %v975_v15 = vrot.slane %v828_v9, 1  ;;  %v1150_v22 = vrot.slane %v3702_v54, 2  ;;  %v1152_v34 = vrot.slane %v828_v9, 2 }
  0xfb   : > { %v523_v0 = vpop.permute.xlu0 %522  ;;  %v974_v20 = vsel %vm901_vm5, %v972_v7, %v973_v8  ;;  %v976_v32 = vsel %vm901_vm5, %v973_v8, %v975_v15  ;;  %v1151_v38 = vsel %vm1078_vm7, %v1149_v21, %v1150_v22  ;;  %v1153_v49 = vsel %vm1078_vm7, %v1150_v22, %v1152_v34 }
  0xfc   : > { %v525_v2 = vpop.permute.xlu1 %524  ;;  %589 = vst.msk [vmem:[#allocation2 + $0x181] sm:$0xff] %vm558_vm3, %v523_v0  ;;  %1036 = vrot.lane.b32.xlu1 %v971_v1, %s3047_s29 }
  0xfd   : > { %590 = vst.msk [vmem:[#allocation2 + $0x189] sm:$0xff] %vm558_vm3, %v525_v2  ;;  %1211 = vrot.lane.b32.xlu0 %v1146_v6, %s3048_s7 }
  0xff   : > { %v716_v10 = vpop.permute.xlu0 %715  ;;  %v3720_v25 = vld [vmem:[#allocation2 + $0x168] sm:$0xff] }
 0x100   : > { %v718_v14 = vpop.permute.xlu1 %717  ;;  %782 = vst.msk [vmem:[#allocation2 + $0x181] sm:$0xff] %vm751_vm4, %v716_v10  ;;  %1213 = vrot.lane.b32.xlu1 %v1148_v13, %s3048_s7  ;;  %v3722_v26 = vld [vmem:[#allocation2 + $0x170] sm:$0xff]  ;;  %v977_v40 = vrot.slane %v3720_v25, 1  ;;  %v831_v44 = vld [vmem:[#allocation2 + $0x178] sm:$0x3]  ;;  %v1154_v52 = vrot.slane %v3720_v25, 2 }
 0x101   : > { %783 = vst.msk [vmem:[#allocation2 + $0x189] sm:$0xff] %vm751_vm4, %v718_v14  ;;  %1038 = vrot.lane.b32.xlu0 %v974_v20, %s3047_s29  ;;  %v978_v41 = vrot.slane %v3722_v26, 1  ;;  %v980_v50 = vrot.slane %v831_v44, 1  ;;  %v1155_v0 = vrot.slane %v3722_v26, 2  ;;  %v1157_v9 = vrot.slane %v831_v44, 2  ;;  %v850_v10 = vld [vmem:[%s4268_s3 + $0x60] sm:$0xff] }
 0x102   : > { %v851_v13 = vld [vmem:[%s4268_s3 + $0x68] sm:$0xff] }
 0x103   : > { %v983_v29 = vpop.permute.xlu0 %982  ;;  %v979_v51 = vsel %vm901_vm5, %v977_v40, %v978_v41  ;;  %v981_v8 = vsel %vm901_vm5, %v978_v41, %v980_v50  ;;  %v1156_v15 = vsel %vm1078_vm7, %v1154_v52, %v1155_v0  ;;  %v1158_v40 = vsel %vm1078_vm7, %v1155_v0, %v1157_v9  ;;  %v3764_v50 = vld [vmem:[#allocation2 + $0x1a0] sm:$0xff] }
 0x104   : > { %1040 = vrot.lane.b32.xlu1 %v976_v32, %s3047_s29  ;;  %v1255_v6 = vsel %vm276_vm0, %v3370_v36, %v983_v29  ;;  %v2949_v32 = vpack.c.bf16 %v851_v13, %v850_v10  ;;  %v837_v13 = vld [vmem:[#allocation2 + $0x1a8] sm:$0x3] }
 0x105   : > { %1215 = vrot.lane.b32.xlu0 %v1151_v38, %s3048_s7 }
 0x106   : > { %v987_v46 = vpop.permute.xlu1 %986 }
 0x107   : > { %v985_v47 = vpop.permute.xlu0 %984  ;;  %v3736_v1 = vld [vmem:[#allocation2 + $0x180] sm:$0xff]  ;;  %v1257_v22 = vsel %vm276_vm0, %v3411_v57, %v987_v46 }
 0x108   : > { %1217 = vrot.lane.b32.xlu1 %v1153_v49, %s3048_s7  ;;  %v3738_v2 = vld [vmem:[#allocation2 + $0x188] sm:$0xff]  ;;  %v1323_v36 = vrot.slane %v3736_v1, 1  ;;  %v834_v21 = vld [vmem:[#allocation2 + $0x190] sm:$0x3]  ;;  %v1256_v34 = vsel %vm276_vm0, %v3372_v39, %v985_v47  ;;  %v3762_v49 = vld [vmem:[#allocation2 + $0x198] sm:$0xff]  ;;  %v1334_v39 = vrot.slane %v3736_v1, 2 }
 0x109   : > { %1042 = vrot.lane.b32.xlu0 %v979_v51, %s3047_s29  ;;  %v1324_v20 = vrot.slane %v3738_v2, 1  ;;  %v1326_v44 = vrot.slane %v834_v21, 1  ;;  %v1335_v46 = vrot.slane %v3738_v2, 2  ;;  %v1912_v0 = vrot.slane %v3762_v49, 1 }
 0x10a   : > { %v989_v3 = vpop.permute.xlu1 %988  ;;  %v1337_v10 = vrot.slane %v834_v21, 2 }
 0x10b   : > { %v1160_v7 = vpop.permute.xlu0 %1159  ;;  %v1325_v57 = vsel %vm901_vm5, %v1323_v36, %v1324_v20  ;;  %v1258_v47 = vsel %vm276_vm0, %v3422_v62, %v989_v3  ;;  %v1327_v9 = vsel %vm901_vm5, %v1324_v20, %v1326_v44  ;;  %v1336_v62 = vsel %vm1078_vm7, %v1334_v39, %v1335_v46  ;;  %v852_v3 = vld [vmem:[%s4268_s3 + $0x70] sm:$0xf] }
 0x10c   : > { %1044 = vrot.lane.b32.xlu1 %v981_v8, %s3047_s29  ;;  %v1288_v14 = vsel %vm1287_vm8, %v1255_v6, %v1160_v7  ;;  %v1913_v6 = vrot.slane %v3764_v50, 1  ;;  %v1338_v21 = vsel %vm1078_vm7, %v1335_v46, %v1337_v10  ;;  %v1926_v44 = vrot.slane %v837_v13, 2 }
 0x10d   : > { %2823 = vmatprep.mubr.msk.f32.mxu0 %vm1349_vm9, %v1288_v14  ;;  %1219 = vrot.lane.b32.xlu0 %v1156_v15, %s3048_s7  ;;  %v1915_v15 = vrot.slane %v837_v13, 1 }
 0x10e   : > { %v1164_v29 = vpop.permute.xlu1 %1163  ;;  %v1914_v14 = vsel %vm901_vm5, %v1912_v0, %v1913_v6 }
 0x10f   : > { %v1162_v38 = vpop.permute.xlu0 %1161  ;;  %v1290_v41 = vsel %vm1287_vm8, %v1257_v22, %v1164_v29  ;;  %v1923_v22 = vrot.slane %v3762_v49, 2  ;;  %v1924_v29 = vrot.slane %v3764_v50, 2 }
 0x110   : > { %v1289_v51 = vsel %vm1287_vm8, %v1256_v34, %v1162_v38  ;;  %1221 = vrot.lane.b32.xlu1 %v1158_v40, %s3048_s7  ;;  %2765 = vmatprep.mubr.msk.f32.mxu1 %vm1349_vm9, %v1290_v41 }
 0x111   : > { %2824 = vmatmul.mubr.msk.f32.vlgmr.msra.gmra.mrb[0].mxu0 %vm1349_vm9, %v1289_v51  ;;  %1328 = vrot.lane.b32.xlu0 %v1325_v57, %s3047_s29 }
 0x112   : > { %2826 = vmatprep.mubr.msk.f32.mxu0 %vm1349_vm9, %v1290_v41  ;;  %v1166_v52 = vpop.permute.xlu1 %1165  ;;  %2948 = vmatpush3.bf16.msra.mxu0 %v3548_v48  ;;  %v1925_v41 = vsel %vm1078_vm7, %v1923_v22, %v1924_v29 }
 0x113   : > { %v1291_v7 = vsel %vm1287_vm8, %v1258_v47, %v1166_v52  ;;  %v991_v8 = vpop.permute.xlu0 %990  ;;  %2950 = vmatprep.subr.bf16.mxu0 %v2949_v32 }
 0x114   : > { %1330 = vrot.lane.b32.xlu1 %v1327_v9, %s3047_s29  ;;  %2766 = vmatmul.mubr.msk.f32.vlgmr.msra.gmra.mrb[0].mxu1 %vm1349_vm9, %v1291_v7  ;;  %v1259_v36 = vsel %vm276_vm0, %v3451_v17, %v991_v8 }
 0x115   : > { %1339 = vrot.lane.b32.xlu0 %v1336_v62, %s3048_s7  ;;  %2827 = vmatmul.mubr.msk.f32.gmra.mrb[2].mxu0 %vm1349_vm9, %v1291_v7 }
 0x116   : > { %v993_v48 = vpop.permute.xlu1 %992  ;;  %2952 = vmatpush3.bf16.msra.mxu0 %v2949_v32  ;;  %2956 = vmatpush3.bf16.msra.mxu1 %v3366_v33  ;;  %v1916_v32 = vsel %vm901_vm5, %v1913_v6, %v1915_v15 }
 0x117   : > { %v1168_v20 = vpop.permute.xlu0 %1167  ;;  %2879 = vmatprep.subr.msk.mxu0 %vm1446_vm6, %v852_v3  ;;  %2954 = vmatprep.subr.bf16.mxu1 %v3392_v45  ;;  %v1260_v33 = vsel %vm276_vm0, %v3453_v18, %v993_v48 }
 0x118   : > { %v3800_v34 = vsel %vm1287_vm8, %v1259_v36, %v1168_v20  ;;  %1341 = vrot.lane.b32.xlu1 %v1338_v21, %s3048_s7 }
 0x119   : > { %2768 = vmatprep.mubr.msk.f32.mxu1 %vm1349_vm9, %v3800_v34  ;;  %2829 = vmatprep.mubr.msk.f32.mxu0 %vm1349_vm9, %v3800_v34 }
 0x11a   : > { %v1170_v17 = vpop.permute.xlu1 %1169  ;;  %1917 = vrot.lane.b32.xlu0 %v1914_v14, %s3047_s29  ;;  %2880 = vmatpush3.msk.msra.mxu0 %vm1446_vm6, %v852_v3 }
 0x11b   : > { %v3813_v38 = vsel %vm1287_vm8, %v1260_v33, %v1170_v17  ;;  %v995_v40 = vpop.permute.xlu0 %994  ;;  %2957 = vmatpush3.bf16.msra.mxu1 %v3392_v45  ;;  %v1927_v45 = vsel %vm1078_vm7, %v1924_v29, %v1926_v44 }
 0x11c   : > { %2769 = vmatmul.mubr.msk.f32.gmra.mrb[2].mxu1 %vm1349_vm9, %v3813_v38  ;;  %2830 = vmatmul.mubr.msk.f32.gmra.mrb[4].mxu0 %vm1349_vm9, %v3813_v38  ;;  %v1261_v51 = vsel %vm276_vm0, %v3471_v35, %v995_v40 }
 0x11d   : > { %1919 = vrot.lane.b32.xlu1 %v1916_v32, %s3047_s29  ;;  %2955 = vmatprep.subr.msk.mxu1 %vm1446_vm6, %v3416_v59 }
 0x11e   : > { %v997_v18 = vpop.permute.xlu1 %996  ;;  %1928 = vrot.lane.b32.xlu0 %v1925_v41, %s3048_s7 }
 0x11f   : > { %v1172_v57 = vpop.permute.xlu0 %1171  ;;  %2958 = vmatpush3.msk.msra.mxu1 %vm1446_vm6, %v3416_v59  ;;  %v1262_v46 = vsel %vm276_vm0, %v3473_v37, %v997_v18 }
 0x120   : > { %v3831_v39 = vsel %vm1287_vm8, %v1261_v51, %v1172_v57 }
 0x121   : > { %2771 = vmatprep.mubr.msk.f32.mxu1 %vm1349_vm9, %v3831_v39  ;;  %2832 = vmatprep.mubr.msk.f32.mxu0 %vm1349_vm9, %v3831_v39 }
 0x122   : > { %v1174_v47 = vpop.permute.xlu1 %1173  ;;  %1930 = vrot.lane.b32.xlu1 %v1927_v45, %s3048_s7 }
 0x123   : > { %v3841_v35 = vsel %vm1287_vm8, %v1262_v46, %v1174_v47  ;;  %v999_v52 = vpop.permute.xlu0 %998 }
 0x124   : > { %2772 = vmatmul.mubr.msk.f32.gmra.mrb[4].mxu1 %vm1349_vm9, %v3841_v35  ;;  %2833 = vmatmul.mubr.msk.f32.gmra.mrb[6].mxu0 %vm1349_vm9, %v3841_v35  ;;  %v1263_v0 = vsel %vm276_vm0, %v3491_v55, %v999_v52 }
 0x126   : > { %v1001_v59 = vpop.permute.xlu1 %1000 }
 0x127   : > { %v1176_v6 = vpop.permute.xlu0 %1175  ;;  %v1264_v7 = vsel %vm276_vm0, %v3493_v56, %v1001_v59 }
 0x128   : > { %v1296_v37 = vsel %vm1287_vm8, %v1263_v0, %v1176_v6 }
 0x129   : > { %2774 = vmatprep.mubr.msk.f32.mxu1 %vm1349_vm9, %v1296_v37  ;;  %2835 = vmatprep.mubr.msk.f32.mxu0 %vm1349_vm9, %v1296_v37 }
 0x12a   : > { %v1178_v8 = vpop.permute.xlu1 %1177 }
 0x12b   : > { %v1297_v9 = vsel %vm1287_vm8, %v1264_v7, %v1178_v8  ;;  %v1003_v10 = vpop.permute.xlu0 %1002 }
 0x12c   : > { %2775 = vmatmul.mubr.msk.f32.gmra.mrb[6].mxu1 %vm1349_vm9, %v1297_v9  ;;  %2836 = vmatmul.mubr.msk.f32.gmra.mrb[8].mxu0 %vm1349_vm9, %v1297_v9  ;;  %v1265_v55 = vsel %vm276_vm0, %v3511_v11, %v1003_v10 }
 0x12e   : > { %v1005_v13 = vpop.permute.xlu1 %1004 }
 0x12f   : > { %v1180_v62 = vpop.permute.xlu0 %1179  ;;  %v1266_v56 = vsel %vm276_vm0, %v3513_v12, %v1005_v13 }
 0x130   : > { %v1298_v3 = vsel %vm1287_vm8, %v1265_v55, %v1180_v62 }
 0x131   : > { %2777 = vmatprep.mubr.msk.f32.mxu1 %vm1349_vm9, %v1298_v3  ;;  %2838 = vmatprep.mubr.msk.f32.mxu0 %vm1349_vm9, %v1298_v3 }
 0x132   : > { %v1182_v48 = vpop.permute.xlu1 %1181 }
 0x133   : > { %v1299_v14 = vsel %vm1287_vm8, %v1266_v56, %v1182_v48  ;;  %v1007_v15 = vpop.permute.xlu0 %1006 }
 0x134   : > { %2778 = vmatmul.mubr.msk.f32.gmra.mrb[8].mxu1 %vm1349_vm9, %v1299_v14  ;;  %2839 = vmatmul.mubr.msk.f32.gmra.mrb[10].mxu0 %vm1349_vm9, %v1299_v14  ;;  %v1267_v11 = vsel %vm276_vm0, %v3531_v30, %v1007_v15 }
 0x136   : > { %v1009_v36 = vpop.permute.xlu1 %1008 }
 0x137   : > { %v1184_v20 = vpop.permute.xlu0 %1183  ;;  %v1268_v12 = vsel %vm276_vm0, %v3533_v31, %v1009_v36 }
 0x138   : > { %v1300_v21 = vsel %vm1287_vm8, %v1267_v11, %v1184_v20 }
 0x139   : > { %2780 = vmatprep.mubr.msk.f32.mxu1 %vm1349_vm9, %v1300_v21  ;;  %2841 = vmatprep.mubr.msk.f32.mxu0 %vm1349_vm9, %v1300_v21 }
 0x13a   : > { %v1186_v22 = vpop.permute.xlu1 %1185 }
 0x13b   : > { %v1301_v29 = vsel %vm1287_vm8, %v1268_v12, %v1186_v22  ;;  %v1011_v33 = vpop.permute.xlu0 %1010 }
 0x13c   : > { %2781 = vmatmul.mubr.msk.f32.gmra.mrb[10].mxu1 %vm1349_vm9, %v1301_v29  ;;  %2842 = vmatmul.mubr.msk.f32.gmra.mrb[12].mxu0 %vm1349_vm9, %v1301_v29  ;;  %v1269_v30 = vsel %vm276_vm0, %v3560_v60, %v1011_v33 }
 0x13e   : > { %v1013_v17 = vpop.permute.xlu1 %1012 }
 0x13f   : > { %v1188_v32 = vpop.permute.xlu0 %1187  ;;  %v1270_v31 = vsel %vm276_vm0, %v3562_v61, %v1013_v17 }
 0x140   : > { %v1302_v40 = vsel %vm1287_vm8, %v1269_v30, %v1188_v32 }
 0x141   : > { %2783 = vmatprep.mubr.msk.f32.mxu1 %vm1349_vm9, %v1302_v40  ;;  %2844 = vmatprep.mubr.msk.f32.mxu0 %vm1349_vm9, %v1302_v40 }
 0x142   : > { %v1190_v41 = vpop.permute.xlu1 %1189 }
 0x143   : > { %v1303_v44 = vsel %vm1287_vm8, %v1270_v31, %v1190_v41  ;;  %v1015_v18 = vpop.permute.xlu0 %1014 }
 0x144   : > { %2784 = vmatmul.mubr.msk.f32.gmra.mrb[12].mxu1 %vm1349_vm9, %v1303_v44  ;;  %2845 = vmatmul.mubr.msk.f32.gmra.mrb[14].mxu0 %vm1349_vm9, %v1303_v44  ;;  %v1271_v51 = vsel %vm276_vm0, %v3580_v16, %v1015_v18 }
 0x145   : > { %2881 = vmatprep.mubr.msk.f32.mxu0 %vm1349_vm9, %v3800_v34 }
 0x146   : > { %v1017_v60 = vpop.permute.xlu1 %1016 }
 0x147   : > { %v1192_v57 = vpop.permute.xlu0 %1191  ;;  %v1272_v61 = vsel %vm276_vm0, %v3582_v19, %v1017_v60 }
 0x148   : > { %v3892_v45 = vsel %vm1287_vm8, %v1271_v51, %v1192_v57  ;;  %2882 = vmatmul.mubr.msk.f32.vlgmr.msra.gmra.mrb[0].mxu0 %vm1349_vm9, %v3813_v38 }
 0x149   : > { %2786 = vmatprep.mubr.msk.f32.mxu1 %vm1349_vm9, %v3892_v45  ;;  %2884 = vmatprep.mubr.msk.f32.mxu0 %vm1349_vm9, %v3831_v39 }
 0x14a   : > { %v1194_v34 = vpop.permute.xlu1 %1193 }
 0x14b   : > { %v3903_v46 = vsel %vm1287_vm8, %v1272_v61, %v1194_v34  ;;  %v1019_v16 = vpop.permute.xlu0 %1018 }
 0x14c   : > { %2787 = vmatmul.mubr.msk.f32.gmra.mrb[14].mxu1 %vm1349_vm9, %v3903_v46  ;;  %2885 = vmatmul.mubr.msk.f32.gmra.mrb[2].mxu0 %vm1349_vm9, %v3841_v35  ;;  %v1273_v39 = vsel %vm276_vm0, %v3600_v42, %v1019_v16 }
 0x14d   : > { %2887 = vmatprep.mubr.msk.f32.mxu0 %vm1349_vm9, %v1296_v37 }
 0x14e   : > { %v1021_v38 = vpop.permute.xlu1 %1020 }
 0x14f   : > { %v1196_v47 = vpop.permute.xlu0 %1195  ;;  %v1274_v35 = vsel %vm276_vm0, %v3602_v43, %v1021_v38 }
 0x150   : > { %v3913_v19 = vsel %vm1287_vm8, %v1273_v39, %v1196_v47  ;;  %2888 = vmatmul.mubr.msk.f32.gmra.mrb[4].mxu0 %vm1349_vm9, %v1297_v9 }
 0x151   : > { %2789 = vmatprep.mubr.msk.f32.mxu1 %vm1349_vm9, %v3913_v19  ;;  %2890 = vmatprep.mubr.msk.f32.mxu0 %vm1349_vm9, %v1298_v3 }
 0x152   : > { %v1198_v52 = vpop.permute.xlu1 %1197 }
 0x153   : > { %v3922_v59 = vsel %vm1287_vm8, %v1274_v35, %v1198_v52  ;;  %v1023_v0 = vpop.permute.xlu0 %1022 }
 0x154   : > { %2790 = vmatmul.mubr.msk.f32.gmra.mrb[16].mxu1 %vm1349_vm9, %v3922_v59  ;;  %2891 = vmatmul.mubr.msk.f32.gmra.mrb[6].mxu0 %vm1349_vm9, %v1299_v14  ;;  %v1275_v6 = vsel %vm276_vm0, %v3620_v4, %v1023_v0 }
 0x155   : > { %2893 = vmatprep.mubr.msk.f32.mxu0 %vm1349_vm9, %v1300_v21 }
 0x156   : > { %v1025_v42 = vpop.permute.xlu1 %1024 }
 0x157   : > { %v1200_v37 = vpop.permute.xlu0 %1199  ;;  %v1276_v43 = vsel %vm276_vm0, %v3622_v5, %v1025_v42 }
 0x158   : > { %v3931_v7 = vsel %vm1287_vm8, %v1275_v6, %v1200_v37  ;;  %2894 = vmatmul.mubr.msk.f32.gmra.mrb[8].mxu0 %vm1349_vm9, %v1301_v29 }
 0x159   : > { %2792 = vmatprep.mubr.msk.f32.mxu1 %vm1349_vm9, %v3931_v7  ;;  %2896 = vmatprep.mubr.msk.f32.mxu0 %vm1349_vm9, %v1302_v40 }
 0x15a   : > { %v1202_v8 = vpop.permute.xlu1 %1201 }
 0x15b   : > { %v3940_v9 = vsel %vm1287_vm8, %v1276_v43, %v1202_v8  ;;  %v1027_v10 = vpop.permute.xlu0 %1026 }
 0x15c   : > { %2793 = vmatmul.mubr.msk.f32.gmra.mrb[18].mxu1 %vm1349_vm9, %v3940_v9  ;;  %2897 = vmatmul.mubr.msk.f32.gmra.mrb[10].mxu0 %vm1349_vm9, %v1303_v44  ;;  %v1277_v13 = vsel %vm276_vm0, %v3640_v27, %v1027_v10 }
 0x15d   : > { %2899 = vmatprep.mubr.msk.f32.mxu0 %vm1349_vm9, %v3892_v45 }
 0x15e   : > { %v1029_v4 = vpop.permute.xlu1 %1028 }
 0x15f   : > { %v1204_v55 = vpop.permute.xlu0 %1203  ;;  %v1278_v62 = vsel %vm276_vm0, %v3642_v28, %v1029_v4 }
 0x160   : > { %v3950_v5 = vsel %vm1287_vm8, %v1277_v13, %v1204_v55  ;;  %2900 = vmatmul.mubr.msk.f32.gmra.mrb[12].mxu0 %vm1349_vm9, %v3903_v46 }
 0x161   : > { %2795 = vmatprep.mubr.msk.f32.mxu1 %vm1349_vm9, %v3950_v5  ;;  %2902 = vmatprep.mubr.msk.f32.mxu0 %vm1349_vm9, %v3913_v19 }
 0x162   : > { %v1206_v3 = vpop.permute.xlu1 %1205 }
 0x163   : > { %v3961_v56 = vsel %vm1287_vm8, %v1278_v62, %v1206_v3  ;;  %v1031_v27 = vpop.permute.xlu0 %1030 }
 0x164   : > { %2796 = vmatmul.mubr.msk.f32.gmra.mrb[20].mxu1 %vm1349_vm9, %v3961_v56  ;;  %2903 = vmatmul.mubr.msk.f32.gmra.mrb[14].mxu0 %vm1349_vm9, %v3922_v59  ;;  %v1279_v14 = vsel %vm276_vm0, %v3660_v58, %v1031_v27 }
 0x165   : > { %2905 = vmatprep.mubr.msk.f32.mxu0 %vm1349_vm9, %v3931_v7 }
 0x166   : > { %v1033_v48 = vpop.permute.xlu1 %1032 }
 0x167   : > { %v1208_v15 = vpop.permute.xlu0 %1207  ;;  %v1280_v36 = vsel %vm276_vm0, %v3662_v63, %v1033_v48 }
 0x168   : > { %v3972_v28 = vsel %vm1287_vm8, %v1279_v14, %v1208_v15  ;;  %2906 = vmatmul.mubr.msk.f32.gmra.mrb[16].mxu0 %vm1349_vm9, %v3940_v9 }
 0x169   : > { %2798 = vmatprep.mubr.msk.f32.mxu1 %vm1349_vm9, %v3972_v28  ;;  %2908 = vmatprep.mubr.msk.f32.mxu0 %vm1349_vm9, %v3950_v5 }
 0x16a   : > { %v1210_v11 = vpop.permute.xlu1 %1209 }
 0x16b   : > { %v3983_v20 = vsel %vm1287_vm8, %v1280_v36, %v1210_v11  ;;  %v1035_v58 = vpop.permute.xlu0 %1034 }
 0x16c   : > { %2799 = vmatmul.mubr.msk.f32.gmra.mrb[22].mxu1 %vm1349_vm9, %v3983_v20  ;;  %2909 = vmatmul.mubr.msk.f32.gmra.mrb[18].mxu0 %vm1349_vm9, %v3961_v56  ;;  %v1281_v12 = vsel %vm276_vm0, %v3680_v23, %v1035_v58 }
 0x16d   : > { %2911 = vmatprep.mubr.msk.f32.mxu0 %vm1349_vm9, %v3972_v28 }
 0x16e   : > { %v1037_v21 = vpop.permute.xlu1 %1036 }
 0x16f   : > { %v1212_v22 = vpop.permute.xlu0 %1211  ;;  %v1282_v29 = vsel %vm276_vm0, %v3682_v24, %v1037_v21 }
 0x170   : > { %v3994_v63 = vsel %vm1287_vm8, %v1281_v12, %v1212_v22  ;;  %2912 = vmatmul.mubr.msk.f32.gmra.mrb[20].mxu0 %vm1349_vm9, %v3983_v20 }
 0x171   : > { %2801 = vmatprep.mubr.msk.f32.mxu1 %vm1349_vm9, %v3994_v63  ;;  %2914 = vmatprep.mubr.msk.f32.mxu0 %vm1349_vm9, %v3994_v63 }
 0x172   : > { %v1214_v33 = vpop.permute.xlu1 %1213 }
 0x173   : > { %v1315_v17 = vsel %vm1287_vm8, %v1282_v29, %v1214_v33  ;;  %v1039_v23 = vpop.permute.xlu0 %1038 }
 0x174   : > { %2802 = vmatmul.mubr.msk.f32.gmra.mrb[24].mxu1 %vm1349_vm9, %v1315_v17  ;;  %2915 = vmatmul.mubr.msk.f32.gmra.mrb[22].mxu0 %vm1349_vm9, %v1315_v17  ;;  %v1283_v32 = vsel %vm276_vm0, %v3700_v53, %v1039_v23 }
 0x176   : > { %v1041_v30 = vpop.permute.xlu1 %1040 }
 0x177   : > { %v1216_v40 = vpop.permute.xlu0 %1215  ;;  %v1284_v24 = vsel %vm276_vm0, %v3702_v54, %v1041_v30 }
 0x178   : > { %v1316_v31 = vsel %vm1287_vm8, %v1283_v32, %v1216_v40 }
 0x179   : > { %2804 = vmatprep.mubr.msk.f32.mxu1 %vm1349_vm9, %v1316_v31  ;;  %2917 = vmatprep.mubr.msk.f32.mxu0 %vm1349_vm9, %v1316_v31 }
 0x17a   : > { %v1218_v41 = vpop.permute.xlu1 %1217 }
 0x17b   : > { %v1317_v44 = vsel %vm1287_vm8, %v1284_v24, %v1218_v41  ;;  %v1043_v18 = vpop.permute.xlu0 %1042 }
 0x17c   : > { %2805 = vmatmul.mubr.msk.f32.gmra.mrb[26].mxu1 %vm1349_vm9, %v1317_v44  ;;  %2918 = vmatmul.mubr.msk.f32.gmra.mrb[24].mxu0 %vm1349_vm9, %v1317_v44  ;;  %v1285_v53 = vsel %vm276_vm0, %v3720_v25, %v1043_v18 }
 0x17e   : > { %v1045_v60 = vpop.permute.xlu1 %1044 }
 0x17f   : > { %v1220_v51 = vpop.permute.xlu0 %1219  ;;  %v1286_v54 = vsel %vm276_vm0, %v3722_v26, %v1045_v60 }
 0x180   : > { %v1318_v57 = vsel %vm1287_vm8, %v1285_v53, %v1220_v51 }
 0x181   : > { %2807 = vmatprep.mubr.msk.f32.mxu1 %vm1349_vm9, %v1318_v57  ;;  %2920 = vmatprep.mubr.msk.f32.mxu0 %vm1349_vm9, %v1318_v57 }
 0x182   : > { %v1222_v61 = vpop.permute.xlu1 %1221 }
 0x183   : > { %v1319_v34 = vsel %vm1287_vm8, %v1286_v54, %v1222_v61  ;;  %v1329_v16 = vpop.permute.xlu0 %1328 }
 0x184   : > { %2808 = vmatmul.mubr.msk.f32.gmra.mrb[28].mxu1 %vm1349_vm9, %v1319_v34  ;;  %2921 = vmatmul.mubr.msk.f32.gmra.mrb[26].mxu0 %vm1349_vm9, %v1319_v34  ;;  %v1345_v25 = vsel %vm276_vm0, %v3736_v1, %v1329_v16 }
 0x186   : > { %v1331_v38 = vpop.permute.xlu1 %1330 }
 0x187   : > { %v1340_v39 = vpop.permute.xlu0 %1339  ;;  %v1346_v26 = vsel %vm276_vm0, %v3738_v2, %v1331_v38 }
 0x188   : > { %v1347_v47 = vsel %vm1287_vm8, %v1345_v25, %v1340_v39 }
 0x189   : > { %2810 = vmatprep.mubr.msk.f32.mxu1 %vm1349_vm9, %v1347_v47  ;;  %2923 = vmatprep.mubr.msk.f32.mxu0 %vm1349_vm9, %v1347_v47 }
 0x18a   : > { %v1342_v35 = vpop.permute.xlu1 %1341 }
 0x18b   : > { %v1348_v52 = vsel %vm1287_vm8, %v1346_v26, %v1342_v35 }
 0x18c   : > { %2811 = vmatmul.mubr.msk.f32.gmra.mrb[30].mxu1 %vm1349_vm9, %v1348_v52  ;;  %2924 = vmatmul.mubr.msk.f32.gmra.mrb[28].mxu0 %vm1349_vm9, %v1348_v52  ;;  %v1918_v0 = vpop.permute.xlu0 %1917 }
 0x18d   : > { %2847 = vmatprep.mubr.msk.f32.mxu1 %vm1349_vm9, %v3892_v45  ;;  %v1934_v1 = vsel %vm276_vm0, %v3762_v49, %v1918_v0 }
 0x18f   : > { %v1920_v42 = vpop.permute.xlu1 %1919 }
 0x190   : > { %2848 = vmatmul.mubr.msk.f32.vlgmr.msra.gmra.mrb[16].mxu1 %vm1349_vm9, %v3903_v46  ;;  %v1929_v6 = vpop.permute.xlu0 %1928  ;;  %v1935_v37 = vsel %vm276_vm0, %v3764_v50, %v1920_v42 }
 0x191   : > { %2850 = vmatprep.mubr.msk.f32.mxu1 %vm1349_vm9, %v3913_v19  ;;  %v1936_v2 = vsel %vm1287_vm8, %v1934_v1, %v1929_v6 }
 0x192   : > { %2926 = vmatprep.mubr.msk.f32.mxu0 %vm1349_vm9, %v1936_v2 }
 0x194   : > { %2851 = vmatmul.mubr.msk.f32.gmra.mrb[18].mxu1 %vm1349_vm9, %v3922_v59  ;;  %v1931_v45 = vpop.permute.xlu1 %1930 }
 0x195   : > { %2853 = vmatprep.mubr.msk.f32.mxu1 %vm1349_vm9, %v3931_v7  ;;  %v1937_v49 = vsel %vm1287_vm8, %v1935_v37, %v1931_v45 }
 0x196   : > { %2927 = vmatmul.mubr.msk.f32.gmra.mrb[30].mxu0 %vm1349_vm9, %v1937_v49 }
 0x198   : > { %2854 = vmatmul.mubr.msk.f32.gmra.mrb[20].mxu1 %vm1349_vm9, %v3940_v9 }
 0x199   : > { %2856 = vmatprep.mubr.msk.f32.mxu1 %vm1349_vm9, %v3950_v5 }
 0x19c   : > { %2857 = vmatmul.mubr.msk.f32.gmra.mrb[22].mxu1 %vm1349_vm9, %v3961_v56 }
 0x19d   : > { %2859 = vmatprep.mubr.msk.f32.mxu1 %vm1349_vm9, %v3972_v28 }
 0x1a0   : > { %2860 = vmatmul.mubr.msk.f32.gmra.mrb[24].mxu1 %vm1349_vm9, %v3983_v20 }
 0x1a1   : > { %2862 = vmatprep.mubr.msk.f32.mxu1 %vm1349_vm9, %v3994_v63 }
 0x1a4   : > { %2863 = vmatmul.mubr.msk.f32.gmra.mrb[26].mxu1 %vm1349_vm9, %v1315_v17 }
 0x1a5   : > { %2865 = vmatprep.mubr.msk.f32.mxu1 %vm1349_vm9, %v1316_v31 }
 0x1a8   : > { %2866 = vmatmul.mubr.msk.f32.gmra.mrb[28].mxu1 %vm1349_vm9, %v1317_v44 }
 0x1a9   : > { %2868 = vmatprep.mubr.msk.f32.mxu1 %vm1349_vm9, %v1318_v57 }
 0x1ac   : > { %2869 = vmatmul.mubr.msk.f32.gmra.mrb[30].mxu1 %vm1349_vm9, %v1319_v34 }
 0x1e7   : > { %v2767_v50 = vpop.f32.mrb[0].mxu1 }
 0x1e8   : > { %v1516_v46 = vpop.f32.mrb[1].mxu1 }
 0x1ef   : > { %v2770_v19 = vpop.f32.mrb[2].mxu1 }
 0x1f0   : > { %v1526_v59 = vpop.f32.mrb[3].mxu1 }
 0x1f7   : > { %v2773_v7 = vpop.f32.mrb[4].mxu1 }
 0x1f8   : > { %v1536_v43 = vpop.f32.mrb[5].mxu1 }
 0x1ff   : > { %v2776_v8 = vpop.f32.mrb[6].mxu1 }
 0x200   : > { %v1546_v9 = vpop.f32.mrb[7].mxu1 }
 0x207   : > { %v4072_v10 = vpop.f32.mrb[8].mxu1 }
 0x208   : > { %v4074_v4 = vpop.f32.mrb[9].mxu1 }
 0x20f   : > { %v4076_v13 = vpop.f32.mrb[10].mxu1 }
 0x210   : > { %v4078_v55 = vpop.f32.mrb[11].mxu1 }
 0x217   : > { %v4080_v5 = vpop.f32.mrb[12].mxu1 }
 0x218   : > { %v4082_v62 = vpop.f32.mrb[13].mxu1 }
 0x21b   : > { %v2883_v3 = vpop.f32.mrb[0].mxu0 }
 0x21c   : > { %v2959_v56 = vadd.f32 %v2883_v3, %v2767_v50  ;;  %v2013_v27 = vpop.f32.mrb[1].mxu0 }
 0x21d   : > { %v2960_v48 = vadd.f32 %v2013_v27, %v1516_v46 }
 0x21e   : > { %2206 = vst.msk [vmem:[%s4088_s23 + $0x8] sm:$0xff] %vm2204_vm10, %v2959_v56  ;;  %v2309_v28 = vmul.f32 %v2959_v56, %v2959_v56  ;;  %v2268_v12 = vsel %vm2204_vm10, %v2959_v56, 0.0 }
 0x21f   : > { %2205 = vst.msk [vmem:[%s4088_s23] sm:$0xff] %vm2204_vm10, %v2960_v48  ;;  %v4094_v14 = vpop.f32.mrb[14].mxu1  ;;  %v2886_v15 = vpop.f32.mrb[2].mxu0  ;;  %v2308_v58 = vmul.f32 %v2960_v48, %v2960_v48  ;;  %v2237_v29 = vsel %vm2204_vm10, %v2960_v48, 0.0 }
 0x220   : > { %v2961_v36 = vadd.f32 %v2886_v15, %v2770_v19  ;;  %v4096_v11 = vpop.f32.mrb[15].mxu1  ;;  %v2023_v20 = vpop.f32.mrb[3].mxu0  ;;  %v2371_v32 = vsel %vm2204_vm10, %v2309_v28, 0.0 }
 0x221   : > { %v2962_v21 = vadd.f32 %v2023_v20, %v1526_v59  ;;  %v2340_v44 = vsel %vm2204_vm10, %v2308_v58, 0.0 }
 0x222   : > { %2208 = vst.msk [vmem:[%s4088_s23 + $0x18] sm:$0xff] %vm2204_vm10, %v2961_v36  ;;  %v2269_v22 = vsel %vm2204_vm10, %v2961_v36, 0.0  ;;  %v2311_v63 = vmul.f32 %v2961_v36, %v2961_v36 }
 0x223   : > { %v2270_v33 = vadd.f32 %v2269_v22, %v2268_v12  ;;  %2207 = vst.msk [vmem:[%s4088_s23 + $0x10] sm:$0xff] %vm2204_vm10, %v2962_v21  ;;  %v2238_v17 = vsel %vm2204_vm10, %v2962_v21, 0.0  ;;  %v2310_v23 = vmul.f32 %v2962_v21, %v2962_v21  ;;  %v2889_v30 = vpop.f32.mrb[4].mxu0 }
 0x224   : > { %v2372_v40 = vsel %vm2204_vm10, %v2311_v63, 0.0  ;;  %v2239_v31 = vadd.f32 %v2238_v17, %v2237_v29  ;;  %v2963_v24 = vadd.f32 %v2889_v30, %v2773_v7  ;;  %v2033_v41 = vpop.f32.mrb[5].mxu0 }
 0x225   : > { %v2373_v18 = vadd.f32 %v2372_v40, %v2371_v32  ;;  %v2341_v60 = vsel %vm2204_vm10, %v2310_v23, 0.0  ;;  %v2964_v53 = vadd.f32 %v2033_v41, %v1536_v43 }
 0x226   : > { %v2342_v51 = vadd.f32 %v2341_v60, %v2340_v44  ;;  %2210 = vst.msk [vmem:[%s4088_s23 + $0x28] sm:$0xff] %vm2204_vm10, %v2963_v24  ;;  %v2271_v57 = vsel %vm2204_vm10, %v2963_v24, 0.0  ;;  %v2313_v54 = vmul.f32 %v2963_v24, %v2963_v24 }
 0x227   : > { %v2272_v61 = vadd.f32 %v2271_v57, %v2270_v33  ;;  %2209 = vst.msk [vmem:[%s4088_s23 + $0x20] sm:$0xff] %vm2204_vm10, %v2964_v53  ;;  %v2240_v34 = vsel %vm2204_vm10, %v2964_v53, 0.0  ;;  %v2312_v16 = vmul.f32 %v2964_v53, %v2964_v53  ;;  %v2892_v38 = vpop.f32.mrb[6].mxu0 }
 0x228   : > { %v2374_v25 = vsel %vm2204_vm10, %v2313_v54, 0.0  ;;  %v2241_v39 = vadd.f32 %v2240_v34, %v2239_v31  ;;  %v2965_v47 = vadd.f32 %v2892_v38, %v2776_v8  ;;  %v2043_v26 = vpop.f32.mrb[7].mxu0 }
 0x229   : > { %v2375_v35 = vadd.f32 %v2374_v25, %v2373_v18  ;;  %v2343_v52 = vsel %vm2204_vm10, %v2312_v16, 0.0  ;;  %v2966_v0 = vadd.f32 %v2043_v26, %v1546_v9 }
 0x22a   : > { %v2344_v1 = vadd.f32 %v2343_v52, %v2342_v51  ;;  %2212 = vst.msk [vmem:[%s4088_s23 + $0x38] sm:$0xff] %vm2204_vm10, %v2965_v47  ;;  %v2273_v42 = vsel %vm2204_vm10, %v2965_v47, 0.0  ;;  %v2315_v6 = vmul.f32 %v2965_v47, %v2965_v47 }
 0x22b   : > { %v2274_v2 = vadd.f32 %v2273_v42, %v2272_v61  ;;  %2211 = vst.msk [vmem:[%s4088_s23 + $0x30] sm:$0xff] %vm2204_vm10, %v2966_v0  ;;  %v2242_v37 = vsel %vm2204_vm10, %v2966_v0, 0.0  ;;  %v2314_v45 = vmul.f32 %v2966_v0, %v2966_v0  ;;  %v2895_v49 = vpop.f32.mrb[8].mxu0 }
 0x22c   : > { %v2376_v50 = vsel %vm2204_vm10, %v2315_v6, 0.0  ;;  %v2243_v46 = vadd.f32 %v2242_v37, %v2241_v39  ;;  %v2967_v19 = vadd.f32 %v2895_v49, %v4072_v10  ;;  %v2053_v59 = vpop.f32.mrb[9].mxu0 }
 0x22d   : > { %v2377_v7 = vadd.f32 %v2376_v50, %v2375_v35  ;;  %v2345_v43 = vsel %vm2204_vm10, %v2314_v45, 0.0  ;;  %v2968_v8 = vadd.f32 %v2053_v59, %v4074_v4 }
 0x22e   : > { %v2346_v9 = vadd.f32 %v2345_v43, %v2344_v1  ;;  %2214 = vst.msk [vmem:[%s4088_s23 + $0x48] sm:$0xff] %vm2204_vm10, %v2967_v19  ;;  %v2275_v3 = vsel %vm2204_vm10, %v2967_v19, 0.0  ;;  %v2317_v56 = vmul.f32 %v2967_v19, %v2967_v19 }
 0x22f   : > { %v2276_v27 = vadd.f32 %v2275_v3, %v2274_v2  ;;  %2213 = vst.msk [vmem:[%s4088_s23 + $0x40] sm:$0xff] %vm2204_vm10, %v2968_v8  ;;  %v2244_v48 = vsel %vm2204_vm10, %v2968_v8, 0.0  ;;  %v2316_v10 = vmul.f32 %v2968_v8, %v2968_v8  ;;  %v2898_v15 = vpop.f32.mrb[10].mxu0 }
 0x230   : > { %v2378_v28 = vsel %vm2204_vm10, %v2317_v56, 0.0  ;;  %v2245_v36 = vadd.f32 %v2244_v48, %v2243_v46  ;;  %v2969_v4 = vadd.f32 %v2898_v15, %v4076_v13  ;;  %v2063_v20 = vpop.f32.mrb[11].mxu0 }
 0x231   : > { %v2379_v58 = vadd.f32 %v2378_v28, %v2377_v7  ;;  %v2347_v21 = vsel %vm2204_vm10, %v2316_v10, 0.0  ;;  %v2970_v12 = vadd.f32 %v2063_v20, %v4078_v55 }
 0x232   : > { %v2348_v22 = vadd.f32 %v2347_v21, %v2346_v9  ;;  %2216 = vst.msk [vmem:[%s4088_s23 + $0x58] sm:$0xff] %vm2204_vm10, %v2969_v4  ;;  %v2277_v63 = vsel %vm2204_vm10, %v2969_v4, 0.0  ;;  %v2319_v29 = vmul.f32 %v2969_v4, %v2969_v4 }
 0x233   : > { %v2278_v33 = vadd.f32 %v2277_v63, %v2276_v27  ;;  %2215 = vst.msk [vmem:[%s4088_s23 + $0x50] sm:$0xff] %vm2204_vm10, %v2970_v12  ;;  %v2246_v17 = vsel %vm2204_vm10, %v2970_v12, 0.0  ;;  %v2318_v13 = vmul.f32 %v2970_v12, %v2970_v12  ;;  %v2901_v23 = vpop.f32.mrb[12].mxu0 }
 0x234   : > { %v2380_v30 = vsel %vm2204_vm10, %v2319_v29, 0.0  ;;  %v2247_v32 = vadd.f32 %v2246_v17, %v2245_v36  ;;  %v2971_v55 = vadd.f32 %v2901_v23, %v4080_v5  ;;  %v2073_v40 = vpop.f32.mrb[13].mxu0 }
 0x235   : > { %v2381_v31 = vadd.f32 %v2380_v30, %v2379_v58  ;;  %v2349_v24 = vsel %vm2204_vm10, %v2318_v13, 0.0  ;;  %v2972_v41 = vadd.f32 %v2073_v40, %v4082_v62 }
 0x236   : > { %v2350_v44 = vadd.f32 %v2349_v24, %v2348_v22  ;;  %2218 = vst.msk [vmem:[%s4088_s23 + $0x68] sm:$0xff] %vm2204_vm10, %v2971_v55  ;;  %v2279_v18 = vsel %vm2204_vm10, %v2971_v55, 0.0  ;;  %v2321_v60 = vmul.f32 %v2971_v55, %v2971_v55 }
 0x237   : > { %v2280_v53 = vadd.f32 %v2279_v18, %v2278_v33  ;;  %2217 = vst.msk [vmem:[%s4088_s23 + $0x60] sm:$0xff] %vm2204_vm10, %v2972_v41  ;;  %v2248_v51 = vsel %vm2204_vm10, %v2972_v41, 0.0  ;;  %v2320_v5 = vmul.f32 %v2972_v41, %v2972_v41  ;;  %v2904_v57 = vpop.f32.mrb[14].mxu0 }
 0x238   : > { %v2382_v54 = vsel %vm2204_vm10, %v2321_v60, 0.0  ;;  %v2249_v61 = vadd.f32 %v2248_v51, %v2247_v32  ;;  %v2973_v62 = vadd.f32 %v2904_v57, %v4094_v14  ;;  %v2083_v34 = vpop.f32.mrb[15].mxu0 }
 0x239   : > { %v2383_v16 = vadd.f32 %v2382_v54, %v2381_v31  ;;  %v2351_v38 = vsel %vm2204_vm10, %v2320_v5, 0.0  ;;  %v2974_v25 = vadd.f32 %v2083_v34, %v4096_v11 }
 0x23a   : > { %v2352_v39 = vadd.f32 %v2351_v38, %v2350_v44  ;;  %2220 = vst.msk [vmem:[%s4088_s23 + $0x78] sm:$0xff] %vm2204_vm10, %v2973_v62  ;;  %v2281_v47 = vsel %vm2204_vm10, %v2973_v62, 0.0  ;;  %v2323_v26 = vmul.f32 %v2973_v62, %v2973_v62 }
 0x23b   : > { %v2282_v35 = vadd.f32 %v2281_v47, %v2280_v53  ;;  %2219 = vst.msk [vmem:[%s4088_s23 + $0x70] sm:$0xff] %vm2204_vm10, %v2974_v25  ;;  %v2250_v52 = vsel %vm2204_vm10, %v2974_v25, 0.0  ;;  %v2322_v0 = vmul.f32 %v2974_v25, %v2974_v25  ;;  %v2907_v1 = vpop.f32.mrb[16].mxu0 }
 0x23c   : > { %v2384_v14 = vsel %vm2204_vm10, %v2323_v26, 0.0  ;;  %v2251_v42 = vadd.f32 %v2250_v52, %v2249_v61  ;;  %v2093_v6 = vpop.f32.mrb[17].mxu0 }
 0x23d   : > { %v2385_v2 = vadd.f32 %v2384_v14, %v2383_v16  ;;  %v2353_v11 = vsel %vm2204_vm10, %v2322_v0, 0.0 }
 0x23e   : > { %v2354_v37 = vadd.f32 %v2353_v11, %v2352_v39 }
 0x23f   : > { %v2910_v45 = vpop.f32.mrb[18].mxu0 }
 0x240   : > { %v2103_v49 = vpop.f32.mrb[19].mxu0 }
 0x243   : > { %v2913_v50 = vpop.f32.mrb[20].mxu0 }
 0x244   : > { %v2113_v46 = vpop.f32.mrb[21].mxu0 }
 0x247   : > { %v2916_v19 = vpop.f32.mrb[22].mxu0 }
 0x248   : > { %v2123_v59 = vpop.f32.mrb[23].mxu0 }
 0x24f   : > { %v4166_v7 = vpop.f32.mrb[24].mxu0 }
 0x250   : > { %v4168_v43 = vpop.f32.mrb[25].mxu0 }
 0x257   : > { %v4170_v8 = vpop.f32.mrb[26].mxu0 }
 0x258   : > { %v4172_v9 = vpop.f32.mrb[27].mxu0 }
 0x25f   : > { %v4174_v3 = vpop.f32.mrb[28].mxu0 }
 0x260   : > { %v4176_v56 = vpop.f32.mrb[29].mxu0 }
 0x263   : > { %v2849_v27 = vpop.f32.mrb[16].mxu1 }
 0x264   : > { %v2975_v48 = vadd.f32 %v2907_v1, %v2849_v27  ;;  %v1830_v10 = vpop.f32.mrb[17].mxu1 }
 0x265   : > { %v2976_v15 = vadd.f32 %v2093_v6, %v1830_v10 }
 0x266   : > { %2222 = vst.msk [vmem:[%s4088_s23 + $0x88] sm:$0xff] %vm2204_vm10, %v2975_v48  ;;  %v2283_v28 = vsel %vm2204_vm10, %v2975_v48, 0.0  ;;  %v2325_v36 = vmul.f32 %v2975_v48, %v2975_v48 }
 0x267   : > { %v2284_v4 = vadd.f32 %v2283_v28, %v2282_v35  ;;  %2221 = vst.msk [vmem:[%s4088_s23 + $0x80] sm:$0xff] %vm2204_vm10, %v2976_v15  ;;  %v2252_v20 = vsel %vm2204_vm10, %v2976_v15, 0.0  ;;  %v2324_v58 = vmul.f32 %v2976_v15, %v2976_v15  ;;  %v2852_v21 = vpop.f32.mrb[18].mxu1 }
 0x268   : > { %v2386_v12 = vsel %vm2204_vm10, %v2325_v36, 0.0  ;;  %v2253_v22 = vadd.f32 %v2252_v20, %v2251_v42  ;;  %v2977_v63 = vadd.f32 %v2910_v45, %v2852_v21  ;;  %v1840_v29 = vpop.f32.mrb[19].mxu1 }
 0x269   : > { %v2387_v33 = vadd.f32 %v2386_v12, %v2385_v2  ;;  %v2355_v17 = vsel %vm2204_vm10, %v2324_v58, 0.0  ;;  %v2978_v13 = vadd.f32 %v2103_v49, %v1840_v29  ;;  %v4186_v23 = vpop.f32.mrb[30].mxu0 }
 0x26a   : > { %v2356_v30 = vadd.f32 %v2355_v17, %v2354_v37  ;;  %2224 = vst.msk [vmem:[%s4088_s23 + $0x98] sm:$0xff] %vm2204_vm10, %v2977_v63  ;;  %v2285_v32 = vsel %vm2204_vm10, %v2977_v63, 0.0  ;;  %v2327_v55 = vmul.f32 %v2977_v63, %v2977_v63  ;;  %v4191_v40 = vpop.f32.mrb[31].mxu0 }
 0x26b   : > { %v2286_v31 = vadd.f32 %v2285_v32, %v2284_v4  ;;  %2223 = vst.msk [vmem:[%s4088_s23 + $0x90] sm:$0xff] %vm2204_vm10, %v2978_v13  ;;  %v2254_v24 = vsel %vm2204_vm10, %v2978_v13, 0.0  ;;  %v2326_v41 = vmul.f32 %v2978_v13, %v2978_v13  ;;  %v2855_v44 = vpop.f32.mrb[20].mxu1 }
 0x26c   : > { %v2388_v18 = vsel %vm2204_vm10, %v2327_v55, 0.0  ;;  %v2255_v60 = vadd.f32 %v2254_v24, %v2253_v22  ;;  %v2979_v53 = vadd.f32 %v2913_v50, %v2855_v44  ;;  %v1850_v51 = vpop.f32.mrb[21].mxu1 }
 0x26d   : > { %v2389_v5 = vadd.f32 %v2388_v18, %v2387_v33  ;;  %v2357_v57 = vsel %vm2204_vm10, %v2326_v41, 0.0  ;;  %v2980_v54 = vadd.f32 %v2113_v46, %v1850_v51 }
 0x26e   : > { %v2358_v61 = vadd.f32 %v2357_v57, %v2356_v30  ;;  %2226 = vst.msk [vmem:[%s4088_s23 + $0xa8] sm:$0xff] %vm2204_vm10, %v2979_v53  ;;  %v2287_v62 = vsel %vm2204_vm10, %v2979_v53, 0.0  ;;  %v2329_v34 = vmul.f32 %v2979_v53, %v2979_v53 }
 0x26f   : > { %v2288_v16 = vadd.f32 %v2287_v62, %v2286_v31  ;;  %2225 = vst.msk [vmem:[%s4088_s23 + $0xa0] sm:$0xff] %vm2204_vm10, %v2980_v54  ;;  %v2256_v38 = vsel %vm2204_vm10, %v2980_v54, 0.0  ;;  %v2328_v25 = vmul.f32 %v2980_v54, %v2980_v54  ;;  %v2858_v39 = vpop.f32.mrb[22].mxu1 }
 0x270   : > { %v2390_v47 = vsel %vm2204_vm10, %v2329_v34, 0.0  ;;  %v2257_v26 = vadd.f32 %v2256_v38, %v2255_v60  ;;  %v2981_v35 = vadd.f32 %v2916_v19, %v2858_v39  ;;  %v1860_v52 = vpop.f32.mrb[23].mxu1 }
 0x271   : > { %v2391_v0 = vadd.f32 %v2390_v47, %v2389_v5  ;;  %v2359_v1 = vsel %vm2204_vm10, %v2328_v25, 0.0  ;;  %v2982_v14 = vadd.f32 %v2123_v59, %v1860_v52 }
 0x272   : > { %v2360_v42 = vadd.f32 %v2359_v1, %v2358_v61  ;;  %2228 = vst.msk [vmem:[%s4088_s23 + $0xb8] sm:$0xff] %vm2204_vm10, %v2981_v35  ;;  %v2289_v6 = vsel %vm2204_vm10, %v2981_v35, 0.0  ;;  %v2331_v2 = vmul.f32 %v2981_v35, %v2981_v35 }
 0x273   : > { %v2290_v11 = vadd.f32 %v2289_v6, %v2288_v16  ;;  %2227 = vst.msk [vmem:[%s4088_s23 + $0xb0] sm:$0xff] %vm2204_vm10, %v2982_v14  ;;  %v2258_v37 = vsel %vm2204_vm10, %v2982_v14, 0.0  ;;  %v2330_v45 = vmul.f32 %v2982_v14, %v2982_v14  ;;  %v2861_v49 = vpop.f32.mrb[24].mxu1 }
 0x274   : > { %v2392_v50 = vsel %vm2204_vm10, %v2331_v2, 0.0  ;;  %v2259_v46 = vadd.f32 %v2258_v37, %v2257_v26  ;;  %v2983_v19 = vadd.f32 %v4166_v7, %v2861_v49  ;;  %v1870_v59 = vpop.f32.mrb[25].mxu1 }
 0x275   : > { %v2393_v27 = vadd.f32 %v2392_v50, %v2391_v0  ;;  %v2361_v48 = vsel %vm2204_vm10, %v2330_v45, 0.0  ;;  %v2984_v10 = vadd.f32 %v4168_v43, %v1870_v59 }
 0x276   : > { %v2362_v15 = vadd.f32 %v2361_v48, %v2360_v42  ;;  %2230 = vst.msk [vmem:[%s4088_s23 + $0xc8] sm:$0xff] %vm2204_vm10, %v2983_v19  ;;  %v2291_v28 = vsel %vm2204_vm10, %v2983_v19, 0.0  ;;  %v2333_v36 = vmul.f32 %v2983_v19, %v2983_v19 }
 0x277   : > { %v2292_v4 = vadd.f32 %v2291_v28, %v2290_v11  ;;  %2229 = vst.msk [vmem:[%s4088_s23 + $0xc0] sm:$0xff] %vm2204_vm10, %v2984_v10  ;;  %v2260_v20 = vsel %vm2204_vm10, %v2984_v10, 0.0  ;;  %v2332_v7 = vmul.f32 %v2984_v10, %v2984_v10  ;;  %v2864_v58 = vpop.f32.mrb[26].mxu1 }
 0x278   : > { %v2394_v21 = vsel %vm2204_vm10, %v2333_v36, 0.0  ;;  %v2261_v12 = vadd.f32 %v2260_v20, %v2259_v46  ;;  %v2985_v43 = vadd.f32 %v4170_v8, %v2864_v58  ;;  %v1880_v22 = vpop.f32.mrb[27].mxu1 }
 0x279   : > { %v2395_v63 = vadd.f32 %v2394_v21, %v2393_v27  ;;  %v2363_v29 = vsel %vm2204_vm10, %v2332_v7, 0.0  ;;  %v2986_v33 = vadd.f32 %v4172_v9, %v1880_v22 }
 0x27a   : > { %v2364_v17 = vadd.f32 %v2363_v29, %v2362_v15  ;;  %2232 = vst.msk [vmem:[%s4088_s23 + $0xd8] sm:$0xff] %vm2204_vm10, %v2985_v43  ;;  %v2293_v13 = vsel %vm2204_vm10, %v2985_v43, 0.0  ;;  %v2335_v30 = vmul.f32 %v2985_v43, %v2985_v43 }
 0x27b   : > { %v2294_v32 = vadd.f32 %v2293_v13, %v2292_v4  ;;  %2231 = vst.msk [vmem:[%s4088_s23 + $0xd0] sm:$0xff] %vm2204_vm10, %v2986_v33  ;;  %v2262_v55 = vsel %vm2204_vm10, %v2986_v33, 0.0  ;;  %v2334_v8 = vmul.f32 %v2986_v33, %v2986_v33  ;;  %v2867_v31 = vpop.f32.mrb[28].mxu1 }
 0x27c   : > { %v2396_v24 = vsel %vm2204_vm10, %v2335_v30, 0.0  ;;  %v2263_v41 = vadd.f32 %v2262_v55, %v2261_v12  ;;  %v2987_v9 = vadd.f32 %v4174_v3, %v2867_v31  ;;  %v1890_v44 = vpop.f32.mrb[29].mxu1 }
 0x27d   : > { %v2397_v18 = vadd.f32 %v2396_v24, %v2395_v63  ;;  %v2365_v60 = vsel %vm2204_vm10, %v2334_v8, 0.0  ;;  %v2988_v53 = vadd.f32 %v4176_v56, %v1890_v44 }
 0x27e   : > { %v2366_v51 = vadd.f32 %v2365_v60, %v2364_v17  ;;  %2234 = vst.msk [vmem:[%s4088_s23 + $0xe8] sm:$0xff] %vm2204_vm10, %v2987_v9  ;;  %v2295_v5 = vsel %vm2204_vm10, %v2987_v9, 0.0  ;;  %v2337_v57 = vmul.f32 %v2987_v9, %v2987_v9 }
 0x27f   : > { %v2296_v54 = vadd.f32 %v2295_v5, %v2294_v32  ;;  %2233 = vst.msk [vmem:[%s4088_s23 + $0xe0] sm:$0xff] %vm2204_vm10, %v2988_v53  ;;  %v2264_v61 = vsel %vm2204_vm10, %v2988_v53, 0.0  ;;  %v2336_v3 = vmul.f32 %v2988_v53, %v2988_v53  ;;  %v2870_v62 = vpop.f32.mrb[30].mxu1 }
 0x280   : > { %v2398_v34 = vsel %vm2204_vm10, %v2337_v57, 0.0  ;;  %v2265_v16 = vadd.f32 %v2264_v61, %v2263_v41  ;;  %v2989_v56 = vadd.f32 %v4186_v23, %v2870_v62  ;;  %v1900_v38 = vpop.f32.mrb[31].mxu1 }
 0x281   : > { %v2399_v25 = vadd.f32 %v2398_v34, %v2397_v18  ;;  %v2367_v39 = vsel %vm2204_vm10, %v2336_v3, 0.0  ;;  %v2990_v47 = vadd.f32 %v4191_v40, %v1900_v38 }
 0x282   : > { %v2368_v26 = vadd.f32 %v2367_v39, %v2366_v51  ;;  %2236 = vst.msk [vmem:[%s4088_s23 + $0xf8] sm:$0xff] %vm2204_vm10, %v2989_v56  ;;  %v2297_v35 = vsel %vm2204_vm10, %v2989_v56, 0.0  ;;  %v2339_v52 = vmul.f32 %v2989_v56, %v2989_v56 }
 0x283   : > { %v2298_v0 = vadd.f32 %v2297_v35, %v2296_v54  ;;  %2235 = vst.msk [vmem:[%s4088_s23 + $0xf0] sm:$0xff] %vm2204_vm10, %v2990_v47  ;;  %v2266_v1 = vsel %vm2204_vm10, %v2990_v47, 0.0  ;;  %v2338_v14 = vmul.f32 %v2990_v47, %v2990_v47 }
 0x284   : > { %v2400_v23 = vsel %vm2204_vm10, %v2339_v52, 0.0  ;;  %v2267_v42 = vadd.f32 %v2266_v1, %v2265_v16 }
 0x285   : > { %v2300_v6 = vsel %vm2204_vm10, %v2298_v0, 0.0  ;;  %v2401_v2 = vadd.f32 %v2400_v23, %v2399_v25  ;;  %v2369_v40 = vsel %vm2204_vm10, %v2338_v14, 0.0 }
 0x286   : > { %v2299_v11 = vsel %vm2204_vm10, %v2267_v42, 0.0  ;;  %v2370_v37 = vadd.f32 %v2369_v40, %v2368_v26 }
 0x287   : > { %v2403_v45 = vsel %vm2204_vm10, %v2401_v2, 0.0  ;;  %v2301_v49 = vadd.f32 %v2300_v6, %v2299_v11 }
 0x288   : > { %v2402_v50 = vsel %vm2204_vm10, %v2370_v37, 0.0 }
 0x289   : > { %v2302_v46 = vrot.slane %v2301_v49, 4  ;;  %v2404_v19 = vadd.f32 %v2403_v45, %v2402_v50 }
 0x28b   : > { %v2303_v59 = vadd.f32 %v2302_v46, %v2301_v49  ;;  %v2405_v27 = vrot.slane %v2404_v19, 4 }
 0x28d   : > { %v2304_v48 = vrot.slane %v2303_v59, 2  ;;  %v2406_v10 = vadd.f32 %v2405_v27, %v2404_v19 }
 0x28f   : > { %v2305_v15 = vadd.f32 %v2304_v48, %v2303_v59  ;;  %v2407_v28 = vrot.slane %v2406_v10, 2 }
 0x291   : > { %v2306_v36 = vrot.slane %v2305_v15, 1  ;;  %v2408_v4 = vadd.f32 %v2407_v28, %v2406_v10 }
 0x293   : > { %v2409_v20 = vrot.slane %v2408_v4, 1  ;;  %v2307_v7 = vadd.f32 %v2306_v36, %v2305_v15 }
 0x295   : > { %v2410_v58 = vadd.f32 %v2409_v20, %v2408_v4 }
 0x297   : > { %v2412_v21 = vsel %vm2411_vm11, %v2307_v7, %v2410_v58 }
 0x298   : > { %2414 = vst.msk [vmem:[%s275_s26] sm:$0x3] %vm2413_vm12, %v2412_v21 }
 0x299 PF: > { %s16_s18 = sadd.s32 1, %s3042_s18  }
 0x29a   : > { %p13_p4 = scmp.ge.s32.totalorder %s16_s18, 4  }
 0x29c   :  { %15 = sbr.rel (!%p13_p4) target bundleno = 1 (0x1), region = 85 }

// kernel: upblock_attention_threefeature.6
= control target key start
LH: loop header
LB: loop body
LE: loop exit
PB: predicated region body
PF: predicated region fallthrough
CT: control target
= control target key end

     0   :  { %s2678_s18 = smov 0   ;;  %s3723_s0 = inlined_call_operand.vmem [shape: f32[2,16,16,8], index: 0, kind: input, shape index: {}]   ;;  %s3724_s1 = inlined_call_operand.vmem [shape: f32[1,8], index: 1, kind: input, shape index: {}]   ;;  %s3725_s2 = inlined_call_operand.vmem [shape: f32[1,8], index: 2, kind: input, shape index: {}]   ;;  %s3726_s3 = inlined_call_operand.vmem [shape: f32[3,24,8], index: 3, kind: input, shape index: {}]   ;;  %s3727_s4 = inlined_call_operand.vmem [shape: f32[2,16,16,8], index: 4, kind: output, shape index: {0}]   ;;  %s3728_s5 = inlined_call_operand.vmem [shape: f32[2,2,8], index: 5, kind: output, shape index: {1}]  }
   0x1 LB: > { %s2166_s19 = sadd.s32 4294967295, %s2643_s18   ;;  %p2170_p0 = scmp.ge.s32.totalorder %s2643_s18, 1  ;;  %s2643_s18 = sphi %s2678_s18, %s16_s18  }
   0x2   : > { %p190_p1 = scmp.lt.s32.totalorder %s2643_s18, 3 }
   0x4   : > { %p191_p2 = pnand %p2170_p0, %p190_p1 }
   0x5   : > { %vm378_vm0 = vcmask (!%p191_p2), 64512   ;;  %v2645_v0 = vmov (!%p191_p2), 0.0   ;;  %vm381_vm1 = vcmask (!%p191_p2), 58368   ;;  %p2724_p3 = scmp.lt.s32.totalorder (!%p191_p2), %s2166_s19, 1  ;;  %v521_v1 = vld [vmem:[%s3726_s3] sm:$0xff] (!%p191_p2)  ;;  %v522_v2 = vld [vmem:[%s3726_s3 + $0x8] sm:$0xff] (!%p191_p2) }
   0x6   : > { %194 = sbr.rel (%p191_p2) target bundleno = 557 (0x22d), region = 36  ;;  %379 = vst.msk [vmem:[#allocation2] sm:$0xff] (!%p191_p2), %vm378_vm0, %v2645_v0  ;;  %380 = vst.msk [vmem:[#allocation2 + $0x8] sm:$0xff] (!%p191_p2), %vm378_vm0, %v2645_v0  ;;  %v2758_v3 = vpack.c.bf16 (!%p191_p2), %v522_v2, %v521_v1  ;;  %v2764_v4 = vld [vmem:[%s3724_s1] ss:$0 sm:$0xff] (!%p191_p2)  ;;  %v523_v5 = vld [vmem:[%s3726_s3 + $0x10] sm:$0xff] (!%p191_p2) }
   0x7   : > { %383 = vst.msk [vmem:[#allocation2 + $0x18] sm:$0xff] (!%p191_p2), %vm378_vm0, %v2645_v0  ;;  %384 = vst.msk [vmem:[#allocation2 + $0x20] sm:$0xff] (!%p191_p2), %vm378_vm0, %v2645_v0  ;;  %v2780_v6 = vld [vmem:[%s3725_s2] ss:$0 sm:$0xff] (!%p191_p2)  ;;  %vm578_vm2 = vcmask (!%p191_p2), 1046528   ;;  %vm755_vm3 = vcmask (!%p191_p2), 1045504  }
   0x8   : > { %386 = vst.msk [vmem:[#allocation2 + $0x30] sm:$0xff] (!%p191_p2), %vm378_vm0, %v2645_v0  ;;  %387 = vst.msk [vmem:[#allocation2 + $0x38] sm:$0xff] (!%p191_p2), %vm378_vm0, %v2645_v0  ;;  %2550 = vmatprep.subr.bf16.mxu0 (!%p191_p2), %v2758_v3  ;;  %s2646_s10 = smov (!%p191_p2), 8   ;;  %s2647_s11 = smov (!%p191_p2), 16   ;;  %vm964_vm4 = vcmask (!%p191_p2), 130048   ;;  %vm1026_vm5 = vcmask (!%p191_p2), 195584  }
   0x9   : > { %389 = vst.msk [vmem:[#allocation2 + $0x48] sm:$0xff] (!%p191_p2), %vm378_vm0, %v2645_v0  ;;  %390 = vst.msk [vmem:[#allocation2 + $0x50] sm:$0xff] (!%p191_p2), %vm378_vm0, %v2645_v0  ;;  %2552 = vmatpush3.bf16.msra.mxu0 (!%p191_p2), %v2758_v3  ;;  %vm2077_vm6 = vcmask (!%p191_p2), 1040384  }
   0xa   : > { %392 = vst.msk [vmem:[#allocation2 + $0x60] sm:$0xff] (!%p191_p2), %vm378_vm0, %v2645_v0  ;;  %393 = vst.msk [vmem:[#allocation2 + $0x68] sm:$0xff] (!%p191_p2), %vm378_vm0, %v2645_v0  ;;  %2441 = vmatprep.subr.mxu0 (!%p191_p2), %v523_v5 }
   0xb   : > { %395 = vst.msk [vmem:[#allocation2 + $0x78] sm:$0xff] (!%p191_p2), %vm378_vm0, %v2645_v0  ;;  %396 = vst.msk [vmem:[#allocation2 + $0x80] sm:$0xff] (!%p191_p2), %vm378_vm0, %v2645_v0 }
   0xc   : > { %398 = vst.msk [vmem:[#allocation2 + $0x90] sm:$0xff] (!%p191_p2), %vm378_vm0, %v2645_v0  ;;  %399 = vst.msk [vmem:[#allocation2 + $0x98] sm:$0xff] (!%p191_p2), %vm378_vm0, %v2645_v0 }
   0xd   : > { %401 = vst.msk [vmem:[#allocation2 + $0xa8] sm:$0xff] %vm378_vm0, %v2645_v0  ;;  %402 = vst.msk [vmem:[#allocation2 + $0xb0] sm:$0xff] %vm378_vm0, %v2645_v0  ;;  %s3731_s19 = smov (!%p2724_p3, %s2166_s19), 1  ;;  %v2786_v10 = vld [vmem:[#allocation2] sm:$0xff]  ;;  %v2788_v11 = vld [vmem:[#allocation2 + $0x8] sm:$0xff]  ;;  %2442 = vmatpush3.msra.mxu0 %v523_v5 }
   0xe   : > { %404 = vst.msk [vmem:[#allocation2 + $0xc0] sm:$0xff] %vm378_vm0, %v2645_v0  ;;  %405 = vst.msk [vmem:[#allocation2 + $0xc8] sm:$0xff] %vm378_vm0, %v2645_v0  ;;  %s2276_s25 = sshll.u32 %s3731_s19, 8  ;;  %v579_v16 = vrot.slane %v2786_v10, 1  ;;  %v580_v17 = vrot.slane %v2788_v11, 1  ;;  %v756_v18 = vrot.slane %v2786_v10, 2 }
   0xf   : > { %407 = vst.msk [vmem:[#allocation2 + $0xd8] sm:$0xff] %vm378_vm0, %v2645_v0  ;;  %408 = vst.msk [vmem:[#allocation2 + $0xe0] sm:$0xff] %vm378_vm0, %v2645_v0  ;;  %s2775_s7 = scalar_lea.vmem %s3723_s0, %s2276_s25  ;;  %v757_v19 = vrot.slane %v2788_v11, 2  ;;  %s3545_s6 = scalar_lea.vmem %s3727_s4, %s2276_s25 }
  0x10   : > { %410 = vst.msk [vmem:[#allocation2 + $0xf0] sm:$0xff] %vm378_vm0, %v2645_v0  ;;  %411 = vst.msk [vmem:[#allocation2 + $0xf8] sm:$0xff] %vm378_vm0, %v2645_v0  ;;  %v236_v7 = vld [vmem:[%s2775_s7] sm:$0xff]  ;;  %v237_v8 = vld [vmem:[%s2775_s7 + $0x8] sm:$0xff]  ;;  %v581_v28 = vsel %vm578_vm2, %v579_v16, %v580_v17  ;;  %s2175_s25 = sshll.u32 %s3731_s19, 1 }
  0x11   : > { %413 = vst.msk [vmem:[#allocation2 + $0x108] sm:$0xff] %vm378_vm0, %v2645_v0  ;;  %414 = vst.msk [vmem:[#allocation2 + $0x110] sm:$0xff] %vm378_vm0, %v2645_v0  ;;  %v238_v9 = vld [vmem:[%s2775_s7 + $0x10] sm:$0xff]  ;;  %v275_v12 = vmul.f32 %v2764_v4, %v236_v7  ;;  %v276_v13 = vmul.f32 %v2764_v4, %v237_v8  ;;  %v239_v14 = vld [vmem:[%s2775_s7 + $0x18] sm:$0xff]  ;;  %v758_v29 = vsel %vm755_vm3, %v756_v18, %v757_v19  ;;  %659 = vrot.lane.b32.xlu0 %v581_v28, %s2646_s10  ;;  %s235_s9 = scalar_lea.vmem %s3728_s5, %s2175_s25 }
  0x12   : > { %416 = vst.msk [vmem:[#allocation2 + $0x120] sm:$0xff] %vm378_vm0, %v2645_v0  ;;  %417 = vst.msk [vmem:[#allocation2 + $0x128] sm:$0xff] %vm378_vm0, %v2645_v0  ;;  %v277_v15 = vmul.f32 %v2764_v4, %v238_v9  ;;  %v240_v25 = vld [vmem:[%s2775_s7 + $0x20] sm:$0xff]  ;;  %v241_v26 = vld [vmem:[%s2775_s7 + $0x28] sm:$0xff]  ;;  %v278_v30 = vmul.f32 %v2764_v4, %v239_v14 }
  0x13   : > { %419 = vst.msk [vmem:[#allocation2 + $0x138] sm:$0xff] %vm378_vm0, %v2645_v0  ;;  %420 = vst.msk [vmem:[#allocation2 + $0x140] sm:$0xff] %vm378_vm0, %v2645_v0  ;;  %v314_v23 = vadd.f32 %v2780_v6, %v275_v12  ;;  %v315_v24 = vadd.f32 %v2780_v6, %v276_v13  ;;  %v242_v27 = vld [vmem:[%s2775_s7 + $0x30] sm:$0xff]  ;;  %v243_v32 = vld [vmem:[%s2775_s7 + $0x38] sm:$0xff]  ;;  %v279_v42 = vmul.f32 %v2764_v4, %v240_v25 }
  0x14   : > { %422 = vst.msk [vmem:[#allocation2 + $0x150] sm:$0xff] %vm378_vm0, %v2645_v0  ;;  %423 = vst.msk [vmem:[#allocation2 + $0x158] sm:$0xff] %vm378_vm0, %v2645_v0  ;;  %v316_v31 = vadd.f32 %v2780_v6, %v277_v15  ;;  %v244_v33 = vld [vmem:[%s2775_s7 + $0x40] sm:$0xff]  ;;  %v245_v34 = vld [vmem:[%s2775_s7 + $0x48] sm:$0xff]  ;;  %v317_v40 = vadd.f32 %v2780_v6, %v278_v30  ;;  %v280_v43 = vmul.f32 %v2764_v4, %v241_v26 }
  0x15   : > { %425 = vst.msk [vmem:[#allocation2 + $0x168] sm:$0xff] %vm378_vm0, %v2645_v0  ;;  %426 = vst.msk [vmem:[#allocation2 + $0x170] sm:$0xff] %vm378_vm0, %v2645_v0  ;;  %v346_v37 = vmax.f32 %v314_v23, 0.0  ;;  %v347_v38 = vmax.f32 %v315_v24, 0.0  ;;  %v246_v39 = vld [vmem:[%s2775_s7 + $0x50] sm:$0xff]  ;;  %v281_v44 = vmul.f32 %v2764_v4, %v242_v27  ;;  %v282_v45 = vmul.f32 %v2764_v4, %v243_v32  ;;  %v247_v48 = vld [vmem:[%s2775_s7 + $0x58] sm:$0xff]  ;;  %836 = vrot.lane.b32.xlu0 %v758_v29, %s2647_s11 }
  0x16   : > { %428 = vst.msk [vmem:[#allocation2 + $0x180] sm:$0xff] %vm378_vm0, %v2645_v0  ;;  %429 = vst.msk [vmem:[#allocation2 + $0x188] sm:$0xff] %vm378_vm0, %v2645_v0  ;;  %v348_v41 = vmax.f32 %v316_v31, 0.0  ;;  %v283_v46 = vmul.f32 %v2764_v4, %v244_v33  ;;  %v284_v47 = vmul.f32 %v2764_v4, %v245_v34  ;;  %v349_v49 = vmax.f32 %v317_v40, 0.0  ;;  %v248_v57 = vld [vmem:[%s2775_s7 + $0x60] sm:$0xff]  ;;  %v249_v58 = vld [vmem:[%s2775_s7 + $0x68] sm:$0xff] }
  0x17   : > { %431 = vst.msk [vmem:[#allocation2 + $0x198] sm:$0xff] %vm378_vm0, %v2645_v0  ;;  %432 = vst.msk [vmem:[#allocation2 + $0x1a0] sm:$0xff] %vm378_vm0, %v2645_v0  ;;  %v318_v50 = vadd.f32 %v2780_v6, %v279_v42  ;;  %v319_v51 = vadd.f32 %v2780_v6, %v280_v43  ;;  %v285_v52 = vmul.f32 %v2764_v4, %v246_v39  ;;  %v250_v39 = vld [vmem:[%s2775_s7 + $0x70] sm:$0xff] }
  0x18   : > { %382 = vst.msk [vmem:[#allocation2 + $0x10] sm:$0x3] %vm381_vm1, %v2645_v0  ;;  %385 = vst.msk [vmem:[#allocation2 + $0x28] sm:$0x3] %vm381_vm1, %v2645_v0  ;;  %v320_v53 = vadd.f32 %v2780_v6, %v281_v44  ;;  %v321_v54 = vadd.f32 %v2780_v6, %v282_v45  ;;  %v322_v55 = vadd.f32 %v2780_v6, %v283_v46 }
  0x19   : > { %388 = vst.msk [vmem:[#allocation2 + $0x40] sm:$0x3] %vm381_vm1, %v2645_v0  ;;  %391 = vst.msk [vmem:[#allocation2 + $0x58] sm:$0x3] %vm381_vm1, %v2645_v0  ;;  %v323_v56 = vadd.f32 %v2780_v6, %v284_v47  ;;  %v350_v59 = vmax.f32 %v318_v50, 0.0  ;;  %v351_v60 = vmax.f32 %v319_v51, 0.0  ;;  %v286_v61 = vmul.f32 %v2764_v4, %v247_v48 }
  0x1a   : > { %394 = vst.msk [vmem:[#allocation2 + $0x70] sm:$0x3] %vm381_vm1, %v2645_v0  ;;  %397 = vst.msk [vmem:[#allocation2 + $0x88] sm:$0x3] %vm381_vm1, %v2645_v0  ;;  %v324_v62 = vadd.f32 %v2780_v6, %v285_v52  ;;  %v352_v63 = vmax.f32 %v320_v53, 0.0  ;;  %v354_v1 = vmax.f32 %v322_v55, 0.0  ;;  %v287_v8 = vmul.f32 %v2764_v4, %v248_v57 }
  0x1b   : > { %400 = vst.msk [vmem:[#allocation2 + $0xa0] sm:$0x3] %vm381_vm1, %v2645_v0  ;;  %403 = vst.msk [vmem:[#allocation2 + $0xb8] sm:$0x3] %vm381_vm1, %v2645_v0  ;;  %v355_v2 = vmax.f32 %v323_v56, 0.0  ;;  %v325_v5 = vadd.f32 %v2780_v6, %v286_v61  ;;  %v288_v9 = vmul.f32 %v2764_v4, %v249_v58  ;;  %v289_v46 = vmul.f32 %v2764_v4, %v250_v39  ;;  %v253_v53 = vld [vmem:[%s2775_s7 + $0x88] sm:$0xff] }
  0x1c   : > { %406 = vst.msk [vmem:[#allocation2 + $0xd0] sm:$0x3] %vm381_vm1, %v2645_v0  ;;  %409 = vst.msk [vmem:[#allocation2 + $0xe8] sm:$0x3] %vm381_vm1, %v2645_v0  ;;  %v356_v7 = vmax.f32 %v324_v62, 0.0  ;;  %v326_v16 = vadd.f32 %v2780_v6, %v287_v8  ;;  %v254_v62 = vld [vmem:[%s2775_s7 + $0x90] sm:$0xff] }
  0x1d   : > { %412 = vst.msk [vmem:[#allocation2 + $0x100] sm:$0x3] %vm381_vm1, %v2645_v0  ;;  %415 = vst.msk [vmem:[#allocation2 + $0x118] sm:$0x3] %vm381_vm1, %v2645_v0  ;;  %v357_v15 = vmax.f32 %v325_v5, 0.0  ;;  %v292_v5 = vmul.f32 %v2764_v4, %v253_v53  ;;  %v260_v39 = vld [vmem:[%s2775_s7 + $0xc0] sm:$0xff] }
  0x1e   : > { %418 = vst.msk [vmem:[#allocation2 + $0x130] sm:$0x3] %vm381_vm1, %v2645_v0  ;;  %421 = vst.msk [vmem:[#allocation2 + $0x148] sm:$0x3] %vm381_vm1, %v2645_v0  ;;  %v358_v28 = vmax.f32 %v326_v16, 0.0 }
  0x1f   : > { %424 = vst.msk [vmem:[#allocation2 + $0x160] sm:$0x3] %vm381_vm1, %v2645_v0  ;;  %427 = vst.msk [vmem:[#allocation2 + $0x178] sm:$0x3] %vm381_vm1, %v2645_v0  ;;  %v469_v20 = vld [vmem:[#allocation2 + $0x10] sm:$0x3] }
  0x20   : > { %430 = vst.msk [vmem:[#allocation2 + $0x190] sm:$0x3] %vm381_vm1, %v2645_v0  ;;  %433 = vst.msk [vmem:[#allocation2 + $0x1a8] sm:$0x3] %vm381_vm1, %v2645_v0  ;;  %v582_v21 = vrot.slane %v469_v20, 1  ;;  %v759_v22 = vrot.slane %v469_v20, 2 }
  0x21   : > { %435 = vst.msk [vmem:[#allocation2 + $0x19] sm:$0xff] %vm378_vm0, %v346_v37  ;;  %436 = vst.msk [vmem:[#allocation2 + $0x21] sm:$0xff] %vm378_vm0, %v347_v38  ;;  %v353_v0 = vmax.f32 %v321_v54, 0.0 }
  0x22   : > { %v583_v35 = vsel %vm578_vm2, %v580_v17, %v582_v21  ;;  %v760_v36 = vsel %vm755_vm3, %v757_v19, %v759_v22  ;;  %437 = vst.msk [vmem:[#allocation2 + $0x31] sm:$0xff] %vm378_vm0, %v348_v41  ;;  %438 = vst.msk [vmem:[#allocation2 + $0x39] sm:$0xff] %vm378_vm0, %v349_v49  ;;  %v327_v17 = vadd.f32 %v2780_v6, %v288_v9  ;;  %v251_v41 = vld [vmem:[%s2775_s7 + $0x78] sm:$0xff]  ;;  %v252_v49 = vld [vmem:[%s2775_s7 + $0x80] sm:$0xff] }
  0x23   : > { %661 = vrot.lane.b32.xlu1 %v583_v35, %s2646_s10  ;;  %439 = vst.msk [vmem:[#allocation2 + $0x49] sm:$0xff] %vm378_vm0, %v350_v59  ;;  %440 = vst.msk [vmem:[#allocation2 + $0x51] sm:$0xff] %vm378_vm0, %v351_v60  ;;  %838 = vrot.lane.b32.xlu0 %v760_v36, %s2647_s11  ;;  %v290_v48 = vmul.f32 %v2764_v4, %v251_v41  ;;  %v328_v60 = vadd.f32 %v2780_v6, %v289_v46 }
  0x24   : > { %441 = vst.msk [vmem:[#allocation2 + $0x61] sm:$0xff] %vm378_vm0, %v352_v63  ;;  %442 = vst.msk [vmem:[#allocation2 + $0x69] sm:$0xff] %vm378_vm0, %v353_v0  ;;  %v359_v29 = vmax.f32 %v327_v17, 0.0  ;;  %v291_v61 = vmul.f32 %v2764_v4, %v252_v49  ;;  %v255_v17 = vld [vmem:[%s2775_s7 + $0x98] sm:$0xff]  ;;  %v262_v49 = vld [vmem:[%s2775_s7 + $0xd0] sm:$0xff] }
  0x25   : > { %443 = vst.msk [vmem:[#allocation2 + $0x79] sm:$0xff] %vm378_vm0, %v354_v1  ;;  %444 = vst.msk [vmem:[#allocation2 + $0x81] sm:$0xff] %vm378_vm0, %v355_v2  ;;  %v329_v2 = vadd.f32 %v2780_v6, %v290_v48 }
  0x26   : > { %445 = vst.msk [vmem:[#allocation2 + $0x91] sm:$0xff] %vm378_vm0, %v356_v7  ;;  %446 = vst.msk [vmem:[#allocation2 + $0x99] sm:$0xff] %vm378_vm0, %v357_v15 }
  0x27   : > { %447 = vst.msk [vmem:[#allocation2 + $0xa9] sm:$0xff] %vm378_vm0, %v358_v28  ;;  %448 = vst.msk [vmem:[#allocation2 + $0xb1] sm:$0xff] %vm378_vm0, %v359_v29  ;;  %v330_v28 = vadd.f32 %v2780_v6, %v291_v61  ;;  %v331_v29 = vadd.f32 %v2780_v6, %v292_v5 }
  0x28   : > { %v2849_v12 = vld [vmem:[#allocation2 + $0x20] sm:$0xff]  ;;  %v472_v13 = vld [vmem:[#allocation2 + $0x28] sm:$0x3]  ;;  %v2851_v14 = vld [vmem:[#allocation2 + $0x18] sm:$0xff] }
  0x29   : > { %v585_v18 = vrot.slane %v2849_v12, 1  ;;  %v587_v19 = vrot.slane %v472_v13, 1  ;;  %v584_v20 = vrot.slane %v2851_v14, 1  ;;  %v761_v21 = vrot.slane %v2851_v14, 2  ;;  %v2859_v22 = vld [vmem:[#allocation2 + $0x30] sm:$0xff]  ;;  %v2866_v27 = vld [vmem:[#allocation2 + $0x38] sm:$0xff] }
  0x2a   : > { %v762_v23 = vrot.slane %v2849_v12, 2  ;;  %v589_v24 = vrot.slane %v2859_v22, 1  ;;  %v764_v30 = vrot.slane %v472_v13, 2  ;;  %v590_v31 = vrot.slane %v2866_v27, 1  ;;  %v475_v36 = vld [vmem:[#allocation2 + $0x40] sm:$0x3] }
  0x2b   : > { %v588_v25 = vsel %vm578_vm2, %v585_v18, %v587_v19  ;;  %v586_v26 = vsel %vm578_vm2, %v584_v20, %v585_v18  ;;  %v766_v33 = vrot.slane %v2859_v22, 2  ;;  %v767_v34 = vrot.slane %v2866_v27, 2  ;;  %v2877_v37 = vld [vmem:[#allocation2 + $0x48] sm:$0xff]  ;;  %v2879_v38 = vld [vmem:[#allocation2 + $0x50] sm:$0xff]  ;;  %v478_v47 = vld [vmem:[#allocation2 + $0x58] sm:$0x3] }
  0x2c   : > { %665 = vrot.lane.b32.xlu1 %v588_v25, %s2646_s10  ;;  %663 = vrot.lane.b32.xlu0 %v586_v26, %s2646_s10  ;;  %v763_v32 = vsel %vm755_vm3, %v761_v21, %v762_v23  ;;  %v591_v35 = vsel %vm578_vm2, %v589_v24, %v590_v31  ;;  %v765_v40 = vsel %vm755_vm3, %v762_v23, %v764_v30  ;;  %v592_v42 = vrot.slane %v475_v36, 1  ;;  %v2894_v51 = vld [vmem:[#allocation2 + $0x60] sm:$0xff]  ;;  %v2896_v52 = vld [vmem:[#allocation2 + $0x68] sm:$0xff]  ;;  %v2908_v1 = vld [vmem:[#allocation2 + $0x70] sm:$0x3] }
  0x2d   : > { %v768_v43 = vsel %vm755_vm3, %v766_v33, %v767_v34  ;;  %v594_v44 = vrot.slane %v2877_v37, 1  ;;  %v595_v45 = vrot.slane %v2879_v38, 1  ;;  %v769_v50 = vrot.slane %v475_v36, 2  ;;  %v2918_v15 = vld [vmem:[#allocation2 + $0x78] sm:$0xff]  ;;  %v2920_v16 = vld [vmem:[#allocation2 + $0x80] sm:$0xff]  ;;  %v257_v30 = vld [vmem:[%s2775_s7 + $0xa8] sm:$0xff] }
  0x2e   : > { %v593_v54 = vsel %vm578_vm2, %v590_v31, %v592_v42  ;;  %v771_v56 = vrot.slane %v2877_v37, 2  ;;  %v772_v57 = vrot.slane %v2879_v38, 2  ;;  %v597_v58 = vrot.slane %v478_v47, 1  ;;  %v256_v24 = vld [vmem:[%s2775_s7 + $0xa0] sm:$0xff]  ;;  %v258_v31 = vld [vmem:[%s2775_s7 + $0xb0] sm:$0xff] }
  0x2f   : > { %v596_v55 = vsel %vm578_vm2, %v594_v44, %v595_v45  ;;  %v774_v59 = vrot.slane %v478_v47, 2  ;;  %v599_v63 = vrot.slane %v2894_v51, 1  ;;  %v600_v0 = vrot.slane %v2896_v52, 1 }
  0x30   : > { %840 = vrot.lane.b32.xlu1 %v763_v32, %s2647_s11  ;;  %667 = vrot.lane.b32.xlu0 %v591_v35, %s2646_s10  ;;  %v776_v7 = vrot.slane %v2894_v51, 2  ;;  %v777_v8 = vrot.slane %v2896_v52, 2  ;;  %v770_v9 = vsel %vm755_vm3, %v767_v34, %v769_v50  ;;  %v773_v13 = vsel %vm755_vm3, %v771_v56, %v772_v57  ;;  %v259_v32 = vld [vmem:[%s2775_s7 + $0xb8] sm:$0xff] }
  0x31   : > { %v293_v18 = vmul.f32 %v2764_v4, %v254_v62  ;;  %v598_v19 = vsel %vm578_vm2, %v595_v45, %v597_v58  ;;  %v775_v20 = vsel %vm755_vm3, %v772_v57, %v774_v59  ;;  %v602_v21 = vrot.slane %v2908_v1, 1  ;;  %v263_v56 = vld [vmem:[%s2775_s7 + $0xd8] sm:$0xff] }
  0x32   : > { %v360_v23 = vmax.f32 %v328_v60, 0.0  ;;  %v601_v25 = vsel %vm578_vm2, %v599_v63, %v600_v0  ;;  %v361_v26 = vmax.f32 %v329_v2, 0.0  ;;  %v778_v33 = vsel %vm755_vm3, %v776_v7, %v777_v8 }
  0x33   : > { %v604_v34 = vrot.slane %v2918_v15, 1  ;;  %v605_v35 = vrot.slane %v2920_v16, 1  ;;  %v294_v36 = vmul.f32 %v2764_v4, %v255_v17  ;;  %v362_v41 = vmax.f32 %v330_v28, 0.0 }
  0x34   : > { %842 = vrot.lane.b32.xlu1 %v765_v40, %s2647_s11  ;;  %844 = vrot.lane.b32.xlu0 %v768_v43, %s2647_s11  ;;  %449 = vst.msk [vmem:[#allocation2 + $0xc1] sm:$0xff] %vm378_vm0, %v360_v23  ;;  %v261_v40 = vld [vmem:[%s2775_s7 + $0xc8] sm:$0xff]  ;;  %450 = vst.msk [vmem:[#allocation2 + $0xc9] sm:$0xff] %vm378_vm0, %v361_v26  ;;  %v363_v42 = vmax.f32 %v331_v29, 0.0  ;;  %v332_v43 = vadd.f32 %v2780_v6, %v293_v18  ;;  %v295_v44 = vmul.f32 %v2764_v4, %v256_v24 }
  0x35   : > { %v333_v45 = vadd.f32 %v2780_v6, %v294_v36  ;;  %v296_v46 = vmul.f32 %v2764_v4, %v257_v30  ;;  %v297_v47 = vmul.f32 %v2764_v4, %v258_v31  ;;  %v298_v48 = vmul.f32 %v2764_v4, %v259_v32  ;;  %451 = vst.msk [vmem:[#allocation2 + $0xd9] sm:$0xff] %vm378_vm0, %v362_v41  ;;  %v484_v26 = vld [vmem:[#allocation2 + $0x88] sm:$0x3]  ;;  %v2996_v30 = vld [vmem:[#allocation2 + $0x90] sm:$0xff]  ;;  %v525_v32 = vld [vmem:[%s3726_s3 + $0x20] sm:$0xff] }
  0x36   : > { %452 = vst.msk [vmem:[#allocation2 + $0xe1] sm:$0xff] %vm378_vm0, %v363_v42  ;;  %v364_v50 = vmax.f32 %v332_v43, 0.0  ;;  %v334_v53 = vadd.f32 %v2780_v6, %v295_v44  ;;  %v301_v2 = vmul.f32 %v2764_v4, %v262_v49  ;;  %v779_v23 = vrot.slane %v2908_v1, 2  ;;  %v524_v1 = vld [vmem:[%s3726_s3 + $0x18] sm:$0xff]  ;;  %v264_v42 = vld [vmem:[%s2775_s7 + $0xe0] sm:$0xff]  ;;  %v265_v44 = vld [vmem:[%s2775_s7 + $0xe8] sm:$0xff] }
  0x37   : > { %v365_v57 = vmax.f32 %v333_v45, 0.0  ;;  %v335_v58 = vadd.f32 %v2780_v6, %v296_v46  ;;  %v336_v59 = vadd.f32 %v2780_v6, %v297_v47  ;;  %v337_v60 = vadd.f32 %v2780_v6, %v298_v48  ;;  %v487_v47 = vld [vmem:[#allocation2 + $0xa0] sm:$0x3] }
  0x38   : > { %669 = vrot.lane.b32.xlu1 %v593_v54, %s2646_s10  ;;  %671 = vrot.lane.b32.xlu0 %v596_v55, %s2646_s10  ;;  %v299_v54 = vmul.f32 %v2764_v4, %v260_v39  ;;  %v300_v55 = vmul.f32 %v2764_v4, %v261_v40  ;;  %453 = vst.msk [vmem:[#allocation2 + $0xf1] sm:$0xff] %vm378_vm0, %v364_v50  ;;  %v366_v61 = vmax.f32 %v334_v53, 0.0  ;;  %v781_v28 = vrot.slane %v2918_v15, 2  ;;  %v3026_v50 = vld [vmem:[#allocation2 + $0xa8] sm:$0xff]  ;;  %v3028_v53 = vld [vmem:[#allocation2 + $0xb0] sm:$0xff] }
  0x39   : > { %454 = vst.msk [vmem:[#allocation2 + $0xf9] sm:$0xff] %vm378_vm0, %v365_v57  ;;  %v367_v5 = vmax.f32 %v335_v58, 0.0  ;;  %v368_v7 = vmax.f32 %v336_v59, 0.0  ;;  %v782_v29 = vrot.slane %v2920_v16, 2  ;;  %v609_v39 = vrot.slane %v2996_v30, 1 }
  0x3a   : > { %v338_v62 = vadd.f32 %v2780_v6, %v299_v54  ;;  %v339_v63 = vadd.f32 %v2780_v6, %v300_v55  ;;  %455 = vst.msk [vmem:[#allocation2 + $0x109] sm:$0xff] %vm378_vm0, %v366_v61  ;;  %v2545_v41 = vpack.c.bf16 %v525_v32, %v524_v1  ;;  %v784_v43 = vrot.slane %v484_v26, 2 }
  0x3b   : > { %456 = vst.msk [vmem:[#allocation2 + $0x111] sm:$0xff] %vm378_vm0, %v367_v5  ;;  %457 = vst.msk [vmem:[#allocation2 + $0x121] sm:$0xff] %vm378_vm0, %v368_v7  ;;  %v783_v36 = vsel %vm755_vm3, %v781_v28, %v782_v29  ;;  %v786_v48 = vrot.slane %v2996_v30, 2  ;;  %v303_v54 = vmul.f32 %v2764_v4, %v264_v42  ;;  %v304_v55 = vmul.f32 %v2764_v4, %v265_v44  ;;  %v266_v5 = vld [vmem:[%s2775_s7 + $0xf0] sm:$0xff]  ;;  %v267_v7 = vld [vmem:[%s2775_s7 + $0xf8] sm:$0xff] }
  0x3c   : > { %846 = vrot.lane.b32.xlu1 %v770_v9, %s2647_s11  ;;  %848 = vrot.lane.b32.xlu0 %v773_v13, %s2647_s11  ;;  %v369_v9 = vmax.f32 %v337_v60, 0.0  ;;  %v302_v13 = vmul.f32 %v2764_v4, %v263_v56  ;;  %v370_v17 = vmax.f32 %v338_v62, 0.0  ;;  %v371_v18 = vmax.f32 %v339_v63, 0.0  ;;  %v528_v28 = vld [vmem:[%s3726_s3 + $0x38] sm:$0xff] }
  0x3d   : > { %2546 = vmatprep.subr.bf16.mxu1 %v2545_v41  ;;  %v785_v56 = vsel %vm755_vm3, %v782_v29, %v784_v43  ;;  %v614_v58 = vrot.slane %v3026_v50, 1  ;;  %v615_v59 = vrot.slane %v3028_v53, 1  ;;  %v342_v60 = vadd.f32 %v2780_v6, %v303_v54  ;;  %v3082_v44 = vld [vmem:[#allocation2 + $0xd8] sm:$0xff] }
  0x3e   : > { %458 = vst.msk [vmem:[#allocation2 + $0x129] sm:$0xff] %vm378_vm0, %v369_v9  ;;  %v341_v24 = vadd.f32 %v2780_v6, %v302_v13  ;;  %459 = vst.msk [vmem:[#allocation2 + $0x139] sm:$0xff] %vm378_vm0, %v370_v17  ;;  %2548 = vmatpush3.bf16.msra.mxu1 %v2545_v41  ;;  %v343_v61 = vadd.f32 %v2780_v6, %v304_v55  ;;  %v789_v62 = vrot.slane %v487_v47, 2  ;;  %v791_v63 = vrot.slane %v3026_v50, 2  ;;  %v490_v17 = vld [vmem:[#allocation2 + $0xb8] sm:$0x3] }
  0x3f   : > { %460 = vst.msk [vmem:[#allocation2 + $0x141] sm:$0xff] %vm378_vm0, %v371_v18  ;;  %v616_v13 = vsel %vm578_vm2, %v614_v58, %v615_v59  ;;  %v3049_v18 = vld [vmem:[#allocation2 + $0xc0] sm:$0xff]  ;;  %v617_v1 = vrot.slane %v490_v17, 1 }
  0x40   : > { %673 = vrot.lane.b32.xlu1 %v598_v19, %s2646_s10  ;;  %675 = vrot.lane.b32.xlu0 %v601_v25, %s2646_s10  ;;  %v340_v19 = vadd.f32 %v2780_v6, %v301_v2  ;;  %v603_v25 = vsel %vm578_vm2, %v600_v0, %v602_v21  ;;  %v2998_v0 = vld [vmem:[#allocation2 + $0x98] sm:$0xff]  ;;  %v373_v31 = vmax.f32 %v341_v24, 0.0  ;;  %v792_v2 = vrot.slane %v3028_v53, 2 }
  0x41   : > { %v610_v40 = vrot.slane %v2998_v0, 1  ;;  %v787_v49 = vrot.slane %v2998_v0, 2  ;;  %v375_v24 = vmax.f32 %v343_v61, 0.0  ;;  %v618_v41 = vsel %vm578_vm2, %v615_v59, %v617_v1  ;;  %v496_v59 = vld [vmem:[#allocation2 + $0xe8] sm:$0x3]  ;;  %v3100_v61 = vld [vmem:[#allocation2 + $0xf8] sm:$0xff] }
  0x42   : > { %v372_v21 = vmax.f32 %v340_v19, 0.0  ;;  %462 = vst.msk [vmem:[#allocation2 + $0x159] sm:$0xff] %vm378_vm0, %v373_v31  ;;  %v3051_v19 = vld [vmem:[#allocation2 + $0xc8] sm:$0xff] }
  0x43   : > { %v611_v46 = vsel %vm578_vm2, %v609_v39, %v610_v40  ;;  %v788_v57 = vsel %vm755_vm3, %v786_v48, %v787_v49  ;;  %v790_v29 = vsel %vm755_vm3, %v787_v49, %v789_v62  ;;  %v620_v31 = vrot.slane %v3051_v19, 1  ;;  %464 = vst.msk [vmem:[#allocation2 + $0x171] sm:$0xff] %vm378_vm0, %v375_v24 }
  0x44   : > { %850 = vrot.lane.b32.xlu1 %v775_v20, %s2647_s11  ;;  %852 = vrot.lane.b32.xlu0 %v778_v33, %s2647_s11  ;;  %v606_v20 = vsel %vm578_vm2, %v604_v34, %v605_v35  ;;  %v780_v33 = vsel %vm755_vm3, %v777_v8, %v779_v23  ;;  %v607_v34 = vrot.slane %v484_v26, 1  ;;  %461 = vst.msk [vmem:[#allocation2 + $0x151] sm:$0xff] %vm378_vm0, %v372_v21  ;;  %v526_v8 = vld [vmem:[%s3726_s3 + $0x28] sm:$0xff]  ;;  %v374_v23 = vmax.f32 %v342_v60, 0.0  ;;  %v527_v26 = vld [vmem:[%s3726_s3 + $0x30] sm:$0xff] }
  0x45   : > { %2387 = vmatprep.subr.mxu1 %v526_v8  ;;  %v793_v21 = vsel %vm755_vm3, %v791_v63, %v792_v2  ;;  %v797_v43 = vrot.slane %v3051_v19, 2  ;;  %v624_v49 = vrot.slane %v3082_v44, 1  ;;  %v3098_v60 = vld [vmem:[#allocation2 + $0xf0] sm:$0xff]  ;;  %v627_v63 = vrot.slane %v496_v59, 1 }
  0x46   : > { %v608_v45 = vsel %vm578_vm2, %v605_v35, %v607_v34  ;;  %v612_v35 = vrot.slane %v487_v47, 1  ;;  %2388 = vmatpush3.msra.mxu1 %v526_v8  ;;  %463 = vst.msk [vmem:[#allocation2 + $0x169] sm:$0xff] %vm378_vm0, %v374_v23  ;;  %v3071_v34 = vpack.c.bf16 %v528_v28, %v527_v26  ;;  %v796_v8 = vrot.slane %v3049_v18, 2  ;;  %v499_v23 = vld [vmem:[#allocation2 + $0x100] sm:$0x3]  ;;  %v3116_v26 = vld [vmem:[#allocation2 + $0x110] sm:$0xff] }
  0x47   : > { %2557 = vmatprep.subr.bf16.mxu1 %v2758_v3  ;;  %v806_v24 = vrot.slane %v3098_v60, 2  ;;  %v632_v28 = vrot.slane %v499_v23, 1 }
  0x48   : > { %677 = vrot.lane.b32.xlu1 %v603_v25, %s2646_s10  ;;  %679 = vrot.lane.b32.xlu0 %v606_v20, %s2646_s10  ;;  %v613_v9 = vsel %vm578_vm2, %v610_v40, %v612_v35  ;;  %v305_v25 = vmul.f32 %v2764_v4, %v266_v5  ;;  %v306_v20 = vmul.f32 %v2764_v4, %v267_v7  ;;  %v619_v4 = vrot.slane %v3049_v18, 1 }
  0x49   : > { %v794_v40 = vrot.slane %v490_v17, 2  ;;  %2554 = vmatprep.subr.bf16.mxu0 %v3071_v34  ;;  %v798_v48 = vsel %vm755_vm3, %v796_v8, %v797_v43  ;;  %v629_v5 = vrot.slane %v3098_v60, 1  ;;  %v630_v7 = vrot.slane %v3100_v61, 1 }
  0x4a   : > { %v344_v32 = vadd.f32 %v2780_v6, %v305_v25  ;;  %v621_v42 = vsel %vm578_vm2, %v619_v4, %v620_v31  ;;  %v807_v25 = vrot.slane %v3100_v61, 2  ;;  %v635_v4 = vrot.slane %v3116_v26, 1 }
  0x4b   : > { %v631_v17 = vsel %vm578_vm2, %v629_v5, %v630_v7 }
  0x4c   : > { %854 = vrot.lane.b32.xlu1 %v780_v33, %s2647_s11  ;;  %856 = vrot.lane.b32.xlu0 %v783_v36, %s2647_s11  ;;  %v345_v33 = vadd.f32 %v2780_v6, %v306_v20  ;;  %v376_v36 = vmax.f32 %v344_v32, 0.0  ;;  %v493_v6 = vld [vmem:[#allocation2 + $0xd0] sm:$0x3]  ;;  %v3114_v20 = vld [vmem:[#allocation2 + $0x108] sm:$0xff]  ;;  %v808_v1 = vsel %vm755_vm3, %v806_v24, %v807_v25  ;;  %v809_v32 = vrot.slane %v499_v23, 2 }
  0x4d   : > { %v622_v47 = vrot.slane %v493_v6, 1  ;;  %v799_v55 = vrot.slane %v493_v6, 2 }
  0x4e   : > { %v377_v39 = vmax.f32 %v345_v33, 0.0  ;;  %465 = vst.msk [vmem:[#allocation2 + $0x181] sm:$0xff] %vm378_vm0, %v376_v36  ;;  %v502_v36 = vld [vmem:[#allocation2 + $0x118] sm:$0x3] }
  0x4f   : > { %v623_v35 = vsel %vm578_vm2, %v620_v31, %v622_v47  ;;  %v800_v62 = vsel %vm755_vm3, %v797_v43, %v799_v55  ;;  %v633_v31 = vsel %vm578_vm2, %v630_v7, %v632_v28  ;;  %v637_v8 = vrot.slane %v502_v36, 1  ;;  %v505_v55 = vld [vmem:[#allocation2 + $0x130] sm:$0x3]  ;;  %v3164_v28 = vld [vmem:[#allocation2 + $0x158] sm:$0xff] }
  0x50   : > { %681 = vrot.lane.b32.xlu1 %v608_v45, %s2646_s10  ;;  %683 = vrot.lane.b32.xlu0 %v611_v46, %s2646_s10  ;;  %466 = vst.msk [vmem:[#allocation2 + $0x189] sm:$0xff] %vm378_vm0, %v377_v39  ;;  %v3084_v45 = vld [vmem:[#allocation2 + $0xe0] sm:$0xff]  ;;  %v795_v46 = vsel %vm755_vm3, %v792_v2, %v794_v40  ;;  %v811_v39 = vrot.slane %v3114_v20, 2  ;;  %v812_v40 = vrot.slane %v3116_v26, 2  ;;  %v810_v43 = vsel %vm755_vm3, %v807_v25, %v809_v32  ;;  %v3162_v25 = vld [vmem:[#allocation2 + $0x150] sm:$0xff] }
  0x51   : > { %v625_v54 = vrot.slane %v3084_v45, 1  ;;  %v802_v58 = vrot.slane %v3084_v45, 2 }
  0x52   : > { %v813_v6 = vsel %vm755_vm3, %v811_v39, %v812_v40  ;;  %v511_v39 = vld [vmem:[#allocation2 + $0x160] sm:$0x3] }
  0x54   : > { %858 = vrot.lane.b32.xlu1 %v785_v56, %s2647_s11  ;;  %860 = vrot.lane.b32.xlu0 %v788_v57, %s2647_s11  ;;  %v626_v56 = vsel %vm578_vm2, %v624_v49, %v625_v54  ;;  %v801_v57 = vrot.slane %v3082_v44, 2  ;;  %v638_v49 = vsel %vm578_vm2, %v635_v4, %v637_v8  ;;  %v827_v8 = vrot.slane %v3164_v28, 2 }
  0x56   : > { %v803_v2 = vsel %vm755_vm3, %v801_v57, %v802_v58  ;;  %v3146_v57 = vld [vmem:[#allocation2 + $0x138] sm:$0xff] }
  0x57   : > { %v821_v23 = vrot.slane %v3146_v57, 2 }
  0x58   : > { %685 = vrot.lane.b32.xlu1 %v613_v9, %s2646_s10  ;;  %687 = vrot.lane.b32.xlu0 %v616_v13, %s2646_s10  ;;  %v804_v9 = vrot.slane %v496_v59, 2  ;;  %v628_v13 = vsel %vm578_vm2, %v625_v54, %v627_v63  ;;  %v642_v59 = vrot.slane %v505_v55, 1 }
  0x5c   : > { %862 = vrot.lane.b32.xlu1 %v790_v29, %s2647_s11  ;;  %864 = vrot.lane.b32.xlu0 %v793_v21, %s2647_s11  ;;  %v805_v29 = vsel %vm755_vm3, %v802_v58, %v804_v9  ;;  %v634_v21 = vrot.slane %v3114_v20, 1  ;;  %v3148_v58 = vld [vmem:[#allocation2 + $0x140] sm:$0xff]  ;;  %v819_v9 = vrot.slane %v505_v55, 2 }
  0x5d   : > { %v645_v5 = vrot.slane %v3148_v58, 1  ;;  %v822_v24 = vrot.slane %v3148_v58, 2 }
  0x5e   : > { %v636_v33 = vsel %vm578_vm2, %v634_v21, %v635_v4  ;;  %v649_v4 = vrot.slane %v3162_v25, 1 }
  0x5f   : > { %v823_v21 = vsel %vm755_vm3, %v821_v23, %v822_v24 }
  0x60   : > { %689 = vrot.lane.b32.xlu1 %v618_v41, %s2646_s10  ;;  %691 = vrot.lane.b32.xlu0 %v621_v42, %s2646_s10  ;;  %v3130_v41 = vld [vmem:[#allocation2 + $0x120] sm:$0xff]  ;;  %v3132_v42 = vld [vmem:[#allocation2 + $0x128] sm:$0xff] }
  0x61   : > { %v640_v47 = vrot.slane %v3132_v42, 1 }
  0x63   : > { %v643_v7 = vsel %vm578_vm2, %v640_v47, %v642_v59  ;;  %v829_v59 = vrot.slane %v511_v39, 2 }
  0x64   : > { %866 = vrot.lane.b32.xlu1 %v795_v46, %s2647_s11  ;;  %868 = vrot.lane.b32.xlu0 %v798_v48, %s2647_s11  ;;  %v639_v46 = vrot.slane %v3130_v41, 1  ;;  %v814_v48 = vrot.slane %v502_v36, 2 }
  0x66   : > { %v641_v54 = vsel %vm578_vm2, %v639_v46, %v640_v47  ;;  %v652_v46 = vrot.slane %v511_v39, 1 }
  0x68   : > { %693 = vrot.lane.b32.xlu1 %v623_v35, %s2646_s10  ;;  %695 = vrot.lane.b32.xlu0 %v626_v56, %s2646_s10  ;;  %v816_v35 = vrot.slane %v3130_v41, 2  ;;  %v817_v56 = vrot.slane %v3132_v42, 2 }
  0x6a   : > { %v818_v63 = vsel %vm755_vm3, %v816_v35, %v817_v56 }
  0x6c   : > { %870 = vrot.lane.b32.xlu1 %v800_v62, %s2647_s11  ;;  %872 = vrot.lane.b32.xlu0 %v803_v2, %s2647_s11  ;;  %v815_v62 = vsel %vm755_vm3, %v812_v40, %v814_v48  ;;  %v644_v2 = vrot.slane %v3146_v57, 1  ;;  %v826_v40 = vrot.slane %v3162_v25, 2 }
  0x70   : > { %697 = vrot.lane.b32.xlu1 %v628_v13, %s2646_s10  ;;  %699 = vrot.lane.b32.xlu0 %v631_v17, %s2646_s10  ;;  %v646_v13 = vsel %vm578_vm2, %v644_v2, %v645_v5  ;;  %v508_v17 = vld [vmem:[#allocation2 + $0x148] sm:$0x3] }
  0x71   : > { %v824_v32 = vrot.slane %v508_v17, 2 }
  0x73   : > { %v825_v48 = vsel %vm755_vm3, %v822_v24, %v824_v32  ;;  %v830_v24 = vsel %vm755_vm3, %v827_v8, %v829_v59 }
  0x74   : > { %874 = vrot.lane.b32.xlu1 %v805_v29, %s2647_s11  ;;  %876 = vrot.lane.b32.xlu0 %v808_v1, %s2647_s11  ;;  %v647_v29 = vrot.slane %v508_v17, 1  ;;  %v820_v1 = vsel %vm755_vm3, %v817_v56, %v819_v9  ;;  %v3199_v17 = vld [vmem:[#allocation2 + $0x188] sm:$0xff] }
  0x78   : > { %701 = vrot.lane.b32.xlu1 %v633_v31, %s2646_s10  ;;  %703 = vrot.lane.b32.xlu0 %v636_v33, %s2646_s10  ;;  %v650_v31 = vrot.slane %v3164_v28, 1  ;;  %v648_v33 = vsel %vm578_vm2, %v645_v5, %v647_v29 }
  0x7a   : > { %v651_v36 = vsel %vm578_vm2, %v649_v4, %v650_v31 }
  0x7c   : > { %878 = vrot.lane.b32.xlu1 %v810_v43, %s2647_s11  ;;  %880 = vrot.lane.b32.xlu0 %v813_v6, %s2647_s11  ;;  %v3178_v43 = vld [vmem:[#allocation2 + $0x168] sm:$0xff]  ;;  %v3180_v6 = vld [vmem:[#allocation2 + $0x170] sm:$0xff] }
  0x7d   : > { %v655_v55 = vrot.slane %v3180_v6, 1  ;;  %v831_v5 = vrot.slane %v3178_v43, 2 }
  0x80   : > { %705 = vrot.lane.b32.xlu1 %v638_v49, %s2646_s10  ;;  %707 = vrot.lane.b32.xlu0 %v641_v54, %s2646_s10  ;;  %v828_v49 = vsel %vm755_vm3, %v826_v40, %v827_v8  ;;  %v654_v54 = vrot.slane %v3178_v43, 1 }
  0x82   : > { %v656_v2 = vsel %vm578_vm2, %v654_v54, %v655_v55  ;;  %v3226_v54 = vld [vmem:[#allocation2 + $0x198] sm:$0xff] }
  0x83   : > { %v660_v47 = vpop.permute.xlu0 %659 }
  0x84   : > { %882 = vrot.lane.b32.xlu1 %v815_v62, %s2647_s11  ;;  %884 = vrot.lane.b32.xlu0 %v818_v63, %s2647_s11  ;;  %v932_v35 = vsel %vm378_vm0, %v2786_v10, %v660_v47  ;;  %v653_v63 = vsel %vm578_vm2, %v650_v31, %v652_v46  ;;  %v514_v10 = vld [vmem:[#allocation2 + $0x178] sm:$0x3]  ;;  %v1001_v31 = vrot.slane %v3199_v17, 1  ;;  %v517_v46 = vld [vmem:[#allocation2 + $0x190] sm:$0x3] }
  0x87   : > { %v837_v62 = vpop.permute.xlu0 %836 }
  0x88   : > { %709 = vrot.lane.b32.xlu1 %v643_v7, %s2646_s10  ;;  %711 = vrot.lane.b32.xlu0 %v646_v13, %s2646_s10  ;;  %v832_v7 = vrot.slane %v3180_v6, 2  ;;  %v965_v9 = vsel %vm964_vm4, %v932_v35, %v837_v62  ;;  %v3197_v13 = vld [vmem:[#allocation2 + $0x180] sm:$0xff]  ;;  %v1003_v35 = vrot.slane %v517_v46, 1 }
  0x89   : > { %2443 = vmatprep.mubr.msk.f32.mxu0 %vm1026_vm5, %v965_v9  ;;  %v1000_v4 = vrot.slane %v3197_v13, 1  ;;  %v1011_v47 = vrot.slane %v3197_v13, 2  ;;  %v1014_v9 = vrot.slane %v517_v46, 2 }
  0x8b   : > { %v1002_v39 = vsel %vm578_vm2, %v1000_v4, %v1001_v31 }
  0x8c   : > { %886 = vrot.lane.b32.xlu1 %v820_v1, %s2647_s11  ;;  %888 = vrot.lane.b32.xlu0 %v823_v21, %s2647_s11  ;;  %v657_v1 = vrot.slane %v514_v10, 1  ;;  %v833_v21 = vsel %vm755_vm3, %v831_v5, %v832_v7 }
  0x90   : > { %713 = vrot.lane.b32.xlu1 %v648_v33, %s2646_s10  ;;  %715 = vrot.lane.b32.xlu0 %v651_v36, %s2646_s10  ;;  %v658_v33 = vsel %vm578_vm2, %v655_v55, %v657_v1  ;;  %v834_v36 = vrot.slane %v514_v10, 2  ;;  %v3228_v55 = vld [vmem:[#allocation2 + $0x1a0] sm:$0xff] }
  0x91   : > { %v1594_v4 = vrot.slane %v3228_v55, 2 }
  0x94   : > { %890 = vrot.lane.b32.xlu1 %v825_v48, %s2647_s11  ;;  %892 = vrot.lane.b32.xlu0 %v828_v49, %s2647_s11  ;;  %v1012_v48 = vrot.slane %v3199_v17, 2 }
  0x95   : > { %v662_v56 = vpop.permute.xlu1 %661  ;;  %v839_v29 = vpop.permute.xlu0 %838 }
  0x96   : > { %v933_v23 = vsel %vm378_vm0, %v2788_v11, %v662_v56  ;;  %v529_v11 = vld [vmem:[%s3726_s3 + $0x40] sm:$0xff]  ;;  %v1013_v62 = vsel %vm755_vm3, %v1011_v47, %v1012_v48 }
  0x97   : > { %v966_v32 = vsel %vm964_vm4, %v933_v23, %v839_v29  ;;  %v1593_v29 = vrot.slane %v3226_v54, 2 }
  0x98   : > { %717 = vrot.lane.b32.xlu1 %v653_v63, %s2646_s10  ;;  %719 = vrot.lane.b32.xlu0 %v656_v2, %s2646_s10  ;;  %v1582_v2 = vrot.slane %v3226_v54, 1 }
  0x99   : > { %2444 = vmatmul.mubr.msk.f32.vlgmr.msra.gmra.mrb[0].mxu0 %vm1026_vm5, %v966_v32 }
  0x9a   : > { %2556 = vmatpush3.bf16.msra.mxu0 %v3071_v34  ;;  %v835_v34 = vsel %vm755_vm3, %v832_v7, %v834_v36  ;;  %v1004_v7 = vsel %vm578_vm2, %v1001_v31, %v1003_v35  ;;  %v520_v31 = vld [vmem:[#allocation2 + $0x1a8] sm:$0x3]  ;;  %v1595_v36 = vsel %vm755_vm3, %v1593_v29, %v1594_v4 }
  0x9b   : > { %2495 = vmatprep.subr.mxu0 %v529_v11 }
  0x9c   : > { %894 = vrot.lane.b32.xlu1 %v830_v24, %s2647_s11  ;;  %896 = vrot.lane.b32.xlu0 %v833_v21, %s2647_s11 }
  0x9e   : > { %v666_v40 = vpop.permute.xlu1 %665  ;;  %v664_v8 = vpop.permute.xlu0 %663  ;;  %2496 = vmatpush3.msra.mxu0 %v529_v11 }
  0x9f   : > { %v934_v49 = vsel %vm378_vm0, %v2851_v14, %v664_v8  ;;  %v1583_v14 = vrot.slane %v3228_v55, 1  ;;  %v935_v10 = vsel %vm378_vm0, %v2849_v12, %v666_v40  ;;  %v1015_v12 = vsel %vm755_vm3, %v1012_v48, %v1014_v9  ;;  %v2636_v40 = vld [vmem:[%s3726_s3 + $0x10] sm:$0xff] }
  0xa0   : > { %721 = vrot.lane.b32.xlu1 %v658_v33, %s2646_s10  ;;  %1005 = vrot.lane.b32.xlu0 %v1002_v39, %s2646_s10  ;;  %v1585_v33 = vrot.slane %v520_v31, 1 }
  0xa2   : > { %v841_v56 = vpop.permute.xlu1 %840  ;;  %v668_v59 = vpop.permute.xlu0 %667 }
  0xa3   : > { %v967_v63 = vsel %vm964_vm4, %v934_v49, %v841_v56  ;;  %v936_v5 = vsel %vm378_vm0, %v2859_v22, %v668_v59  ;;  %v1584_v22 = vsel %vm578_vm2, %v1582_v2, %v1583_v14  ;;  %v1596_v49 = vrot.slane %v520_v31, 2 }
  0xa4   : > { %898 = vrot.lane.b32.xlu1 %v835_v34, %s2647_s11  ;;  %2389 = vmatprep.mubr.msk.f32.mxu1 %vm1026_vm5, %v967_v63 }
  0xa5   : > { %2446 = vmatprep.mubr.msk.f32.mxu0 %vm1026_vm5, %v967_v63  ;;  %1016 = vrot.lane.b32.xlu0 %v1013_v62, %s2647_s11  ;;  %v1597_v35 = vsel %vm755_vm3, %v1594_v4, %v1596_v49 }
  0xa6   : > { %v843_v23 = vpop.permute.xlu1 %842  ;;  %v845_v24 = vpop.permute.xlu0 %844 }
  0xa7   : > { %v968_v1 = vsel %vm964_vm4, %v935_v10, %v843_v23  ;;  %v3247_v21 = vsel %vm964_vm4, %v936_v5, %v845_v24 }
  0xa8   : > { %1007 = vrot.lane.b32.xlu1 %v1004_v7, %s2646_s10  ;;  %2390 = vmatmul.mubr.msk.f32.vlgmr.msra.gmra.mrb[0].mxu1 %vm1026_vm5, %v968_v1 }
  0xa9   : > { %2447 = vmatmul.mubr.msk.f32.gmra.mrb[2].mxu0 %vm1026_vm5, %v968_v1  ;;  %2392 = vmatprep.mubr.msk.f32.mxu1 %vm1026_vm5, %v3247_v21 }
  0xaa   : > { %v670_v32 = vpop.permute.xlu1 %669  ;;  %2449 = vmatprep.mubr.msk.f32.mxu0 %vm1026_vm5, %v3247_v21  ;;  %v672_v11 = vpop.permute.xlu0 %671  ;;  %1587 = vrot.lane.b32.xlu0 %v1584_v22, %s2646_s10 }
  0xab   : > { %2559 = vmatpush3.bf16.msra.mxu1 %v2758_v3  ;;  %v938_v39 = vsel %vm378_vm0, %v2877_v37, %v672_v11  ;;  %v937_v8 = vsel %vm378_vm0, %v2866_v27, %v670_v32  ;;  %v1586_v37 = vsel %vm578_vm2, %v1583_v14, %v1585_v33 }
  0xac   : > { %1018 = vrot.lane.b32.xlu1 %v1015_v12, %s2647_s11  ;;  %2558 = vmatprep.subr.mxu1 %v2636_v40 }
  0xae   : > { %v847_v46 = vpop.permute.xlu1 %846  ;;  %v849_v47 = vpop.permute.xlu0 %848  ;;  %1598 = vrot.lane.b32.xlu0 %v1595_v36, %s2647_s11 }
  0xaf   : > { %v3272_v48 = vsel %vm964_vm4, %v937_v8, %v847_v46  ;;  %v3275_v3 = vsel %vm964_vm4, %v938_v39, %v849_v47  ;;  %2560 = vmatpush3.msra.mxu1 %v2636_v40 }
  0xb0   : > { %2393 = vmatmul.mubr.msk.f32.gmra.mrb[2].mxu1 %vm1026_vm5, %v3272_v48  ;;  %2450 = vmatmul.mubr.msk.f32.gmra.mrb[4].mxu0 %vm1026_vm5, %v3272_v48 }
  0xb1   : > { %2395 = vmatprep.mubr.msk.f32.mxu1 %vm1026_vm5, %v3275_v3  ;;  %2452 = vmatprep.mubr.msk.f32.mxu0 %vm1026_vm5, %v3275_v3 }
  0xb2   : > { %v674_v27 = vpop.permute.xlu1 %673  ;;  %v676_v34 = vpop.permute.xlu0 %675  ;;  %1589 = vrot.lane.b32.xlu1 %v1586_v37, %s2646_s10 }
  0xb3   : > { %v940_v56 = vsel %vm378_vm0, %v2894_v51, %v676_v34  ;;  %v939_v59 = vsel %vm378_vm0, %v2879_v38, %v674_v27 }
  0xb6   : > { %v851_v62 = vpop.permute.xlu1 %850  ;;  %v853_v63 = vpop.permute.xlu0 %852  ;;  %1600 = vrot.lane.b32.xlu1 %v1597_v35, %s2647_s11 }
  0xb7   : > { %v3294_v2 = vsel %vm964_vm4, %v939_v59, %v851_v62  ;;  %v3297_v14 = vsel %vm964_vm4, %v940_v56, %v853_v63 }
  0xb8   : > { %2396 = vmatmul.mubr.msk.f32.gmra.mrb[4].mxu1 %vm1026_vm5, %v3294_v2  ;;  %2453 = vmatmul.mubr.msk.f32.gmra.mrb[6].mxu0 %vm1026_vm5, %v3294_v2 }
  0xb9   : > { %2398 = vmatprep.mubr.msk.f32.mxu1 %vm1026_vm5, %v3297_v14  ;;  %2455 = vmatprep.mubr.msk.f32.mxu0 %vm1026_vm5, %v3297_v14 }
  0xba   : > { %v678_v38 = vpop.permute.xlu1 %677  ;;  %v680_v51 = vpop.permute.xlu0 %679 }
  0xbb   : > { %v942_v5 = vsel %vm378_vm0, %v2918_v15, %v680_v51  ;;  %v941_v7 = vsel %vm378_vm0, %v2896_v52, %v678_v38 }
  0xbe   : > { %v855_v9 = vpop.permute.xlu1 %854  ;;  %v857_v10 = vpop.permute.xlu0 %856 }
  0xbf   : > { %v974_v23 = vsel %vm964_vm4, %v941_v7, %v855_v9  ;;  %v975_v24 = vsel %vm964_vm4, %v942_v5, %v857_v10 }
  0xc0   : > { %2399 = vmatmul.mubr.msk.f32.gmra.mrb[6].mxu1 %vm1026_vm5, %v974_v23  ;;  %2456 = vmatmul.mubr.msk.f32.gmra.mrb[8].mxu0 %vm1026_vm5, %v974_v23 }
  0xc1   : > { %2401 = vmatprep.mubr.msk.f32.mxu1 %vm1026_vm5, %v975_v24  ;;  %2458 = vmatprep.mubr.msk.f32.mxu0 %vm1026_vm5, %v975_v24 }
  0xc2   : > { %v682_v29 = vpop.permute.xlu1 %681  ;;  %v684_v1 = vpop.permute.xlu0 %683 }
  0xc3   : > { %v944_v15 = vsel %vm378_vm0, %v2996_v30, %v684_v1  ;;  %v943_v52 = vsel %vm378_vm0, %v2920_v16, %v682_v29 }
  0xc6   : > { %v859_v22 = vpop.permute.xlu1 %858  ;;  %v861_v4 = vpop.permute.xlu0 %860 }
  0xc7   : > { %v976_v31 = vsel %vm964_vm4, %v943_v52, %v859_v22  ;;  %v977_v12 = vsel %vm964_vm4, %v944_v15, %v861_v4 }
  0xc8   : > { %2402 = vmatmul.mubr.msk.f32.gmra.mrb[8].mxu1 %vm1026_vm5, %v976_v31  ;;  %2459 = vmatmul.mubr.msk.f32.gmra.mrb[10].mxu0 %vm1026_vm5, %v976_v31 }
  0xc9   : > { %2404 = vmatprep.mubr.msk.f32.mxu1 %vm1026_vm5, %v977_v12  ;;  %2461 = vmatprep.mubr.msk.f32.mxu0 %vm1026_vm5, %v977_v12 }
  0xca   : > { %v686_v32 = vpop.permute.xlu1 %685  ;;  %v688_v11 = vpop.permute.xlu0 %687 }
  0xcb   : > { %v946_v30 = vsel %vm378_vm0, %v3026_v50, %v688_v11  ;;  %v945_v16 = vsel %vm378_vm0, %v2998_v0, %v686_v32 }
  0xce   : > { %v863_v33 = vpop.permute.xlu1 %862  ;;  %v865_v36 = vpop.permute.xlu0 %864 }
  0xcf   : > { %v978_v39 = vsel %vm964_vm4, %v945_v16, %v863_v33  ;;  %v979_v40 = vsel %vm964_vm4, %v946_v30, %v865_v36 }
  0xd0   : > { %2405 = vmatmul.mubr.msk.f32.gmra.mrb[10].mxu1 %vm1026_vm5, %v978_v39  ;;  %2462 = vmatmul.mubr.msk.f32.gmra.mrb[12].mxu0 %vm1026_vm5, %v978_v39 }
  0xd1   : > { %2407 = vmatprep.mubr.msk.f32.mxu1 %vm1026_vm5, %v979_v40  ;;  %2464 = vmatprep.mubr.msk.f32.mxu0 %vm1026_vm5, %v979_v40 }
  0xd2   : > { %v690_v8 = vpop.permute.xlu1 %689  ;;  %v692_v46 = vpop.permute.xlu0 %691 }
  0xd3   : > { %v948_v50 = vsel %vm378_vm0, %v3049_v18, %v692_v46  ;;  %v947_v0 = vsel %vm378_vm0, %v3028_v53, %v690_v8 }
  0xd6   : > { %v867_v47 = vpop.permute.xlu1 %866  ;;  %v869_v37 = vpop.permute.xlu0 %868 }
  0xd7   : > { %v980_v49 = vsel %vm964_vm4, %v947_v0, %v867_v47  ;;  %v3343_v27 = vsel %vm964_vm4, %v948_v50, %v869_v37 }
  0xd8   : > { %2408 = vmatmul.mubr.msk.f32.gmra.mrb[12].mxu1 %vm1026_vm5, %v980_v49  ;;  %2465 = vmatmul.mubr.msk.f32.gmra.mrb[14].mxu0 %vm1026_vm5, %v980_v49 }
  0xd9   : > { %2497 = vmatprep.mubr.msk.f32.mxu0 %vm1026_vm5, %v3247_v21  ;;  %2410 = vmatprep.mubr.msk.f32.mxu1 %vm1026_vm5, %v3343_v27 }
  0xda   : > { %v694_v18 = vpop.permute.xlu1 %693  ;;  %v696_v34 = vpop.permute.xlu0 %695 }
  0xdb   : > { %v950_v53 = vsel %vm378_vm0, %v3082_v44, %v696_v34  ;;  %v949_v35 = vsel %vm378_vm0, %v3051_v19, %v694_v18 }
  0xdc   : > { %2498 = vmatmul.mubr.msk.f32.vlgmr.msra.gmra.mrb[0].mxu0 %vm1026_vm5, %v3272_v48 }
  0xdd   : > { %2500 = vmatprep.mubr.msk.f32.mxu0 %vm1026_vm5, %v3275_v3 }
  0xde   : > { %v871_v56 = vpop.permute.xlu1 %870  ;;  %v873_v59 = vpop.permute.xlu0 %872 }
  0xdf   : > { %v3360_v21 = vsel %vm964_vm4, %v949_v35, %v871_v56  ;;  %v3363_v62 = vsel %vm964_vm4, %v950_v53, %v873_v59 }
  0xe0   : > { %2411 = vmatmul.mubr.msk.f32.gmra.mrb[14].mxu1 %vm1026_vm5, %v3360_v21  ;;  %2501 = vmatmul.mubr.msk.f32.gmra.mrb[2].mxu0 %vm1026_vm5, %v3294_v2 }
  0xe1   : > { %2503 = vmatprep.mubr.msk.f32.mxu0 %vm1026_vm5, %v3297_v14  ;;  %2413 = vmatprep.mubr.msk.f32.mxu1 %vm1026_vm5, %v3363_v62 }
  0xe2   : > { %v698_v19 = vpop.permute.xlu1 %697  ;;  %v700_v44 = vpop.permute.xlu0 %699 }
  0xe3   : > { %v952_v48 = vsel %vm378_vm0, %v3098_v60, %v700_v44  ;;  %v951_v3 = vsel %vm378_vm0, %v3084_v45, %v698_v19 }
  0xe4   : > { %2504 = vmatmul.mubr.msk.f32.gmra.mrb[4].mxu0 %vm1026_vm5, %v974_v23 }
  0xe5   : > { %2506 = vmatprep.mubr.msk.f32.mxu0 %vm1026_vm5, %v975_v24 }
  0xe6   : > { %v875_v63 = vpop.permute.xlu1 %874  ;;  %v877_v2 = vpop.permute.xlu0 %876 }
  0xe7   : > { %v3380_v38 = vsel %vm964_vm4, %v951_v3, %v875_v63  ;;  %v3383_v14 = vsel %vm964_vm4, %v952_v48, %v877_v2 }
  0xe8   : > { %2414 = vmatmul.mubr.msk.f32.gmra.mrb[16].mxu1 %vm1026_vm5, %v3380_v38  ;;  %2507 = vmatmul.mubr.msk.f32.gmra.mrb[6].mxu0 %vm1026_vm5, %v976_v31 }
  0xe9   : > { %2509 = vmatprep.mubr.msk.f32.mxu0 %vm1026_vm5, %v977_v12  ;;  %2416 = vmatprep.mubr.msk.f32.mxu1 %vm1026_vm5, %v3383_v14 }
  0xea   : > { %v702_v60 = vpop.permute.xlu1 %701  ;;  %v704_v45 = vpop.permute.xlu0 %703 }
  0xeb   : > { %v954_v51 = vsel %vm378_vm0, %v3114_v20, %v704_v45  ;;  %v953_v5 = vsel %vm378_vm0, %v3100_v61, %v702_v60 }
  0xec   : > { %2510 = vmatmul.mubr.msk.f32.gmra.mrb[8].mxu0 %vm1026_vm5, %v978_v39 }
  0xed   : > { %2512 = vmatprep.mubr.msk.f32.mxu0 %vm1026_vm5, %v979_v40 }
  0xee   : > { %v879_v7 = vpop.permute.xlu1 %878  ;;  %v881_v9 = vpop.permute.xlu0 %880 }
  0xef   : > { %v3398_v10 = vsel %vm964_vm4, %v953_v5, %v879_v7  ;;  %v3401_v23 = vsel %vm964_vm4, %v954_v51, %v881_v9 }
  0xf0   : > { %2417 = vmatmul.mubr.msk.f32.gmra.mrb[18].mxu1 %vm1026_vm5, %v3398_v10  ;;  %2513 = vmatmul.mubr.msk.f32.gmra.mrb[10].mxu0 %vm1026_vm5, %v980_v49 }
  0xf1   : > { %2515 = vmatprep.mubr.msk.f32.mxu0 %vm1026_vm5, %v3343_v27  ;;  %2419 = vmatprep.mubr.msk.f32.mxu1 %vm1026_vm5, %v3401_v23 }
  0xf2   : > { %v706_v61 = vpop.permute.xlu1 %705  ;;  %v708_v20 = vpop.permute.xlu0 %707 }
  0xf3   : > { %v956_v24 = vsel %vm378_vm0, %v3130_v41, %v708_v20  ;;  %v955_v29 = vsel %vm378_vm0, %v3116_v26, %v706_v61 }
  0xf4   : > { %2516 = vmatmul.mubr.msk.f32.gmra.mrb[12].mxu0 %vm1026_vm5, %v3360_v21 }
  0xf5   : > { %2518 = vmatprep.mubr.msk.f32.mxu0 %vm1026_vm5, %v3363_v62 }
  0xf6   : > { %v883_v1 = vpop.permute.xlu1 %882  ;;  %v885_v15 = vpop.permute.xlu0 %884 }
  0xf7   : > { %v3419_v52 = vsel %vm964_vm4, %v955_v29, %v883_v1  ;;  %v3422_v22 = vsel %vm964_vm4, %v956_v24, %v885_v15 }
  0xf8   : > { %2420 = vmatmul.mubr.msk.f32.gmra.mrb[20].mxu1 %vm1026_vm5, %v3419_v52  ;;  %2519 = vmatmul.mubr.msk.f32.gmra.mrb[14].mxu0 %vm1026_vm5, %v3380_v38 }
  0xf9   : > { %2521 = vmatprep.mubr.msk.f32.mxu0 %vm1026_vm5, %v3383_v14  ;;  %2422 = vmatprep.mubr.msk.f32.mxu1 %vm1026_vm5, %v3422_v22 }
  0xfa   : > { %v710_v26 = vpop.permute.xlu1 %709  ;;  %v712_v41 = vpop.permute.xlu0 %711 }
  0xfb   : > { %v958_v4 = vsel %vm378_vm0, %v3146_v57, %v712_v41  ;;  %v957_v31 = vsel %vm378_vm0, %v3132_v42, %v710_v26 }
  0xfc   : > { %2522 = vmatmul.mubr.msk.f32.gmra.mrb[16].mxu0 %vm1026_vm5, %v3398_v10 }
  0xfd   : > { %2524 = vmatprep.mubr.msk.f32.mxu0 %vm1026_vm5, %v3401_v23 }
  0xfe   : > { %v887_v12 = vpop.permute.xlu1 %886  ;;  %v889_v32 = vpop.permute.xlu0 %888 }
  0xff   : > { %v3441_v11 = vsel %vm964_vm4, %v957_v31, %v887_v12  ;;  %v3444_v30 = vsel %vm964_vm4, %v958_v4, %v889_v32 }
 0x100   : > { %2423 = vmatmul.mubr.msk.f32.gmra.mrb[22].mxu1 %vm1026_vm5, %v3441_v11  ;;  %2525 = vmatmul.mubr.msk.f32.gmra.mrb[18].mxu0 %vm1026_vm5, %v3419_v52 }
 0x101   : > { %2527 = vmatprep.mubr.msk.f32.mxu0 %vm1026_vm5, %v3422_v22  ;;  %2425 = vmatprep.mubr.msk.f32.mxu1 %vm1026_vm5, %v3444_v30 }
 0x102   : > { %v714_v42 = vpop.permute.xlu1 %713  ;;  %v716_v57 = vpop.permute.xlu0 %715 }
 0x103   : > { %v960_v16 = vsel %vm378_vm0, %v3162_v25, %v716_v57  ;;  %v959_v33 = vsel %vm378_vm0, %v3148_v58, %v714_v42 }
 0x104   : > { %2528 = vmatmul.mubr.msk.f32.gmra.mrb[20].mxu0 %vm1026_vm5, %v3441_v11 }
 0x105   : > { %2530 = vmatprep.mubr.msk.f32.mxu0 %vm1026_vm5, %v3444_v30 }
 0x106   : > { %v891_v36 = vpop.permute.xlu1 %890  ;;  %v893_v39 = vpop.permute.xlu0 %892 }
 0x107   : > { %v992_v40 = vsel %vm964_vm4, %v959_v33, %v891_v36  ;;  %v993_v8 = vsel %vm964_vm4, %v960_v16, %v893_v39 }
 0x108   : > { %2426 = vmatmul.mubr.msk.f32.gmra.mrb[24].mxu1 %vm1026_vm5, %v992_v40  ;;  %2531 = vmatmul.mubr.msk.f32.gmra.mrb[22].mxu0 %vm1026_vm5, %v992_v40 }
 0x109   : > { %2428 = vmatprep.mubr.msk.f32.mxu1 %vm1026_vm5, %v993_v8  ;;  %2533 = vmatprep.mubr.msk.f32.mxu0 %vm1026_vm5, %v993_v8 }
 0x10a   : > { %v718_v25 = vpop.permute.xlu1 %717  ;;  %v720_v46 = vpop.permute.xlu0 %719 }
 0x10b   : > { %v962_v50 = vsel %vm378_vm0, %v3178_v43, %v720_v46  ;;  %v961_v58 = vsel %vm378_vm0, %v3164_v28, %v718_v25 }
 0x10e   : > { %v895_v0 = vpop.permute.xlu1 %894  ;;  %v897_v47 = vpop.permute.xlu0 %896 }
 0x10f   : > { %v994_v37 = vsel %vm964_vm4, %v961_v58, %v895_v0  ;;  %v995_v49 = vsel %vm964_vm4, %v962_v50, %v897_v47 }
 0x110   : > { %2429 = vmatmul.mubr.msk.f32.gmra.mrb[26].mxu1 %vm1026_vm5, %v994_v37  ;;  %2534 = vmatmul.mubr.msk.f32.gmra.mrb[24].mxu0 %vm1026_vm5, %v994_v37 }
 0x111   : > { %2431 = vmatprep.mubr.msk.f32.mxu1 %vm1026_vm5, %v995_v49  ;;  %2536 = vmatprep.mubr.msk.f32.mxu0 %vm1026_vm5, %v995_v49 }
 0x112   : > { %v722_v18 = vpop.permute.xlu1 %721  ;;  %v1006_v34 = vpop.permute.xlu0 %1005 }
 0x113   : > { %v1022_v43 = vsel %vm378_vm0, %v3197_v13, %v1006_v34  ;;  %v963_v28 = vsel %vm378_vm0, %v3180_v6, %v722_v18 }
 0x116   : > { %v899_v53 = vpop.permute.xlu1 %898 }
 0x117   : > { %v996_v35 = vsel %vm964_vm4, %v963_v28, %v899_v53  ;;  %v1017_v56 = vpop.permute.xlu0 %1016 }
 0x118   : > { %2432 = vmatmul.mubr.msk.f32.gmra.mrb[28].mxu1 %vm1026_vm5, %v996_v35  ;;  %2537 = vmatmul.mubr.msk.f32.gmra.mrb[26].mxu0 %vm1026_vm5, %v996_v35  ;;  %v1024_v59 = vsel %vm964_vm4, %v1022_v43, %v1017_v56 }
 0x119   : > { %2434 = vmatprep.mubr.msk.f32.mxu1 %vm1026_vm5, %v1024_v59  ;;  %2539 = vmatprep.mubr.msk.f32.mxu0 %vm1026_vm5, %v1024_v59 }
 0x11a   : > { %v1008_v19 = vpop.permute.xlu1 %1007 }
 0x11b   : > { %v1023_v13 = vsel %vm378_vm0, %v3199_v17, %v1008_v19 }
 0x11c   : > { %v1588_v44 = vpop.permute.xlu0 %1587 }
 0x11d   : > { %v1604_v48 = vsel %vm378_vm0, %v3226_v54, %v1588_v44 }
 0x11e   : > { %v1019_v6 = vpop.permute.xlu1 %1018 }
 0x11f   : > { %v1025_v3 = vsel %vm964_vm4, %v1023_v13, %v1019_v6 }
 0x120   : > { %2435 = vmatmul.mubr.msk.f32.gmra.mrb[30].mxu1 %vm1026_vm5, %v1025_v3  ;;  %2540 = vmatmul.mubr.msk.f32.gmra.mrb[28].mxu0 %vm1026_vm5, %v1025_v3  ;;  %v1599_v63 = vpop.permute.xlu0 %1598 }
 0x121   : > { %2467 = vmatprep.mubr.msk.f32.mxu1 %vm1026_vm5, %v3343_v27  ;;  %v1606_v2 = vsel %vm964_vm4, %v1604_v48, %v1599_v63 }
 0x122   : > { %2542 = vmatprep.mubr.msk.f32.mxu0 %vm1026_vm5, %v1606_v2 }
 0x124   : > { %2468 = vmatmul.mubr.msk.f32.vlgmr.msra.gmra.mrb[16].mxu1 %vm1026_vm5, %v3360_v21  ;;  %v1590_v17 = vpop.permute.xlu1 %1589 }
 0x125   : > { %2470 = vmatprep.mubr.msk.f32.mxu1 %vm1026_vm5, %v3363_v62  ;;  %v1605_v54 = vsel %vm378_vm0, %v3228_v55, %v1590_v17 }
 0x128   : > { %2471 = vmatmul.mubr.msk.f32.gmra.mrb[18].mxu1 %vm1026_vm5, %v3380_v38  ;;  %v1601_v60 = vpop.permute.xlu1 %1600 }
 0x129   : > { %2473 = vmatprep.mubr.msk.f32.mxu1 %vm1026_vm5, %v3383_v14  ;;  %v1607_v27 = vsel %vm964_vm4, %v1605_v54, %v1601_v60 }
 0x12a   : > { %2543 = vmatmul.mubr.msk.f32.gmra.mrb[30].mxu0 %vm1026_vm5, %v1607_v27 }
 0x12c   : > { %2474 = vmatmul.mubr.msk.f32.gmra.mrb[20].mxu1 %vm1026_vm5, %v3398_v10 }
 0x12d   : > { %2476 = vmatprep.mubr.msk.f32.mxu1 %vm1026_vm5, %v3401_v23 }
 0x130   : > { %2477 = vmatmul.mubr.msk.f32.gmra.mrb[22].mxu1 %vm1026_vm5, %v3419_v52 }
 0x131   : > { %2479 = vmatprep.mubr.msk.f32.mxu1 %vm1026_vm5, %v3422_v22 }
 0x134   : > { %2480 = vmatmul.mubr.msk.f32.gmra.mrb[24].mxu1 %vm1026_vm5, %v3441_v11 }
 0x135   : > { %2482 = vmatprep.mubr.msk.f32.mxu1 %vm1026_vm5, %v3444_v30 }
 0x138   : > { %2483 = vmatmul.mubr.msk.f32.gmra.mrb[26].mxu1 %vm1026_vm5, %v992_v40 }
 0x139   : > { %2485 = vmatprep.mubr.msk.f32.mxu1 %vm1026_vm5, %v993_v8 }
 0x13c   : > { %2486 = vmatmul.mubr.msk.f32.gmra.mrb[28].mxu1 %vm1026_vm5, %v994_v37 }
 0x13d   : > { %2488 = vmatprep.mubr.msk.f32.mxu1 %vm1026_vm5, %v995_v49 }
 0x140   : > { %2489 = vmatmul.mubr.msk.f32.gmra.mrb[30].mxu1 %vm1026_vm5, %v996_v35 }
 0x17b   : > { %v2391_v55 = vpop.f32.mrb[0].mxu1 }
 0x17c   : > { %v1189_v21 = vpop.f32.mrb[1].mxu1 }
 0x183   : > { %v2394_v62 = vpop.f32.mrb[2].mxu1 }
 0x184   : > { %v1199_v38 = vpop.f32.mrb[3].mxu1 }
 0x18b   : > { %v2397_v14 = vpop.f32.mrb[4].mxu1 }
 0x18c   : > { %v1209_v45 = vpop.f32.mrb[5].mxu1 }
 0x193   : > { %v2400_v51 = vpop.f32.mrb[6].mxu1 }
 0x194   : > { %v1219_v5 = vpop.f32.mrb[7].mxu1 }
 0x19b   : > { %v3528_v7 = vpop.f32.mrb[8].mxu1 }
 0x19c   : > { %v3530_v9 = vpop.f32.mrb[9].mxu1 }
 0x1a3   : > { %v3532_v10 = vpop.f32.mrb[10].mxu1 }
 0x1a4   : > { %v3534_v23 = vpop.f32.mrb[11].mxu1 }
 0x1ab   : > { %v3536_v61 = vpop.f32.mrb[12].mxu1 }
 0x1ac   : > { %v3538_v20 = vpop.f32.mrb[13].mxu1 }
 0x1af   : > { %v2499_v24 = vpop.f32.mrb[0].mxu0 }
 0x1b0   : > { %v2561_v29 = vadd.f32 %v2499_v24, %v2391_v55  ;;  %v1680_v1 = vpop.f32.mrb[1].mxu0 }
 0x1b1   : > { %v2562_v15 = vadd.f32 %v1680_v1, %v1189_v21 }
 0x1b2   : > { %1872 = vst.msk [vmem:[%s3545_s6 + $0x8] sm:$0xff] %vm378_vm0, %v2561_v29  ;;  %v1975_v26 = vmul.f32 %v2561_v29, %v2561_v29  ;;  %v1934_v11 = vsel %vm378_vm0, %v2561_v29, 0.0 }
 0x1b3   : > { %1871 = vst.msk [vmem:[%s3545_s6] sm:$0xff] %vm378_vm0, %v2562_v15  ;;  %v3551_v52 = vpop.f32.mrb[14].mxu1  ;;  %v2502_v22 = vpop.f32.mrb[2].mxu0  ;;  %v1974_v12 = vmul.f32 %v2562_v15, %v2562_v15  ;;  %v1903_v57 = vsel %vm378_vm0, %v2562_v15, 0.0 }
 0x1b4   : > { %v2563_v41 = vadd.f32 %v2502_v22, %v2394_v62  ;;  %v3553_v4 = vpop.f32.mrb[15].mxu1  ;;  %v1690_v31 = vpop.f32.mrb[3].mxu0  ;;  %v2037_v40 = vsel %vm378_vm0, %v1975_v26, 0.0 }
 0x1b5   : > { %v2564_v32 = vadd.f32 %v1690_v31, %v1199_v38  ;;  %v2006_v58 = vsel %vm378_vm0, %v1974_v12, 0.0 }
 0x1b6   : > { %1874 = vst.msk [vmem:[%s3545_s6 + $0x18] sm:$0xff] %vm378_vm0, %v2563_v41  ;;  %v1935_v30 = vsel %vm378_vm0, %v2563_v41, 0.0  ;;  %v1977_v42 = vmul.f32 %v2563_v41, %v2563_v41 }
 0x1b7   : > { %v1936_v16 = vadd.f32 %v1935_v30, %v1934_v11  ;;  %1873 = vst.msk [vmem:[%s3545_s6 + $0x10] sm:$0xff] %vm378_vm0, %v2564_v32  ;;  %v1904_v33 = vsel %vm378_vm0, %v2564_v32, 0.0  ;;  %v1976_v36 = vmul.f32 %v2564_v32, %v2564_v32  ;;  %v2505_v39 = vpop.f32.mrb[4].mxu0 }
 0x1b8   : > { %v2038_v8 = vsel %vm378_vm0, %v1977_v42, 0.0  ;;  %v1905_v25 = vadd.f32 %v1904_v33, %v1903_v57  ;;  %v2565_v46 = vadd.f32 %v2505_v39, %v2397_v14  ;;  %v1700_v50 = vpop.f32.mrb[5].mxu0 }
 0x1b9   : > { %v2039_v0 = vadd.f32 %v2038_v8, %v2037_v40  ;;  %v2007_v47 = vsel %vm378_vm0, %v1976_v36, 0.0  ;;  %v2566_v37 = vadd.f32 %v1700_v50, %v1209_v45 }
 0x1ba   : > { %v2008_v49 = vadd.f32 %v2007_v47, %v2006_v58  ;;  %1876 = vst.msk [vmem:[%s3545_s6 + $0x28] sm:$0xff] %vm378_vm0, %v2565_v46  ;;  %v1937_v18 = vsel %vm378_vm0, %v2565_v46, 0.0  ;;  %v1979_v34 = vmul.f32 %v2565_v46, %v2565_v46 }
 0x1bb   : > { %v1938_v43 = vadd.f32 %v1937_v18, %v1936_v16  ;;  %1875 = vst.msk [vmem:[%s3545_s6 + $0x20] sm:$0xff] %vm378_vm0, %v2566_v37  ;;  %v1906_v28 = vsel %vm378_vm0, %v2566_v37, 0.0  ;;  %v1978_v53 = vmul.f32 %v2566_v37, %v2566_v37  ;;  %v2508_v35 = vpop.f32.mrb[6].mxu0 }
 0x1bc   : > { %v2040_v56 = vsel %vm378_vm0, %v1979_v34, 0.0  ;;  %v1907_v59 = vadd.f32 %v1906_v28, %v1905_v25  ;;  %v2567_v19 = vadd.f32 %v2508_v35, %v2400_v51  ;;  %v1710_v44 = vpop.f32.mrb[7].mxu0 }
 0x1bd   : > { %v2041_v13 = vadd.f32 %v2040_v56, %v2039_v0  ;;  %v2009_v6 = vsel %vm378_vm0, %v1978_v53, 0.0  ;;  %v2568_v48 = vadd.f32 %v1710_v44, %v1219_v5 }
 0x1be   : > { %v2010_v3 = vadd.f32 %v2009_v6, %v2008_v49  ;;  %1878 = vst.msk [vmem:[%s3545_s6 + $0x38] sm:$0xff] %vm378_vm0, %v2567_v19  ;;  %v1939_v63 = vsel %vm378_vm0, %v2567_v19, 0.0  ;;  %v1981_v2 = vmul.f32 %v2567_v19, %v2567_v19 }
 0x1bf   : > { %v1940_v17 = vadd.f32 %v1939_v63, %v1938_v43  ;;  %1877 = vst.msk [vmem:[%s3545_s6 + $0x30] sm:$0xff] %vm378_vm0, %v2568_v48  ;;  %v1908_v54 = vsel %vm378_vm0, %v2568_v48, 0.0  ;;  %v1980_v60 = vmul.f32 %v2568_v48, %v2568_v48  ;;  %v2511_v27 = vpop.f32.mrb[8].mxu0 }
 0x1c0   : > { %v2042_v55 = vsel %vm378_vm0, %v1981_v2, 0.0  ;;  %v1909_v21 = vadd.f32 %v1908_v54, %v1907_v59  ;;  %v2569_v62 = vadd.f32 %v2511_v27, %v3528_v7  ;;  %v1720_v38 = vpop.f32.mrb[9].mxu0 }
 0x1c1   : > { %v2043_v14 = vadd.f32 %v2042_v55, %v2041_v13  ;;  %v2011_v45 = vsel %vm378_vm0, %v1980_v60, 0.0  ;;  %v2570_v51 = vadd.f32 %v1720_v38, %v3530_v9 }
 0x1c2   : > { %v2012_v5 = vadd.f32 %v2011_v45, %v2010_v3  ;;  %1880 = vst.msk [vmem:[%s3545_s6 + $0x48] sm:$0xff] %vm378_vm0, %v2569_v62  ;;  %v1941_v24 = vsel %vm378_vm0, %v2569_v62, 0.0  ;;  %v1983_v29 = vmul.f32 %v2569_v62, %v2569_v62 }
 0x1c3   : > { %v1942_v1 = vadd.f32 %v1941_v24, %v1940_v17  ;;  %1879 = vst.msk [vmem:[%s3545_s6 + $0x40] sm:$0xff] %vm378_vm0, %v2570_v51  ;;  %v1910_v15 = vsel %vm378_vm0, %v2570_v51, 0.0  ;;  %v1982_v7 = vmul.f32 %v2570_v51, %v2570_v51  ;;  %v2514_v22 = vpop.f32.mrb[10].mxu0 }
 0x1c4   : > { %v2044_v26 = vsel %vm378_vm0, %v1983_v29, 0.0  ;;  %v1911_v41 = vadd.f32 %v1910_v15, %v1909_v21  ;;  %v2571_v9 = vadd.f32 %v2514_v22, %v3532_v10  ;;  %v1730_v31 = vpop.f32.mrb[11].mxu0 }
 0x1c5   : > { %v2045_v12 = vadd.f32 %v2044_v26, %v2043_v14  ;;  %v2013_v32 = vsel %vm378_vm0, %v1982_v7, 0.0  ;;  %v2572_v11 = vadd.f32 %v1730_v31, %v3534_v23 }
 0x1c6   : > { %v2014_v30 = vadd.f32 %v2013_v32, %v2012_v5  ;;  %1882 = vst.msk [vmem:[%s3545_s6 + $0x58] sm:$0xff] %vm378_vm0, %v2571_v9  ;;  %v1943_v42 = vsel %vm378_vm0, %v2571_v9, 0.0  ;;  %v1985_v57 = vmul.f32 %v2571_v9, %v2571_v9 }
 0x1c7   : > { %v1944_v16 = vadd.f32 %v1943_v42, %v1942_v1  ;;  %1881 = vst.msk [vmem:[%s3545_s6 + $0x50] sm:$0xff] %vm378_vm0, %v2572_v11  ;;  %v1912_v33 = vsel %vm378_vm0, %v2572_v11, 0.0  ;;  %v1984_v10 = vmul.f32 %v2572_v11, %v2572_v11  ;;  %v2517_v36 = vpop.f32.mrb[12].mxu0 }
 0x1c8   : > { %v2046_v39 = vsel %vm378_vm0, %v1985_v57, 0.0  ;;  %v1913_v40 = vadd.f32 %v1912_v33, %v1911_v41  ;;  %v2573_v23 = vadd.f32 %v2517_v36, %v3536_v61  ;;  %v1740_v8 = vpop.f32.mrb[13].mxu0 }
 0x1c9   : > { %v2047_v25 = vadd.f32 %v2046_v39, %v2045_v12  ;;  %v2015_v46 = vsel %vm378_vm0, %v1984_v10, 0.0  ;;  %v2574_v50 = vadd.f32 %v1740_v8, %v3538_v20 }
 0x1ca   : > { %v2016_v58 = vadd.f32 %v2015_v46, %v2014_v30  ;;  %1884 = vst.msk [vmem:[%s3545_s6 + $0x68] sm:$0xff] %vm378_vm0, %v2573_v23  ;;  %v1945_v0 = vsel %vm378_vm0, %v2573_v23, 0.0  ;;  %v1987_v47 = vmul.f32 %v2573_v23, %v2573_v23 }
 0x1cb   : > { %v1946_v37 = vadd.f32 %v1945_v0, %v1944_v16  ;;  %1883 = vst.msk [vmem:[%s3545_s6 + $0x60] sm:$0xff] %vm378_vm0, %v2574_v50  ;;  %v1914_v49 = vsel %vm378_vm0, %v2574_v50, 0.0  ;;  %v1986_v61 = vmul.f32 %v2574_v50, %v2574_v50  ;;  %v2520_v18 = vpop.f32.mrb[14].mxu0 }
 0x1cc   : > { %v2048_v34 = vsel %vm378_vm0, %v1987_v47, 0.0  ;;  %v1915_v43 = vadd.f32 %v1914_v49, %v1913_v40  ;;  %v2575_v20 = vadd.f32 %v2520_v18, %v3551_v52  ;;  %v1750_v28 = vpop.f32.mrb[15].mxu0 }
 0x1cd   : > { %v2049_v53 = vadd.f32 %v2048_v34, %v2047_v25  ;;  %v2017_v35 = vsel %vm378_vm0, %v1986_v61, 0.0  ;;  %v2576_v56 = vadd.f32 %v1750_v28, %v3553_v4 }
 0x1ce   : > { %v2018_v59 = vadd.f32 %v2017_v35, %v2016_v58  ;;  %1886 = vst.msk [vmem:[%s3545_s6 + $0x78] sm:$0xff] %vm378_vm0, %v2575_v20  ;;  %v1947_v19 = vsel %vm378_vm0, %v2575_v20, 0.0  ;;  %v1989_v44 = vmul.f32 %v2575_v20, %v2575_v20 }
 0x1cf   : > { %v1948_v13 = vadd.f32 %v1947_v19, %v1946_v37  ;;  %1885 = vst.msk [vmem:[%s3545_s6 + $0x70] sm:$0xff] %vm378_vm0, %v2576_v56  ;;  %v1916_v6 = vsel %vm378_vm0, %v2576_v56, 0.0  ;;  %v1988_v48 = vmul.f32 %v2576_v56, %v2576_v56  ;;  %v2523_v3 = vpop.f32.mrb[16].mxu0 }
 0x1d0   : > { %v2050_v52 = vsel %vm378_vm0, %v1989_v44, 0.0  ;;  %v1917_v63 = vadd.f32 %v1916_v6, %v1915_v43  ;;  %v1760_v2 = vpop.f32.mrb[17].mxu0 }
 0x1d1   : > { %v2051_v17 = vadd.f32 %v2050_v52, %v2049_v53  ;;  %v2019_v4 = vsel %vm378_vm0, %v1988_v48, 0.0 }
 0x1d2   : > { %v2020_v54 = vadd.f32 %v2019_v4, %v2018_v59 }
 0x1d3   : > { %v2526_v60 = vpop.f32.mrb[18].mxu0 }
 0x1d4   : > { %v1770_v27 = vpop.f32.mrb[19].mxu0 }
 0x1d7   : > { %v2529_v55 = vpop.f32.mrb[20].mxu0 }
 0x1d8   : > { %v1780_v21 = vpop.f32.mrb[21].mxu0 }
 0x1db   : > { %v2532_v62 = vpop.f32.mrb[22].mxu0 }
 0x1dc   : > { %v1790_v38 = vpop.f32.mrb[23].mxu0 }
 0x1e3   : > { %v3623_v14 = vpop.f32.mrb[24].mxu0 }
 0x1e4   : > { %v3625_v45 = vpop.f32.mrb[25].mxu0 }
 0x1eb   : > { %v3627_v51 = vpop.f32.mrb[26].mxu0 }
 0x1ec   : > { %v3629_v5 = vpop.f32.mrb[27].mxu0 }
 0x1f3   : > { %v3631_v24 = vpop.f32.mrb[28].mxu0 }
 0x1f4   : > { %v3633_v29 = vpop.f32.mrb[29].mxu0 }
 0x1f7   : > { %v2469_v1 = vpop.f32.mrb[16].mxu1 }
 0x1f8   : > { %v2577_v15 = vadd.f32 %v2523_v3, %v2469_v1  ;;  %v1500_v7 = vpop.f32.mrb[17].mxu1 }
 0x1f9   : > { %v2578_v22 = vadd.f32 %v1760_v2, %v1500_v7 }
 0x1fa   : > { %1888 = vst.msk [vmem:[%s3545_s6 + $0x88] sm:$0xff] %vm378_vm0, %v2577_v15  ;;  %v1949_v26 = vsel %vm378_vm0, %v2577_v15, 0.0  ;;  %v1991_v41 = vmul.f32 %v2577_v15, %v2577_v15 }
 0x1fb   : > { %v1950_v9 = vadd.f32 %v1949_v26, %v1948_v13  ;;  %1887 = vst.msk [vmem:[%s3545_s6 + $0x80] sm:$0xff] %vm378_vm0, %v2578_v22  ;;  %v1918_v31 = vsel %vm378_vm0, %v2578_v22, 0.0  ;;  %v1990_v12 = vmul.f32 %v2578_v22, %v2578_v22  ;;  %v2472_v32 = vpop.f32.mrb[18].mxu1 }
 0x1fc   : > { %v2052_v11 = vsel %vm378_vm0, %v1991_v41, 0.0  ;;  %v1919_v30 = vadd.f32 %v1918_v31, %v1917_v63  ;;  %v2579_v42 = vadd.f32 %v2526_v60, %v2472_v32  ;;  %v1510_v57 = vpop.f32.mrb[19].mxu1 }
 0x1fd   : > { %v2053_v16 = vadd.f32 %v2052_v11, %v2051_v17  ;;  %v2021_v33 = vsel %vm378_vm0, %v1990_v12, 0.0  ;;  %v2580_v10 = vadd.f32 %v1770_v27, %v1510_v57  ;;  %v3643_v36 = vpop.f32.mrb[30].mxu0 }
 0x1fe   : > { %v2022_v39 = vadd.f32 %v2021_v33, %v2020_v54  ;;  %1890 = vst.msk [vmem:[%s3545_s6 + $0x98] sm:$0xff] %vm378_vm0, %v2579_v42  ;;  %v1951_v40 = vsel %vm378_vm0, %v2579_v42, 0.0  ;;  %v1993_v23 = vmul.f32 %v2579_v42, %v2579_v42  ;;  %v3648_v8 = vpop.f32.mrb[31].mxu0 }
 0x1ff   : > { %v1952_v25 = vadd.f32 %v1951_v40, %v1950_v9  ;;  %1889 = vst.msk [vmem:[%s3545_s6 + $0x90] sm:$0xff] %vm378_vm0, %v2580_v10  ;;  %v1920_v46 = vsel %vm378_vm0, %v2580_v10, 0.0  ;;  %v1992_v50 = vmul.f32 %v2580_v10, %v2580_v10  ;;  %v2475_v58 = vpop.f32.mrb[20].mxu1 }
 0x200   : > { %v2054_v0 = vsel %vm378_vm0, %v1993_v23, 0.0  ;;  %v1921_v47 = vadd.f32 %v1920_v46, %v1919_v30  ;;  %v2581_v37 = vadd.f32 %v2529_v55, %v2475_v58  ;;  %v1520_v49 = vpop.f32.mrb[21].mxu1 }
 0x201   : > { %v2055_v61 = vadd.f32 %v2054_v0, %v2053_v16  ;;  %v2023_v18 = vsel %vm378_vm0, %v1992_v50, 0.0  ;;  %v2582_v34 = vadd.f32 %v1780_v21, %v1520_v49 }
 0x202   : > { %v2024_v43 = vadd.f32 %v2023_v18, %v2022_v39  ;;  %1892 = vst.msk [vmem:[%s3545_s6 + $0xa8] sm:$0xff] %vm378_vm0, %v2581_v37  ;;  %v1953_v20 = vsel %vm378_vm0, %v2581_v37, 0.0  ;;  %v1995_v28 = vmul.f32 %v2581_v37, %v2581_v37 }
 0x203   : > { %v1954_v53 = vadd.f32 %v1953_v20, %v1952_v25  ;;  %1891 = vst.msk [vmem:[%s3545_s6 + $0xa0] sm:$0xff] %vm378_vm0, %v2582_v34  ;;  %v1922_v35 = vsel %vm378_vm0, %v2582_v34, 0.0  ;;  %v1994_v56 = vmul.f32 %v2582_v34, %v2582_v34  ;;  %v2478_v59 = vpop.f32.mrb[22].mxu1 }
 0x204   : > { %v2056_v19 = vsel %vm378_vm0, %v1995_v28, 0.0  ;;  %v1923_v44 = vadd.f32 %v1922_v35, %v1921_v47  ;;  %v2583_v13 = vadd.f32 %v2532_v62, %v2478_v59  ;;  %v1530_v6 = vpop.f32.mrb[23].mxu1 }
 0x205   : > { %v2057_v48 = vadd.f32 %v2056_v19, %v2055_v61  ;;  %v2025_v3 = vsel %vm378_vm0, %v1994_v56, 0.0  ;;  %v2584_v52 = vadd.f32 %v1790_v38, %v1530_v6 }
 0x206   : > { %v2026_v63 = vadd.f32 %v2025_v3, %v2024_v43  ;;  %1894 = vst.msk [vmem:[%s3545_s6 + $0xb8] sm:$0xff] %vm378_vm0, %v2583_v13  ;;  %v1955_v2 = vsel %vm378_vm0, %v2583_v13, 0.0  ;;  %v1997_v17 = vmul.f32 %v2583_v13, %v2583_v13 }
 0x207   : > { %v1956_v4 = vadd.f32 %v1955_v2, %v1954_v53  ;;  %1893 = vst.msk [vmem:[%s3545_s6 + $0xb0] sm:$0xff] %vm378_vm0, %v2584_v52  ;;  %v1924_v54 = vsel %vm378_vm0, %v2584_v52, 0.0  ;;  %v1996_v60 = vmul.f32 %v2584_v52, %v2584_v52  ;;  %v2481_v27 = vpop.f32.mrb[24].mxu1 }
 0x208   : > { %v2058_v55 = vsel %vm378_vm0, %v1997_v17, 0.0  ;;  %v1925_v21 = vadd.f32 %v1924_v54, %v1923_v44  ;;  %v2585_v62 = vadd.f32 %v3623_v14, %v2481_v27  ;;  %v1540_v38 = vpop.f32.mrb[25].mxu1 }
 0x209   : > { %v2059_v1 = vadd.f32 %v2058_v55, %v2057_v48  ;;  %v2027_v15 = vsel %vm378_vm0, %v1996_v60, 0.0  ;;  %v2586_v7 = vadd.f32 %v3625_v45, %v1540_v38 }
 0x20a   : > { %v2028_v22 = vadd.f32 %v2027_v15, %v2026_v63  ;;  %1896 = vst.msk [vmem:[%s3545_s6 + $0xc8] sm:$0xff] %vm378_vm0, %v2585_v62  ;;  %v1957_v26 = vsel %vm378_vm0, %v2585_v62, 0.0  ;;  %v1999_v41 = vmul.f32 %v2585_v62, %v2585_v62 }
 0x20b   : > { %v1958_v9 = vadd.f32 %v1957_v26, %v1956_v4  ;;  %1895 = vst.msk [vmem:[%s3545_s6 + $0xc0] sm:$0xff] %vm378_vm0, %v2586_v7  ;;  %v1926_v31 = vsel %vm378_vm0, %v2586_v7, 0.0  ;;  %v1998_v14 = vmul.f32 %v2586_v7, %v2586_v7  ;;  %v2484_v12 = vpop.f32.mrb[26].mxu1 }
 0x20c   : > { %v2060_v32 = vsel %vm378_vm0, %v1999_v41, 0.0  ;;  %v1927_v11 = vadd.f32 %v1926_v31, %v1925_v21  ;;  %v2587_v45 = vadd.f32 %v3627_v51, %v2484_v12  ;;  %v1550_v30 = vpop.f32.mrb[27].mxu1 }
 0x20d   : > { %v2061_v42 = vadd.f32 %v2060_v32, %v2059_v1  ;;  %v2029_v57 = vsel %vm378_vm0, %v1998_v14, 0.0  ;;  %v2588_v16 = vadd.f32 %v3629_v5, %v1550_v30 }
 0x20e   : > { %v2030_v33 = vadd.f32 %v2029_v57, %v2028_v22  ;;  %1898 = vst.msk [vmem:[%s3545_s6 + $0xd8] sm:$0xff] %vm378_vm0, %v2587_v45  ;;  %v1959_v10 = vsel %vm378_vm0, %v2587_v45, 0.0  ;;  %v2001_v39 = vmul.f32 %v2587_v45, %v2587_v45 }
 0x20f   : > { %v1960_v40 = vadd.f32 %v1959_v10, %v1958_v9  ;;  %1897 = vst.msk [vmem:[%s3545_s6 + $0xd0] sm:$0xff] %vm378_vm0, %v2588_v16  ;;  %v1928_v23 = vsel %vm378_vm0, %v2588_v16, 0.0  ;;  %v2000_v51 = vmul.f32 %v2588_v16, %v2588_v16  ;;  %v2487_v25 = vpop.f32.mrb[28].mxu1 }
 0x210   : > { %v2062_v46 = vsel %vm378_vm0, %v2001_v39, 0.0  ;;  %v1929_v50 = vadd.f32 %v1928_v23, %v1927_v11  ;;  %v2589_v5 = vadd.f32 %v3631_v24, %v2487_v25  ;;  %v1560_v58 = vpop.f32.mrb[29].mxu1 }
 0x211   : > { %v2063_v0 = vadd.f32 %v2062_v46, %v2061_v42  ;;  %v2031_v47 = vsel %vm378_vm0, %v2000_v51, 0.0  ;;  %v2590_v37 = vadd.f32 %v3633_v29, %v1560_v58 }
 0x212   : > { %v2032_v49 = vadd.f32 %v2031_v47, %v2030_v33  ;;  %1900 = vst.msk [vmem:[%s3545_s6 + $0xe8] sm:$0xff] %vm378_vm0, %v2589_v5  ;;  %v1961_v61 = vsel %vm378_vm0, %v2589_v5, 0.0  ;;  %v2003_v18 = vmul.f32 %v2589_v5, %v2589_v5 }
 0x213   : > { %v1962_v34 = vadd.f32 %v1961_v61, %v1960_v40  ;;  %1899 = vst.msk [vmem:[%s3545_s6 + $0xe0] sm:$0xff] %vm378_vm0, %v2590_v37  ;;  %v1930_v43 = vsel %vm378_vm0, %v2590_v37, 0.0  ;;  %v2002_v24 = vmul.f32 %v2590_v37, %v2590_v37  ;;  %v2490_v20 = vpop.f32.mrb[30].mxu1 }
 0x214   : > { %v2064_v28 = vsel %vm378_vm0, %v2003_v18, 0.0  ;;  %v1931_v53 = vadd.f32 %v1930_v43, %v1929_v50  ;;  %v2591_v29 = vadd.f32 %v3643_v36, %v2490_v20  ;;  %v1570_v35 = vpop.f32.mrb[31].mxu1 }
 0x215   : > { %v2065_v56 = vadd.f32 %v2064_v28, %v2063_v0  ;;  %v2033_v59 = vsel %vm378_vm0, %v2002_v24, 0.0  ;;  %v2592_v19 = vadd.f32 %v3648_v8, %v1570_v35 }
 0x216   : > { %v2034_v44 = vadd.f32 %v2033_v59, %v2032_v49  ;;  %1902 = vst.msk [vmem:[%s3545_s6 + $0xf8] sm:$0xff] %vm378_vm0, %v2591_v29  ;;  %v1963_v13 = vsel %vm378_vm0, %v2591_v29, 0.0  ;;  %v2005_v6 = vmul.f32 %v2591_v29, %v2591_v29 }
 0x217   : > { %v1964_v48 = vadd.f32 %v1963_v13, %v1962_v34  ;;  %1901 = vst.msk [vmem:[%s3545_s6 + $0xf0] sm:$0xff] %vm378_vm0, %v2592_v19  ;;  %v1932_v3 = vsel %vm378_vm0, %v2592_v19, 0.0  ;;  %v2004_v52 = vmul.f32 %v2592_v19, %v2592_v19 }
 0x218   : > { %v2066_v36 = vsel %vm378_vm0, %v2005_v6, 0.0  ;;  %v1933_v63 = vadd.f32 %v1932_v3, %v1931_v53 }
 0x219   : > { %v1966_v2 = vsel %vm378_vm0, %v1964_v48, 0.0  ;;  %v2067_v17 = vadd.f32 %v2066_v36, %v2065_v56  ;;  %v2035_v8 = vsel %vm378_vm0, %v2004_v52, 0.0 }
 0x21a   : > { %v1965_v4 = vsel %vm378_vm0, %v1933_v63, 0.0  ;;  %v2036_v54 = vadd.f32 %v2035_v8, %v2034_v44 }
 0x21b   : > { %v2069_v60 = vsel %vm378_vm0, %v2067_v17, 0.0  ;;  %v1967_v27 = vadd.f32 %v1966_v2, %v1965_v4 }
 0x21c   : > { %v2068_v55 = vsel %vm378_vm0, %v2036_v54, 0.0 }
 0x21d   : > { %v1968_v21 = vrot.slane %v1967_v27, 4  ;;  %v2070_v62 = vadd.f32 %v2069_v60, %v2068_v55 }
 0x21f   : > { %v1969_v38 = vadd.f32 %v1968_v21, %v1967_v27  ;;  %v2071_v1 = vrot.slane %v2070_v62, 4 }
 0x221   : > { %v1970_v15 = vrot.slane %v1969_v38, 2  ;;  %v2072_v7 = vadd.f32 %v2071_v1, %v2070_v62 }
 0x223   : > { %v1971_v22 = vadd.f32 %v1970_v15, %v1969_v38  ;;  %v2073_v26 = vrot.slane %v2072_v7, 2 }
 0x225   : > { %v1972_v41 = vrot.slane %v1971_v22, 1  ;;  %v2074_v9 = vadd.f32 %v2073_v26, %v2072_v7 }
 0x227   : > { %v2075_v31 = vrot.slane %v2074_v9, 1  ;;  %v1973_v14 = vadd.f32 %v1972_v41, %v1971_v22 }
 0x229   : > { %v2076_v12 = vadd.f32 %v2075_v31, %v2074_v9 }
 0x22b   : > { %v2078_v32 = vsel %vm2077_vm6, %v1973_v14, %v2076_v12 }
 0x22c   : > { %2079 = vst.msk [vmem:[%s235_s9] sm:$0x3] %vm381_vm1, %v2078_v32 }
 0x22d PF: > { %s16_s18 = sadd.s32 1, %s2643_s18  }
 0x22e   : > { %p13_p4 = scmp.ge.s32.totalorder %s16_s18, 4  }
 0x230   :  { %15 = sbr.rel (!%p13_p4) target bundleno = 1 (0x1), region = 79 }

</bundles_post_ra>
